<compile_context>
chip_gen: v7x
topology: tpu7x:2x2x1
jax: 0.10.0
libtpu: 0.0.40
codegen_flags: <defaults>
</compile_context>

<pallas_src>
import math
from functools import partial

import jax
import jax.numpy as jnp
from jax import lax
from jax.experimental import pallas as pl
from jax.experimental.pallas import tpu as pltpu

F32 = jnp.float32


def _vmem():
    return pl.BlockSpec(memory_space=pltpu.MemorySpace.VMEM)


def _layer_norm(v, g, b, eps=1e-5):
    mu = jnp.mean(v, axis=-1, keepdims=True)
    var = jnp.mean((v - mu) ** 2, axis=-1, keepdims=True)
    return (v - mu) * lax.rsqrt(var + eps) * g + b


def _fro_ortho(w):
    """|| W @ W^T - I ||_F as a (1,1) array (NT dot_general, no .T materialized)."""
    n = w.shape[0]
    g = lax.dot_general(w, w, (((1,), (1,)), ((), ())), preferred_element_type=F32)
    eye = (lax.broadcasted_iota(jnp.int32, (n, n), 0)
           == lax.broadcasted_iota(jnp.int32, (n, n), 1)).astype(F32)
    d = g - eye
    return jnp.sqrt(jnp.sum(d * d, axis=(0, 1), keepdims=True))


# ---------------------------------------------------------------------------
# Fused forward kernel
# ---------------------------------------------------------------------------
def _qtype_fused_kernel(
        # runtime inputs
        x_ref, pj_ref,
        # big weights (pre-transposed once, outside the hot path)
        emb_wt_ref, pos_ref, pjw_t_ref,
        wih_ref, whh_ref,
        wqkv_ref, wo_ref, w1_ref, w2_ref, projw_ref,
        # packed small-vector slab (biases + LayerNorm params)
        slab_ref,
        # raw weights for the orthogonality regularizer
        wih_full_ref, whh_full_ref, qkv0_ref, proj_full_ref,
        # outputs
        out_ref, loss_ref,
        *, num_heads, num_layers):
    B, S, NQ = x_ref.shape
    E = emb_wt_ref.shape[1]
    H = num_heads
    dh = E // H
    L = num_layers
    Fd = w1_ref.shape[2]
    BS = B * S
    scale = 1.0 / math.sqrt(dh)

    # --- packed bias/LayerNorm slab: one row per vector, lane-aligned ---
    slab = slab_ref[...]

    def vec(row, width):
        return slab[row:row + 1, :width]          # (1, width)

    R_EMB_B, R_PJB, R_LSTM_B, R_LNG, R_LNB = 0, 1, 2, 3, 4

    def lrow(l, k):                                # per-layer rows
        return 5 + l * 8 + k

    R_PROJB = 5 + L * 8

    # ---- 1) embedding + sinusoidal position + param_J embedding (batched over B*S) ----
    x_flat = x_ref[...].reshape(BS, NQ)
    emb = jnp.dot(x_flat, emb_wt_ref[...], preferred_element_type=F32) + vec(R_EMB_B, E)
    pj = jnp.dot(pj_ref[...], pjw_t_ref[...], preferred_element_type=F32) + vec(R_PJB, E)
    pos = pos_ref[...][:S, :]
    h0 = emb.reshape(B, S, E) + pos[None, :, :] + pj[:, None, :]          # (B, S, E)
    # TODO(synk): training-mode gaussian noise (+0.05 * randn) and dropout omitted (eval path).

    # ---- 2) LSTM: fused input projection (hoisted) + fused recurrent matmul ----
    h0_flat = h0.reshape(BS, E)
    xg = jnp.dot(h0_flat, wih_ref[...], preferred_element_type=F32) + vec(R_LSTM_B, 4 * E)
    xg3 = xg.reshape(B, S, 4 * E)                  # (B, S, 4E), gate order i,f,g,o
    whh = whh_ref[...]                             # (E, 4E), hoisted load
    ln_g = vec(R_LNG, E)
    ln_b = vec(R_LNB, E)
    h = jnp.zeros((B, E), F32)
    c = jnp.zeros((B, E), F32)
    outs = []
    for t in range(S):                             # serial recurrence (static unroll)
        pre = xg3[:, t, :] + jnp.dot(h, whh, preferred_element_type=F32)  # (B, 4E), 128 lanes
        gi = jax.nn.sigmoid(pre[:, 0:E])
        gf = jax.nn.sigmoid(pre[:, E:2 * E])
        gg = jnp.tanh(pre[:, 2 * E:3 * E])
        go = jax.nn.sigmoid(pre[:, 3 * E:4 * E])
        c = gf * c + gi * gg
        h = go * jnp.tanh(c)
        outs.append(_layer_norm(h, ln_g, ln_b))    # LayerNorm(emb_dim), eps=1e-5
    # (B, S, E) -> flat (B*S, E); row index = b*S + t (b-major)
    xf = jnp.stack(outs, axis=1).reshape(BS, E)

    # ---- 3) transformer encoder layers (post-norm, ReLU FFN, eval mode) ----
    for l in range(L):
        # fused QKV: one lane-dense (BS,E)@(E,3E) matmul
        qkv = jnp.dot(xf, wqkv_ref[l], preferred_element_type=F32) + vec(lrow(l, 0), 3 * E)
        ctx_heads = []
        for hd in range(H):
            q = qkv[:, hd * dh:(hd + 1) * dh].reshape(B, S, dh)
            k = qkv[:, E + hd * dh:E + (hd + 1) * dh].reshape(B, S, dh)
            v = qkv[:, 2 * E + hd * dh:2 * E + (hd + 1) * dh].reshape(B, S, dh)
            sc = jnp.einsum('bqd,bkd->bqk', q, k, preferred_element_type=F32) * scale
            sc = sc - jnp.max(sc, axis=-1, keepdims=True)
            p = jnp.exp(sc)
            p = p * pl.reciprocal(jnp.sum(p, axis=-1, keepdims=True), approx=True)
            ctx = jnp.einsum('bqk,bkd->bqd', p, v, preferred_element_type=F32)
            ctx_heads.append(ctx.reshape(BS, dh))
        ctx_all = jnp.concatenate(ctx_heads, axis=-1)                     # (BS, E) head concat
        attn = jnp.dot(ctx_all, wo_ref[l], preferred_element_type=F32) + vec(lrow(l, 1), E)
        y = _layer_norm(xf + attn, vec(lrow(l, 2), E), vec(lrow(l, 3), E))
        ff = jnp.maximum(
            jnp.dot(y, w1_ref[l], preferred_element_type=F32) + vec(lrow(l, 4), Fd), 0.0)
        ff = jnp.dot(ff, w2_ref[l], preferred_element_type=F32) + vec(lrow(l, 5), E)
        xf = _layer_norm(y + ff, vec(lrow(l, 6), E), vec(lrow(l, 7), E))

    # ---- 4) flattened (seq*emb) projection: ONE matmul with K = S*E ----
    xf3 = xf.reshape(B, S, E)
    xcat = jnp.concatenate([xf3[:, s, :] for s in range(S)], axis=-1)     # (B, S*E)
    out_ref[...] = (jnp.dot(xcat, projw_ref[...], preferred_element_type=F32)
                    + vec(R_PROJB, NQ))

    # ---- 5) orthogonality regularizer: all 6 Frobenius terms in this same kernel ----
    total = _fro_ortho(wih_full_ref[...]) + _fro_ortho(whh_full_ref[...])
    for i in range(3):                             # layer-0 query / key / value weights
        total = total + _fro_ortho(qkv0_ref[i])
    total = total + _fro_ortho(proj_full_ref[...])
    loss_ref[...] = total


# ---------------------------------------------------------------------------
# Parameter init (deterministic, PyTorch-style uniform fan-in bounds)
# ---------------------------------------------------------------------------
def _uniform(key, shape, bound):
    return jax.random.uniform(key, shape, F32, minval=-bound, maxval=bound)


def init_params(key, n_qubits, shots, emb_dim, num_layers, dim_feedforward):
    ki = iter(jax.random.split(key, 64))
    p = {}
    b = 1.0 / math.sqrt(n_qubits)
    p['emb_w'] = _uniform(next(ki), (emb_dim, n_qubits), b)
    p['emb_b'] = _uniform(next(ki), (emb_dim,), b)
    b = 1.0 / math.sqrt(2.0)
    p['pj_w'] = _uniform(next(ki), (emb_dim, 2), b)
    p['pj_b'] = _uniform(next(ki), (emb_dim,), b)
    # sinusoidal position encoding (non-trainable), max_len = shots
    position = jnp.arange(shots, dtype=F32)[:, None]
    div_term = jnp.exp(jnp.arange(0, emb_dim, 2, dtype=F32) * (-math.log(10000.0) / emb_dim))
    ang = position * div_term
    p['pos'] = jnp.stack([jnp.sin(ang), jnp.cos(ang)], axis=-1).reshape(shots, emb_dim)
    # LSTM
    b = 1.0 / math.sqrt(emb_dim)
    p['lstm_w_ih'] = _uniform(next(ki), (4 * emb_dim, emb_dim), b)
    p['lstm_w_hh'] = _uniform(next(ki), (4 * emb_dim, emb_dim), b)
    p['lstm_b_ih'] = _uniform(next(ki), (4 * emb_dim,), b)
    p['lstm_b_hh'] = _uniform(next(ki), (4 * emb_dim,), b)
    p['lstm_ln_g'] = jnp.ones((emb_dim,), F32)
    p['lstm_ln_b'] = jnp.zeros((emb_dim,), F32)
    # transformer encoder layers
    layers = []
    lb = 1.0 / math.sqrt(emb_dim)
    fb = 1.0 / math.sqrt(dim_feedforward)
    for _ in range(num_layers):
        layers.append(dict(
            in_proj_w=_uniform(next(ki), (3 * emb_dim, emb_dim), lb),
            in_proj_b=_uniform(next(ki), (3 * emb_dim,), lb),
            out_w=_uniform(next(ki), (emb_dim, emb_dim), lb),
            out_b=_uniform(next(ki), (emb_dim,), lb),
            ln1_g=jnp.ones((emb_dim,), F32), ln1_b=jnp.zeros((emb_dim,), F32),
            lin1_w=_uniform(next(ki), (dim_feedforward, emb_dim), lb),
            lin1_b=_uniform(next(ki), (dim_feedforward,), lb),
            lin2_w=_uniform(next(ki), (emb_dim, dim_feedforward), fb),
            lin2_b=_uniform(next(ki), (emb_dim,), fb),
            ln2_g=jnp.ones((emb_dim,), F32), ln2_b=jnp.zeros((emb_dim,), F32),
        ))
    p['layers'] = layers
    pb = 1.0 / math.sqrt(shots * emb_dim)
    p['proj_w'] = _uniform(next(ki), (n_qubits, shots * emb_dim), pb)
    p['proj_b'] = _uniform(next(ki), (n_qubits,), pb)
    return p


# ---------------------------------------------------------------------------
# One-time weight relayout for the kernel (NOT in the per-call hot path)
# ---------------------------------------------------------------------------
def prepare_params(p):
    E = p['emb_w'].shape[0]
    NQ = p['emb_w'].shape[1]
    Fd = p['layers'][0]['lin1_w'].shape[0]
    L = len(p['layers'])

    k = {}
    k['emb_wt'] = p['emb_w'].T                                    # (NQ, E)
    k['pos'] = p['pos']                                           # (S, E)
    k['pjw_t'] = p['pj_w'].T                                      # (2, E)
    # LSTM: fused transposed weights, gate order i, f, g, o (PyTorch block order)
    k['wih'] = p['lstm_w_ih'].T                                   # (E, 4E)
    k['whh'] = p['lstm_w_hh'].T                                   # (E, 4E)
    # transformer: per-layer stacked, pre-transposed, QKV fused
    wqkv, wo, w1, w2 = [], [], [], []
    for layer in p['layers']:
        wqkv.append(layer['in_proj_w'].T)                         # (E, 3E)
        wo.append(layer['out_w'].T)                               # (E, E)
        w1.append(layer['lin1_w'].T)                              # (E, F)
        w2.append(layer['lin2_w'].T)                              # (F, E)
    k['wqkv'] = jnp.stack(wqkv)                                   # (L, E, 3E)
    k['wo'] = jnp.stack(wo)                                       # (L, E, E)
    k['w1'] = jnp.stack(w1)                                       # (L, E, F)
    k['w2'] = jnp.stack(w2)                                       # (L, F, E)
    # flattened-sequence projection, single matmul with K = S*E
    k['projw'] = p['proj_w'].T                                    # (S*E, NQ)
    # raw weights for the orthogonality regularizer
    k['wih_full'] = p['lstm_w_ih']                                # (4E, E)
    k['whh_full'] = p['lstm_w_hh']                                # (4E, E)
    k['qkv0'] = p['layers'][0]['in_proj_w'].reshape(3, E, E)      # (3, E, E)
    k['proj_full'] = p['proj_w']                                  # (NQ, S*E)
    # packed small-vector slab: one row per bias / LayerNorm vector
    W = 128 * int(math.ceil(max(128, 4 * E, 3 * E, Fd, NQ) / 128))
    rows = []

    def add(v):
        v = v.reshape(-1)
        rows.append(jnp.pad(v, (0, W - v.shape[0])))

    add(p['emb_b'])                                               # row 0
    add(p['pj_b'])                                                # row 1
    add(p['lstm_b_ih'] + p['lstm_b_hh'])                          # row 2 (summed bias)
    add(p['lstm_ln_g'])                                           # row 3
    add(p['lstm_ln_b'])                                           # row 4
    for layer in p['layers']:                                     # rows 5 + l*8 + k
        add(layer['in_proj_b'])      # k=0
        add(layer['out_b'])          # k=1
        add(layer['ln1_g'])          # k=2
        add(layer['ln1_b'])          # k=3
        add(layer['lin1_b'])         # k=4
        add(layer['lin2_b'])         # k=5
        add(layer['ln2_g'])          # k=6
        add(layer['ln2_b'])          # k=7
    add(p['proj_b'])                                              # row 5 + L*8
    k['slab'] = jnp.stack(rows)                                   # (5 + 8L + 1, W)
    return k


# ---------------------------------------------------------------------------
# Forward pass: one fused pallas_call, zero wrapper-side tensor ops
# ---------------------------------------------------------------------------
def qtype_forward(kp, x, param_J, num_heads, num_layers):
    B, S, NQ = x.shape
    out, loss = pl.pallas_call(
        partial(_qtype_fused_kernel, num_heads=num_heads, num_layers=num_layers),
        out_shape=(jax.ShapeDtypeStruct((B, NQ), F32),
                   jax.ShapeDtypeStruct((1, 1), F32)),
        in_specs=[_vmem()] * 17,
        out_specs=(_vmem(), _vmem()),
    )(x, param_J,
      kp['emb_wt'], kp['pos'], kp['pjw_t'],
      kp['wih'], kp['whh'],
      kp['wqkv'], kp['wo'], kp['w1'], kp['w2'], kp['projw'],
      kp['slab'],
      kp['wih_full'], kp['whh_full'], kp['qkv0'], kp['proj_full'])
    return out, loss[0, 0]


if __name__ == "__main__":
    n_qubits = 4          # input feature dim and output dim
    shots = 8             # sequence length (max_len of the position embedding)
    emb_dim = 32
    num_heads = 4
    num_layers = 2
    dim_feedforward = 64
    batch = 2

    key = jax.random.PRNGKey(0)
    kparam, kx, kj = jax.random.split(key, 3)
    params = init_params(kparam, n_qubits, shots, emb_dim, num_layers, dim_feedforward)
    kp = prepare_params(params)                  # one-time weight relayout (outside hot path)

    x = jax.random.normal(kx, (batch, shots, n_qubits), F32)
    param_J = jax.random.normal(kj, (batch, 2), F32)

    out, total_orth_loss = qtype_forward(kp, x, param_J,
                                         num_heads=num_heads, num_layers=num_layers)
    out, total_orth_loss = jax.block_until_ready((out, total_orth_loss))

    assert out.shape == (batch, n_qubits)
    assert total_orth_loss.shape == ()
    assert jnp.all(jnp.isfinite(out)) and jnp.isfinite(total_orth_loss)
    print("KERNEL_OK")
</pallas_src>

<mosaic_0001>
module attributes {stable_mosaic.version = 11 : i64} {
  func.func @_qtype_fused_kernel(%arg0: memref<2x8x4xf32, #tpu.memory_space<vmem>>, %arg1: memref<2x2xf32, #tpu.memory_space<vmem>>, %arg2: memref<4x32xf32, #tpu.memory_space<vmem>>, %arg3: memref<8x32xf32, #tpu.memory_space<vmem>>, %arg4: memref<2x32xf32, #tpu.memory_space<vmem>>, %arg5: memref<32x128xf32, #tpu.memory_space<vmem>>, %arg6: memref<32x128xf32, #tpu.memory_space<vmem>>, %arg7: memref<2x32x96xf32, #tpu.memory_space<vmem>>, %arg8: memref<2x32x32xf32, #tpu.memory_space<vmem>>, %arg9: memref<2x32x64xf32, #tpu.memory_space<vmem>>, %arg10: memref<2x64x32xf32, #tpu.memory_space<vmem>>, %arg11: memref<256x4xf32, #tpu.memory_space<vmem>>, %arg12: memref<22x128xf32, #tpu.memory_space<vmem>>, %arg13: memref<128x32xf32, #tpu.memory_space<vmem>>, %arg14: memref<128x32xf32, #tpu.memory_space<vmem>>, %arg15: memref<3x32x32xf32, #tpu.memory_space<vmem>>, %arg16: memref<4x256xf32, #tpu.memory_space<vmem>>, %arg17: memref<2x4xf32, #tpu.memory_space<vmem>>, %arg18: memref<1x1xf32, #tpu.memory_space<vmem>>) attributes {dimension_semantics = [], scalar_prefetch = 0 : i64, scratch_operands = 0 : i64, tpu.core_type = #tpu.core_type<tc>} {
    %c0 = arith.constant 0 : index
    %c0_0 = arith.constant 0 : index
    %0 = vector.load %arg12[%c0, %c0_0] : memref<22x128xf32, #tpu.memory_space<vmem>>, vector<22x128xf32>
    %c0_1 = arith.constant 0 : index
    %c0_2 = arith.constant 0 : index
    %c0_3 = arith.constant 0 : index
    %1 = vector.load %arg0[%c0_1, %c0_2, %c0_3] : memref<2x8x4xf32, #tpu.memory_space<vmem>>, vector<2x8x4xf32>
    %2 = vector.shape_cast %1 : vector<2x8x4xf32> to vector<16x4xf32>
    %c0_4 = arith.constant 0 : index
    %c0_5 = arith.constant 0 : index
    %3 = vector.load %arg2[%c0_4, %c0_5] : memref<4x32xf32, #tpu.memory_space<vmem>>, vector<4x32xf32>
    %cst = arith.constant dense<0.000000e+00> : vector<16x32xf32>
    %4 = tpu.matmul %2, %3, %cst {dimension_numbers = #tpu.dot_dimension_numbers<[1], [0], [0], [1], [0, 0, 1, 1], [], []>} : vector<16x4xf32>, vector<4x32xf32>, vector<16x32xf32> -> vector<16x32xf32>
    %5 = vector.extract_strided_slice %0 {offsets = [0, 0], sizes = [1, 32], strides = [1, 1]} : vector<22x128xf32> to vector<1x32xf32>
    %6 = vector.broadcast %5 : vector<1x32xf32> to vector<16x32xf32>
    %7 = arith.addf %4, %6 : vector<16x32xf32>
    %c0_6 = arith.constant 0 : index
    %c0_7 = arith.constant 0 : index
    %8 = vector.load %arg1[%c0_6, %c0_7] : memref<2x2xf32, #tpu.memory_space<vmem>>, vector<2x2xf32>
    %c0_8 = arith.constant 0 : index
    %c0_9 = arith.constant 0 : index
    %9 = vector.load %arg4[%c0_8, %c0_9] : memref<2x32xf32, #tpu.memory_space<vmem>>, vector<2x32xf32>
    %cst_10 = arith.constant dense<0.000000e+00> : vector<2x32xf32>
    %10 = tpu.matmul %8, %9, %cst_10 {dimension_numbers = #tpu.dot_dimension_numbers<[1], [0], [0], [1], [0, 0, 1, 1], [], []>} : vector<2x2xf32>, vector<2x32xf32>, vector<2x32xf32> -> vector<2x32xf32>
    %11 = vector.extract_strided_slice %0 {offsets = [1, 0], sizes = [1, 32], strides = [1, 1]} : vector<22x128xf32> to vector<1x32xf32>
    %12 = vector.broadcast %11 : vector<1x32xf32> to vector<2x32xf32>
    %13 = arith.addf %10, %12 : vector<2x32xf32>
    %c0_11 = arith.constant 0 : index
    %c0_12 = arith.constant 0 : index
    %14 = vector.load %arg3[%c0_11, %c0_12] : memref<8x32xf32, #tpu.memory_space<vmem>>, vector<8x32xf32>
    %15 = vector.shape_cast %7 : vector<16x32xf32> to vector<2x8x32xf32>
    %16 = vector.shape_cast %14 : vector<8x32xf32> to vector<1x8x32xf32>
    %17 = vector.broadcast %16 : vector<1x8x32xf32> to vector<2x8x32xf32>
    %18 = arith.addf %15, %17 : vector<2x8x32xf32>
    %19 = vector.shape_cast %13 : vector<2x32xf32> to vector<2x1x32xf32>
    %20 = vector.broadcast %19 : vector<2x1x32xf32> to vector<2x8x32xf32>
    %21 = arith.addf %18, %20 : vector<2x8x32xf32>
    %22 = vector.shape_cast %21 : vector<2x8x32xf32> to vector<16x32xf32>
    %c0_13 = arith.constant 0 : index
    %c0_14 = arith.constant 0 : index
    %23 = vector.load %arg5[%c0_13, %c0_14] : memref<32x128xf32, #tpu.memory_space<vmem>>, vector<32x128xf32>
    %cst_15 = arith.constant dense<0.000000e+00> : vector<16x128xf32>
    %24 = tpu.matmul %22, %23, %cst_15 {dimension_numbers = #tpu.dot_dimension_numbers<[1], [0], [0], [1], [0, 0, 1, 1], [], []>} : vector<16x32xf32>, vector<32x128xf32>, vector<16x128xf32> -> vector<16x128xf32>
    %25 = vector.extract_strided_slice %0 {offsets = [2, 0], sizes = [1, 128], strides = [1, 1]} : vector<22x128xf32> to vector<1x128xf32>
    %26 = vector.broadcast %25 : vector<1x128xf32> to vector<16x128xf32>
    %27 = arith.addf %24, %26 : vector<16x128xf32>
    %28 = vector.shape_cast %27 : vector<16x128xf32> to vector<2x8x128xf32>
    %c0_16 = arith.constant 0 : index
    %c0_17 = arith.constant 0 : index
    %29 = vector.load %arg6[%c0_16, %c0_17] : memref<32x128xf32, #tpu.memory_space<vmem>>, vector<32x128xf32>
    %30 = vector.extract_strided_slice %0 {offsets = [3, 0], sizes = [1, 32], strides = [1, 1]} : vector<22x128xf32> to vector<1x32xf32>
    %31 = vector.extract_strided_slice %0 {offsets = [4, 0], sizes = [1, 32], strides = [1, 1]} : vector<22x128xf32> to vector<1x32xf32>
    %cst_18 = arith.constant 0.000000e+00 : f32
    %32 = vector.broadcast %cst_18 : f32 to vector<2x32xf32>
    %cst_19 = arith.constant 0.000000e+00 : f32
    %33 = vector.broadcast %cst_19 : f32 to vector<2x32xf32>
    %34 = vector.extract_strided_slice %28 {offsets = [0, 0, 0], sizes = [2, 1, 128], strides = [1, 1, 1]} : vector<2x8x128xf32> to vector<2x1x128xf32>
    %35 = vector.shape_cast %34 : vector<2x1x128xf32> to vector<2x128xf32>
    %cst_20 = arith.constant dense<0.000000e+00> : vector<2x128xf32>
    %36 = tpu.matmul %32, %29, %cst_20 {dimension_numbers = #tpu.dot_dimension_numbers<[1], [0], [0], [1], [0, 0, 1, 1], [], []>} : vector<2x32xf32>, vector<32x128xf32>, vector<2x128xf32> -> vector<2x128xf32>
    %37 = arith.addf %35, %36 : vector<2x128xf32>
    %38 = vector.extract_strided_slice %37 {offsets = [0, 0], sizes = [2, 32], strides = [1, 1]} : vector<2x128xf32> to vector<2x32xf32>
    %39 = arith.negf %38 : vector<2x32xf32>
    %40 = math.exp %39 : vector<2x32xf32>
    %cst_21 = arith.constant 1.000000e+00 : f32
    %41 = vector.broadcast %cst_21 : f32 to vector<2x32xf32>
    %42 = arith.addf %41, %40 : vector<2x32xf32>
    %43 = arith.divf %41, %42 : vector<2x32xf32>
    %44 = vector.extract_strided_slice %37 {offsets = [0, 32], sizes = [2, 32], strides = [1, 1]} : vector<2x128xf32> to vector<2x32xf32>
    %45 = arith.negf %44 : vector<2x32xf32>
    %46 = math.exp %45 : vector<2x32xf32>
    %cst_22 = arith.constant 1.000000e+00 : f32
    %47 = vector.broadcast %cst_22 : f32 to vector<2x32xf32>
    %48 = arith.addf %47, %46 : vector<2x32xf32>
    %49 = arith.divf %47, %48 : vector<2x32xf32>
    %50 = vector.extract_strided_slice %37 {offsets = [0, 64], sizes = [2, 32], strides = [1, 1]} : vector<2x128xf32> to vector<2x32xf32>
    %51 = math.tanh %50 : vector<2x32xf32>
    %52 = vector.extract_strided_slice %37 {offsets = [0, 96], sizes = [2, 32], strides = [1, 1]} : vector<2x128xf32> to vector<2x32xf32>
    %53 = arith.negf %52 : vector<2x32xf32>
    %54 = math.exp %53 : vector<2x32xf32>
    %cst_23 = arith.constant 1.000000e+00 : f32
    %55 = vector.broadcast %cst_23 : f32 to vector<2x32xf32>
    %56 = arith.addf %55, %54 : vector<2x32xf32>
    %57 = arith.divf %55, %56 : vector<2x32xf32>
    %58 = arith.mulf %49, %33 : vector<2x32xf32>
    %59 = arith.mulf %43, %51 : vector<2x32xf32>
    %60 = arith.addf %58, %59 : vector<2x32xf32>
    %61 = math.tanh %60 : vector<2x32xf32>
    %62 = arith.mulf %57, %61 : vector<2x32xf32>
    %cst_24 = arith.constant dense<0.000000e+00> : vector<2xf32>
    %63 = vector.multi_reduction <add>, %62, %cst_24 [1] : vector<2x32xf32> to vector<2xf32>
    %64 = vector.shape_cast %63 : vector<2xf32> to vector<2x1xf32>
    %cst_25 = arith.constant 3.200000e+01 : f32
    %65 = vector.broadcast %cst_25 : f32 to vector<2x1xf32>
    %66 = arith.divf %64, %65 : vector<2x1xf32>
    %67 = vector.broadcast %66 : vector<2x1xf32> to vector<2x32xf32>
    %68 = arith.subf %62, %67 : vector<2x32xf32>
    %69 = arith.mulf %68, %68 : vector<2x32xf32>
    %cst_26 = arith.constant dense<0.000000e+00> : vector<2xf32>
    %70 = vector.multi_reduction <add>, %69, %cst_26 [1] : vector<2x32xf32> to vector<2xf32>
    %71 = vector.shape_cast %70 : vector<2xf32> to vector<2x1xf32>
    %cst_27 = arith.constant 3.200000e+01 : f32
    %72 = vector.broadcast %cst_27 : f32 to vector<2x1xf32>
    %73 = arith.divf %71, %72 : vector<2x1xf32>
    %74 = vector.broadcast %66 : vector<2x1xf32> to vector<2x32xf32>
    %75 = arith.subf %62, %74 : vector<2x32xf32>
    %cst_28 = arith.constant 9.99999974E-6 : f32
    %76 = vector.broadcast %cst_28 : f32 to vector<2x1xf32>
    %77 = arith.addf %73, %76 : vector<2x1xf32>
    %78 = math.rsqrt %77 : vector<2x1xf32>
    %79 = vector.broadcast %78 : vector<2x1xf32> to vector<2x32xf32>
    %80 = arith.mulf %75, %79 : vector<2x32xf32>
    %81 = vector.broadcast %30 : vector<1x32xf32> to vector<2x32xf32>
    %82 = arith.mulf %80, %81 : vector<2x32xf32>
    %83 = vector.broadcast %31 : vector<1x32xf32> to vector<2x32xf32>
    %84 = arith.addf %82, %83 : vector<2x32xf32>
    %85 = vector.extract_strided_slice %28 {offsets = [0, 1, 0], sizes = [2, 1, 128], strides = [1, 1, 1]} : vector<2x8x128xf32> to vector<2x1x128xf32>
    %86 = vector.shape_cast %85 : vector<2x1x128xf32> to vector<2x128xf32>
    %cst_29 = arith.constant dense<0.000000e+00> : vector<2x128xf32>
    %87 = tpu.matmul %62, %29, %cst_29 {dimension_numbers = #tpu.dot_dimension_numbers<[1], [0], [0], [1], [0, 0, 1, 1], [], []>} : vector<2x32xf32>, vector<32x128xf32>, vector<2x128xf32> -> vector<2x128xf32>
    %88 = arith.addf %86, %87 : vector<2x128xf32>
    %89 = vector.extract_strided_slice %88 {offsets = [0, 0], sizes = [2, 32], strides = [1, 1]} : vector<2x128xf32> to vector<2x32xf32>
    %90 = arith.negf %89 : vector<2x32xf32>
    %91 = math.exp %90 : vector<2x32xf32>
    %cst_30 = arith.constant 1.000000e+00 : f32
    %92 = vector.broadcast %cst_30 : f32 to vector<2x32xf32>
    %93 = arith.addf %92, %91 : vector<2x32xf32>
    %94 = arith.divf %92, %93 : vector<2x32xf32>
    %95 = vector.extract_strided_slice %88 {offsets = [0, 32], sizes = [2, 32], strides = [1, 1]} : vector<2x128xf32> to vector<2x32xf32>
    %96 = arith.negf %95 : vector<2x32xf32>
    %97 = math.exp %96 : vector<2x32xf32>
    %cst_31 = arith.constant 1.000000e+00 : f32
    %98 = vector.broadcast %cst_31 : f32 to vector<2x32xf32>
    %99 = arith.addf %98, %97 : vector<2x32xf32>
    %100 = arith.divf %98, %99 : vector<2x32xf32>
    %101 = vector.extract_strided_slice %88 {offsets = [0, 64], sizes = [2, 32], strides = [1, 1]} : vector<2x128xf32> to vector<2x32xf32>
    %102 = math.tanh %101 : vector<2x32xf32>
    %103 = vector.extract_strided_slice %88 {offsets = [0, 96], sizes = [2, 32], strides = [1, 1]} : vector<2x128xf32> to vector<2x32xf32>
    %104 = arith.negf %103 : vector<2x32xf32>
    %105 = math.exp %104 : vector<2x32xf32>
    %cst_32 = arith.constant 1.000000e+00 : f32
    %106 = vector.broadcast %cst_32 : f32 to vector<2x32xf32>
    %107 = arith.addf %106, %105 : vector<2x32xf32>
    %108 = arith.divf %106, %107 : vector<2x32xf32>
    %109 = arith.mulf %100, %60 : vector<2x32xf32>
    %110 = arith.mulf %94, %102 : vector<2x32xf32>
    %111 = arith.addf %109, %110 : vector<2x32xf32>
    %112 = math.tanh %111 : vector<2x32xf32>
    %113 = arith.mulf %108, %112 : vector<2x32xf32>
    %cst_33 = arith.constant dense<0.000000e+00> : vector<2xf32>
    %114 = vector.multi_reduction <add>, %113, %cst_33 [1] : vector<2x32xf32> to vector<2xf32>
    %115 = vector.shape_cast %114 : vector<2xf32> to vector<2x1xf32>
    %cst_34 = arith.constant 3.200000e+01 : f32
    %116 = vector.broadcast %cst_34 : f32 to vector<2x1xf32>
    %117 = arith.divf %115, %116 : vector<2x1xf32>
    %118 = vector.broadcast %117 : vector<2x1xf32> to vector<2x32xf32>
    %119 = arith.subf %113, %118 : vector<2x32xf32>
    %120 = arith.mulf %119, %119 : vector<2x32xf32>
    %cst_35 = arith.constant dense<0.000000e+00> : vector<2xf32>
    %121 = vector.multi_reduction <add>, %120, %cst_35 [1] : vector<2x32xf32> to vector<2xf32>
    %122 = vector.shape_cast %121 : vector<2xf32> to vector<2x1xf32>
    %cst_36 = arith.constant 3.200000e+01 : f32
    %123 = vector.broadcast %cst_36 : f32 to vector<2x1xf32>
    %124 = arith.divf %122, %123 : vector<2x1xf32>
    %125 = vector.broadcast %117 : vector<2x1xf32> to vector<2x32xf32>
    %126 = arith.subf %113, %125 : vector<2x32xf32>
    %cst_37 = arith.constant 9.99999974E-6 : f32
    %127 = vector.broadcast %cst_37 : f32 to vector<2x1xf32>
    %128 = arith.addf %124, %127 : vector<2x1xf32>
    %129 = math.rsqrt %128 : vector<2x1xf32>
    %130 = vector.broadcast %129 : vector<2x1xf32> to vector<2x32xf32>
    %131 = arith.mulf %126, %130 : vector<2x32xf32>
    %132 = vector.broadcast %30 : vector<1x32xf32> to vector<2x32xf32>
    %133 = arith.mulf %131, %132 : vector<2x32xf32>
    %134 = vector.broadcast %31 : vector<1x32xf32> to vector<2x32xf32>
    %135 = arith.addf %133, %134 : vector<2x32xf32>
    %136 = vector.extract_strided_slice %28 {offsets = [0, 2, 0], sizes = [2, 1, 128], strides = [1, 1, 1]} : vector<2x8x128xf32> to vector<2x1x128xf32>
    %137 = vector.shape_cast %136 : vector<2x1x128xf32> to vector<2x128xf32>
    %cst_38 = arith.constant dense<0.000000e+00> : vector<2x128xf32>
    %138 = tpu.matmul %113, %29, %cst_38 {dimension_numbers = #tpu.dot_dimension_numbers<[1], [0], [0], [1], [0, 0, 1, 1], [], []>} : vector<2x32xf32>, vector<32x128xf32>, vector<2x128xf32> -> vector<2x128xf32>
    %139 = arith.addf %137, %138 : vector<2x128xf32>
    %140 = vector.extract_strided_slice %139 {offsets = [0, 0], sizes = [2, 32], strides = [1, 1]} : vector<2x128xf32> to vector<2x32xf32>
    %141 = arith.negf %140 : vector<2x32xf32>
    %142 = math.exp %141 : vector<2x32xf32>
    %cst_39 = arith.constant 1.000000e+00 : f32
    %143 = vector.broadcast %cst_39 : f32 to vector<2x32xf32>
    %144 = arith.addf %143, %142 : vector<2x32xf32>
    %145 = arith.divf %143, %144 : vector<2x32xf32>
    %146 = vector.extract_strided_slice %139 {offsets = [0, 32], sizes = [2, 32], strides = [1, 1]} : vector<2x128xf32> to vector<2x32xf32>
    %147 = arith.negf %146 : vector<2x32xf32>
    %148 = math.exp %147 : vector<2x32xf32>
    %cst_40 = arith.constant 1.000000e+00 : f32
    %149 = vector.broadcast %cst_40 : f32 to vector<2x32xf32>
    %150 = arith.addf %149, %148 : vector<2x32xf32>
    %151 = arith.divf %149, %150 : vector<2x32xf32>
    %152 = vector.extract_strided_slice %139 {offsets = [0, 64], sizes = [2, 32], strides = [1, 1]} : vector<2x128xf32> to vector<2x32xf32>
    %153 = math.tanh %152 : vector<2x32xf32>
    %154 = vector.extract_strided_slice %139 {offsets = [0, 96], sizes = [2, 32], strides = [1, 1]} : vector<2x128xf32> to vector<2x32xf32>
    %155 = arith.negf %154 : vector<2x32xf32>
    %156 = math.exp %155 : vector<2x32xf32>
    %cst_41 = arith.constant 1.000000e+00 : f32
    %157 = vector.broadcast %cst_41 : f32 to vector<2x32xf32>
    %158 = arith.addf %157, %156 : vector<2x32xf32>
    %159 = arith.divf %157, %158 : vector<2x32xf32>
    %160 = arith.mulf %151, %111 : vector<2x32xf32>
    %161 = arith.mulf %145, %153 : vector<2x32xf32>
    %162 = arith.addf %160, %161 : vector<2x32xf32>
    %163 = math.tanh %162 : vector<2x32xf32>
    %164 = arith.mulf %159, %163 : vector<2x32xf32>
    %cst_42 = arith.constant dense<0.000000e+00> : vector<2xf32>
    %165 = vector.multi_reduction <add>, %164, %cst_42 [1] : vector<2x32xf32> to vector<2xf32>
    %166 = vector.shape_cast %165 : vector<2xf32> to vector<2x1xf32>
    %cst_43 = arith.constant 3.200000e+01 : f32
    %167 = vector.broadcast %cst_43 : f32 to vector<2x1xf32>
    %168 = arith.divf %166, %167 : vector<2x1xf32>
    %169 = vector.broadcast %168 : vector<2x1xf32> to vector<2x32xf32>
    %170 = arith.subf %164, %169 : vector<2x32xf32>
    %171 = arith.mulf %170, %170 : vector<2x32xf32>
    %cst_44 = arith.constant dense<0.000000e+00> : vector<2xf32>
    %172 = vector.multi_reduction <add>, %171, %cst_44 [1] : vector<2x32xf32> to vector<2xf32>
    %173 = vector.shape_cast %172 : vector<2xf32> to vector<2x1xf32>
    %cst_45 = arith.constant 3.200000e+01 : f32
    %174 = vector.broadcast %cst_45 : f32 to vector<2x1xf32>
    %175 = arith.divf %173, %174 : vector<2x1xf32>
    %176 = vector.broadcast %168 : vector<2x1xf32> to vector<2x32xf32>
    %177 = arith.subf %164, %176 : vector<2x32xf32>
    %cst_46 = arith.constant 9.99999974E-6 : f32
    %178 = vector.broadcast %cst_46 : f32 to vector<2x1xf32>
    %179 = arith.addf %175, %178 : vector<2x1xf32>
    %180 = math.rsqrt %179 : vector<2x1xf32>
    %181 = vector.broadcast %180 : vector<2x1xf32> to vector<2x32xf32>
    %182 = arith.mulf %177, %181 : vector<2x32xf32>
    %183 = vector.broadcast %30 : vector<1x32xf32> to vector<2x32xf32>
    %184 = arith.mulf %182, %183 : vector<2x32xf32>
    %185 = vector.broadcast %31 : vector<1x32xf32> to vector<2x32xf32>
    %186 = arith.addf %184, %185 : vector<2x32xf32>
    %187 = vector.extract_strided_slice %28 {offsets = [0, 3, 0], sizes = [2, 1, 128], strides = [1, 1, 1]} : vector<2x8x128xf32> to vector<2x1x128xf32>
    %188 = vector.shape_cast %187 : vector<2x1x128xf32> to vector<2x128xf32>
    %cst_47 = arith.constant dense<0.000000e+00> : vector<2x128xf32>
    %189 = tpu.matmul %164, %29, %cst_47 {dimension_numbers = #tpu.dot_dimension_numbers<[1], [0], [0], [1], [0, 0, 1, 1], [], []>} : vector<2x32xf32>, vector<32x128xf32>, vector<2x128xf32> -> vector<2x128xf32>
    %190 = arith.addf %188, %189 : vector<2x128xf32>
    %191 = vector.extract_strided_slice %190 {offsets = [0, 0], sizes = [2, 32], strides = [1, 1]} : vector<2x128xf32> to vector<2x32xf32>
    %192 = arith.negf %191 : vector<2x32xf32>
    %193 = math.exp %192 : vector<2x32xf32>
    %cst_48 = arith.constant 1.000000e+00 : f32
    %194 = vector.broadcast %cst_48 : f32 to vector<2x32xf32>
    %195 = arith.addf %194, %193 : vector<2x32xf32>
    %196 = arith.divf %194, %195 : vector<2x32xf32>
    %197 = vector.extract_strided_slice %190 {offsets = [0, 32], sizes = [2, 32], strides = [1, 1]} : vector<2x128xf32> to vector<2x32xf32>
    %198 = arith.negf %197 : vector<2x32xf32>
    %199 = math.exp %198 : vector<2x32xf32>
    %cst_49 = arith.constant 1.000000e+00 : f32
    %200 = vector.broadcast %cst_49 : f32 to vector<2x32xf32>
    %201 = arith.addf %200, %199 : vector<2x32xf32>
    %202 = arith.divf %200, %201 : vector<2x32xf32>
    %203 = vector.extract_strided_slice %190 {offsets = [0, 64], sizes = [2, 32], strides = [1, 1]} : vector<2x128xf32> to vector<2x32xf32>
    %204 = math.tanh %203 : vector<2x32xf32>
    %205 = vector.extract_strided_slice %190 {offsets = [0, 96], sizes = [2, 32], strides = [1, 1]} : vector<2x128xf32> to vector<2x32xf32>
    %206 = arith.negf %205 : vector<2x32xf32>
    %207 = math.exp %206 : vector<2x32xf32>
    %cst_50 = arith.constant 1.000000e+00 : f32
    %208 = vector.broadcast %cst_50 : f32 to vector<2x32xf32>
    %209 = arith.addf %208, %207 : vector<2x32xf32>
    %210 = arith.divf %208, %209 : vector<2x32xf32>
    %211 = arith.mulf %202, %162 : vector<2x32xf32>
    %212 = arith.mulf %196, %204 : vector<2x32xf32>
    %213 = arith.addf %211, %212 : vector<2x32xf32>
    %214 = math.tanh %213 : vector<2x32xf32>
    %215 = arith.mulf %210, %214 : vector<2x32xf32>
    %cst_51 = arith.constant dense<0.000000e+00> : vector<2xf32>
    %216 = vector.multi_reduction <add>, %215, %cst_51 [1] : vector<2x32xf32> to vector<2xf32>
    %217 = vector.shape_cast %216 : vector<2xf32> to vector<2x1xf32>
    %cst_52 = arith.constant 3.200000e+01 : f32
    %218 = vector.broadcast %cst_52 : f32 to vector<2x1xf32>
    %219 = arith.divf %217, %218 : vector<2x1xf32>
    %220 = vector.broadcast %219 : vector<2x1xf32> to vector<2x32xf32>
    %221 = arith.subf %215, %220 : vector<2x32xf32>
    %222 = arith.mulf %221, %221 : vector<2x32xf32>
    %cst_53 = arith.constant dense<0.000000e+00> : vector<2xf32>
    %223 = vector.multi_reduction <add>, %222, %cst_53 [1] : vector<2x32xf32> to vector<2xf32>
    %224 = vector.shape_cast %223 : vector<2xf32> to vector<2x1xf32>
    %cst_54 = arith.constant 3.200000e+01 : f32
    %225 = vector.broadcast %cst_54 : f32 to vector<2x1xf32>
    %226 = arith.divf %224, %225 : vector<2x1xf32>
    %227 = vector.broadcast %219 : vector<2x1xf32> to vector<2x32xf32>
    %228 = arith.subf %215, %227 : vector<2x32xf32>
    %cst_55 = arith.constant 9.99999974E-6 : f32
    %229 = vector.broadcast %cst_55 : f32 to vector<2x1xf32>
    %230 = arith.addf %226, %229 : vector<2x1xf32>
    %231 = math.rsqrt %230 : vector<2x1xf32>
    %232 = vector.broadcast %231 : vector<2x1xf32> to vector<2x32xf32>
    %233 = arith.mulf %228, %232 : vector<2x32xf32>
    %234 = vector.broadcast %30 : vector<1x32xf32> to vector<2x32xf32>
    %235 = arith.mulf %233, %234 : vector<2x32xf32>
    %236 = vector.broadcast %31 : vector<1x32xf32> to vector<2x32xf32>
    %237 = arith.addf %235, %236 : vector<2x32xf32>
    %238 = vector.extract_strided_slice %28 {offsets = [0, 4, 0], sizes = [2, 1, 128], strides = [1, 1, 1]} : vector<2x8x128xf32> to vector<2x1x128xf32>
    %239 = vector.shape_cast %238 : vector<2x1x128xf32> to vector<2x128xf32>
    %cst_56 = arith.constant dense<0.000000e+00> : vector<2x128xf32>
    %240 = tpu.matmul %215, %29, %cst_56 {dimension_numbers = #tpu.dot_dimension_numbers<[1], [0], [0], [1], [0, 0, 1, 1], [], []>} : vector<2x32xf32>, vector<32x128xf32>, vector<2x128xf32> -> vector<2x128xf32>
    %241 = arith.addf %239, %240 : vector<2x128xf32>
    %242 = vector.extract_strided_slice %241 {offsets = [0, 0], sizes = [2, 32], strides = [1, 1]} : vector<2x128xf32> to vector<2x32xf32>
    %243 = arith.negf %242 : vector<2x32xf32>
    %244 = math.exp %243 : vector<2x32xf32>
    %cst_57 = arith.constant 1.000000e+00 : f32
    %245 = vector.broadcast %cst_57 : f32 to vector<2x32xf32>
    %246 = arith.addf %245, %244 : vector<2x32xf32>
    %247 = arith.divf %245, %246 : vector<2x32xf32>
    %248 = vector.extract_strided_slice %241 {offsets = [0, 32], sizes = [2, 32], strides = [1, 1]} : vector<2x128xf32> to vector<2x32xf32>
    %249 = arith.negf %248 : vector<2x32xf32>
    %250 = math.exp %249 : vector<2x32xf32>
    %cst_58 = arith.constant 1.000000e+00 : f32
    %251 = vector.broadcast %cst_58 : f32 to vector<2x32xf32>
    %252 = arith.addf %251, %250 : vector<2x32xf32>
    %253 = arith.divf %251, %252 : vector<2x32xf32>
    %254 = vector.extract_strided_slice %241 {offsets = [0, 64], sizes = [2, 32], strides = [1, 1]} : vector<2x128xf32> to vector<2x32xf32>
    %255 = math.tanh %254 : vector<2x32xf32>
    %256 = vector.extract_strided_slice %241 {offsets = [0, 96], sizes = [2, 32], strides = [1, 1]} : vector<2x128xf32> to vector<2x32xf32>
    %257 = arith.negf %256 : vector<2x32xf32>
    %258 = math.exp %257 : vector<2x32xf32>
    %cst_59 = arith.constant 1.000000e+00 : f32
    %259 = vector.broadcast %cst_59 : f32 to vector<2x32xf32>
    %260 = arith.addf %259, %258 : vector<2x32xf32>
    %261 = arith.divf %259, %260 : vector<2x32xf32>
    %262 = arith.mulf %253, %213 : vector<2x32xf32>
    %263 = arith.mulf %247, %255 : vector<2x32xf32>
    %264 = arith.addf %262, %263 : vector<2x32xf32>
    %265 = math.tanh %264 : vector<2x32xf32>
    %266 = arith.mulf %261, %265 : vector<2x32xf32>
    %cst_60 = arith.constant dense<0.000000e+00> : vector<2xf32>
    %267 = vector.multi_reduction <add>, %266, %cst_60 [1] : vector<2x32xf32> to vector<2xf32>
    %268 = vector.shape_cast %267 : vector<2xf32> to vector<2x1xf32>
    %cst_61 = arith.constant 3.200000e+01 : f32
    %269 = vector.broadcast %cst_61 : f32 to vector<2x1xf32>
    %270 = arith.divf %268, %269 : vector<2x1xf32>
    %271 = vector.broadcast %270 : vector<2x1xf32> to vector<2x32xf32>
    %272 = arith.subf %266, %271 : vector<2x32xf32>
    %273 = arith.mulf %272, %272 : vector<2x32xf32>
    %cst_62 = arith.constant dense<0.000000e+00> : vector<2xf32>
    %274 = vector.multi_reduction <add>, %273, %cst_62 [1] : vector<2x32xf32> to vector<2xf32>
    %275 = vector.shape_cast %274 : vector<2xf32> to vector<2x1xf32>
    %cst_63 = arith.constant 3.200000e+01 : f32
    %276 = vector.broadcast %cst_63 : f32 to vector<2x1xf32>
    %277 = arith.divf %275, %276 : vector<2x1xf32>
    %278 = vector.broadcast %270 : vector<2x1xf32> to vector<2x32xf32>
    %279 = arith.subf %266, %278 : vector<2x32xf32>
    %cst_64 = arith.constant 9.99999974E-6 : f32
    %280 = vector.broadcast %cst_64 : f32 to vector<2x1xf32>
    %281 = arith.addf %277, %280 : vector<2x1xf32>
    %282 = math.rsqrt %281 : vector<2x1xf32>
    %283 = vector.broadcast %282 : vector<2x1xf32> to vector<2x32xf32>
    %284 = arith.mulf %279, %283 : vector<2x32xf32>
    %285 = vector.broadcast %30 : vector<1x32xf32> to vector<2x32xf32>
    %286 = arith.mulf %284, %285 : vector<2x32xf32>
    %287 = vector.broadcast %31 : vector<1x32xf32> to vector<2x32xf32>
    %288 = arith.addf %286, %287 : vector<2x32xf32>
    %289 = vector.extract_strided_slice %28 {offsets = [0, 5, 0], sizes = [2, 1, 128], strides = [1, 1, 1]} : vector<2x8x128xf32> to vector<2x1x128xf32>
    %290 = vector.shape_cast %289 : vector<2x1x128xf32> to vector<2x128xf32>
    %cst_65 = arith.constant dense<0.000000e+00> : vector<2x128xf32>
    %291 = tpu.matmul %266, %29, %cst_65 {dimension_numbers = #tpu.dot_dimension_numbers<[1], [0], [0], [1], [0, 0, 1, 1], [], []>} : vector<2x32xf32>, vector<32x128xf32>, vector<2x128xf32> -> vector<2x128xf32>
    %292 = arith.addf %290, %291 : vector<2x128xf32>
    %293 = vector.extract_strided_slice %292 {offsets = [0, 0], sizes = [2, 32], strides = [1, 1]} : vector<2x128xf32> to vector<2x32xf32>
    %294 = arith.negf %293 : vector<2x32xf32>
    %295 = math.exp %294 : vector<2x32xf32>
    %cst_66 = arith.constant 1.000000e+00 : f32
    %296 = vector.broadcast %cst_66 : f32 to vector<2x32xf32>
    %297 = arith.addf %296, %295 : vector<2x32xf32>
    %298 = arith.divf %296, %297 : vector<2x32xf32>
    %299 = vector.extract_strided_slice %292 {offsets = [0, 32], sizes = [2, 32], strides = [1, 1]} : vector<2x128xf32> to vector<2x32xf32>
    %300 = arith.negf %299 : vector<2x32xf32>
    %301 = math.exp %300 : vector<2x32xf32>
    %cst_67 = arith.constant 1.000000e+00 : f32
    %302 = vector.broadcast %cst_67 : f32 to vector<2x32xf32>
    %303 = arith.addf %302, %301 : vector<2x32xf32>
    %304 = arith.divf %302, %303 : vector<2x32xf32>
    %305 = vector.extract_strided_slice %292 {offsets = [0, 64], sizes = [2, 32], strides = [1, 1]} : vector<2x128xf32> to vector<2x32xf32>
    %306 = math.tanh %305 : vector<2x32xf32>
    %307 = vector.extract_strided_slice %292 {offsets = [0, 96], sizes = [2, 32], strides = [1, 1]} : vector<2x128xf32> to vector<2x32xf32>
    %308 = arith.negf %307 : vector<2x32xf32>
    %309 = math.exp %308 : vector<2x32xf32>
    %cst_68 = arith.constant 1.000000e+00 : f32
    %310 = vector.broadcast %cst_68 : f32 to vector<2x32xf32>
    %311 = arith.addf %310, %309 : vector<2x32xf32>
    %312 = arith.divf %310, %311 : vector<2x32xf32>
    %313 = arith.mulf %304, %264 : vector<2x32xf32>
    %314 = arith.mulf %298, %306 : vector<2x32xf32>
    %315 = arith.addf %313, %314 : vector<2x32xf32>
    %316 = math.tanh %315 : vector<2x32xf32>
    %317 = arith.mulf %312, %316 : vector<2x32xf32>
    %cst_69 = arith.constant dense<0.000000e+00> : vector<2xf32>
    %318 = vector.multi_reduction <add>, %317, %cst_69 [1] : vector<2x32xf32> to vector<2xf32>
    %319 = vector.shape_cast %318 : vector<2xf32> to vector<2x1xf32>
    %cst_70 = arith.constant 3.200000e+01 : f32
    %320 = vector.broadcast %cst_70 : f32 to vector<2x1xf32>
    %321 = arith.divf %319, %320 : vector<2x1xf32>
    %322 = vector.broadcast %321 : vector<2x1xf32> to vector<2x32xf32>
    %323 = arith.subf %317, %322 : vector<2x32xf32>
    %324 = arith.mulf %323, %323 : vector<2x32xf32>
    %cst_71 = arith.constant dense<0.000000e+00> : vector<2xf32>
    %325 = vector.multi_reduction <add>, %324, %cst_71 [1] : vector<2x32xf32> to vector<2xf32>
    %326 = vector.shape_cast %325 : vector<2xf32> to vector<2x1xf32>
    %cst_72 = arith.constant 3.200000e+01 : f32
    %327 = vector.broadcast %cst_72 : f32 to vector<2x1xf32>
    %328 = arith.divf %326, %327 : vector<2x1xf32>
    %329 = vector.broadcast %321 : vector<2x1xf32> to vector<2x32xf32>
    %330 = arith.subf %317, %329 : vector<2x32xf32>
    %cst_73 = arith.constant 9.99999974E-6 : f32
    %331 = vector.broadcast %cst_73 : f32 to vector<2x1xf32>
    %332 = arith.addf %328, %331 : vector<2x1xf32>
    %333 = math.rsqrt %332 : vector<2x1xf32>
    %334 = vector.broadcast %333 : vector<2x1xf32> to vector<2x32xf32>
    %335 = arith.mulf %330, %334 : vector<2x32xf32>
    %336 = vector.broadcast %30 : vector<1x32xf32> to vector<2x32xf32>
    %337 = arith.mulf %335, %336 : vector<2x32xf32>
    %338 = vector.broadcast %31 : vector<1x32xf32> to vector<2x32xf32>
    %339 = arith.addf %337, %338 : vector<2x32xf32>
    %340 = vector.extract_strided_slice %28 {offsets = [0, 6, 0], sizes = [2, 1, 128], strides = [1, 1, 1]} : vector<2x8x128xf32> to vector<2x1x128xf32>
    %341 = vector.shape_cast %340 : vector<2x1x128xf32> to vector<2x128xf32>
    %cst_74 = arith.constant dense<0.000000e+00> : vector<2x128xf32>
    %342 = tpu.matmul %317, %29, %cst_74 {dimension_numbers = #tpu.dot_dimension_numbers<[1], [0], [0], [1], [0, 0, 1, 1], [], []>} : vector<2x32xf32>, vector<32x128xf32>, vector<2x128xf32> -> vector<2x128xf32>
    %343 = arith.addf %341, %342 : vector<2x128xf32>
    %344 = vector.extract_strided_slice %343 {offsets = [0, 0], sizes = [2, 32], strides = [1, 1]} : vector<2x128xf32> to vector<2x32xf32>
    %345 = arith.negf %344 : vector<2x32xf32>
    %346 = math.exp %345 : vector<2x32xf32>
    %cst_75 = arith.constant 1.000000e+00 : f32
    %347 = vector.broadcast %cst_75 : f32 to vector<2x32xf32>
    %348 = arith.addf %347, %346 : vector<2x32xf32>
    %349 = arith.divf %347, %348 : vector<2x32xf32>
    %350 = vector.extract_strided_slice %343 {offsets = [0, 32], sizes = [2, 32], strides = [1, 1]} : vector<2x128xf32> to vector<2x32xf32>
    %351 = arith.negf %350 : vector<2x32xf32>
    %352 = math.exp %351 : vector<2x32xf32>
    %cst_76 = arith.constant 1.000000e+00 : f32
    %353 = vector.broadcast %cst_76 : f32 to vector<2x32xf32>
    %354 = arith.addf %353, %352 : vector<2x32xf32>
    %355 = arith.divf %353, %354 : vector<2x32xf32>
    %356 = vector.extract_strided_slice %343 {offsets = [0, 64], sizes = [2, 32], strides = [1, 1]} : vector<2x128xf32> to vector<2x32xf32>
    %357 = math.tanh %356 : vector<2x32xf32>
    %358 = vector.extract_strided_slice %343 {offsets = [0, 96], sizes = [2, 32], strides = [1, 1]} : vector<2x128xf32> to vector<2x32xf32>
    %359 = arith.negf %358 : vector<2x32xf32>
    %360 = math.exp %359 : vector<2x32xf32>
    %cst_77 = arith.constant 1.000000e+00 : f32
    %361 = vector.broadcast %cst_77 : f32 to vector<2x32xf32>
    %362 = arith.addf %361, %360 : vector<2x32xf32>
    %363 = arith.divf %361, %362 : vector<2x32xf32>
    %364 = arith.mulf %355, %315 : vector<2x32xf32>
    %365 = arith.mulf %349, %357 : vector<2x32xf32>
    %366 = arith.addf %364, %365 : vector<2x32xf32>
    %367 = math.tanh %366 : vector<2x32xf32>
    %368 = arith.mulf %363, %367 : vector<2x32xf32>
    %cst_78 = arith.constant dense<0.000000e+00> : vector<2xf32>
    %369 = vector.multi_reduction <add>, %368, %cst_78 [1] : vector<2x32xf32> to vector<2xf32>
    %370 = vector.shape_cast %369 : vector<2xf32> to vector<2x1xf32>
    %cst_79 = arith.constant 3.200000e+01 : f32
    %371 = vector.broadcast %cst_79 : f32 to vector<2x1xf32>
    %372 = arith.divf %370, %371 : vector<2x1xf32>
    %373 = vector.broadcast %372 : vector<2x1xf32> to vector<2x32xf32>
    %374 = arith.subf %368, %373 : vector<2x32xf32>
    %375 = arith.mulf %374, %374 : vector<2x32xf32>
    %cst_80 = arith.constant dense<0.000000e+00> : vector<2xf32>
    %376 = vector.multi_reduction <add>, %375, %cst_80 [1] : vector<2x32xf32> to vector<2xf32>
    %377 = vector.shape_cast %376 : vector<2xf32> to vector<2x1xf32>
    %cst_81 = arith.constant 3.200000e+01 : f32
    %378 = vector.broadcast %cst_81 : f32 to vector<2x1xf32>
    %379 = arith.divf %377, %378 : vector<2x1xf32>
    %380 = vector.broadcast %372 : vector<2x1xf32> to vector<2x32xf32>
    %381 = arith.subf %368, %380 : vector<2x32xf32>
    %cst_82 = arith.constant 9.99999974E-6 : f32
    %382 = vector.broadcast %cst_82 : f32 to vector<2x1xf32>
    %383 = arith.addf %379, %382 : vector<2x1xf32>
    %384 = math.rsqrt %383 : vector<2x1xf32>
    %385 = vector.broadcast %384 : vector<2x1xf32> to vector<2x32xf32>
    %386 = arith.mulf %381, %385 : vector<2x32xf32>
    %387 = vector.broadcast %30 : vector<1x32xf32> to vector<2x32xf32>
    %388 = arith.mulf %386, %387 : vector<2x32xf32>
    %389 = vector.broadcast %31 : vector<1x32xf32> to vector<2x32xf32>
    %390 = arith.addf %388, %389 : vector<2x32xf32>
    %391 = vector.extract_strided_slice %28 {offsets = [0, 7, 0], sizes = [2, 1, 128], strides = [1, 1, 1]} : vector<2x8x128xf32> to vector<2x1x128xf32>
    %392 = vector.shape_cast %391 : vector<2x1x128xf32> to vector<2x128xf32>
    %cst_83 = arith.constant dense<0.000000e+00> : vector<2x128xf32>
    %393 = tpu.matmul %368, %29, %cst_83 {dimension_numbers = #tpu.dot_dimension_numbers<[1], [0], [0], [1], [0, 0, 1, 1], [], []>} : vector<2x32xf32>, vector<32x128xf32>, vector<2x128xf32> -> vector<2x128xf32>
    %394 = arith.addf %392, %393 : vector<2x128xf32>
    %395 = vector.extract_strided_slice %394 {offsets = [0, 0], sizes = [2, 32], strides = [1, 1]} : vector<2x128xf32> to vector<2x32xf32>
    %396 = arith.negf %395 : vector<2x32xf32>
    %397 = math.exp %396 : vector<2x32xf32>
    %cst_84 = arith.constant 1.000000e+00 : f32
    %398 = vector.broadcast %cst_84 : f32 to vector<2x32xf32>
    %399 = arith.addf %398, %397 : vector<2x32xf32>
    %400 = arith.divf %398, %399 : vector<2x32xf32>
    %401 = vector.extract_strided_slice %394 {offsets = [0, 32], sizes = [2, 32], strides = [1, 1]} : vector<2x128xf32> to vector<2x32xf32>
    %402 = arith.negf %401 : vector<2x32xf32>
    %403 = math.exp %402 : vector<2x32xf32>
    %cst_85 = arith.constant 1.000000e+00 : f32
    %404 = vector.broadcast %cst_85 : f32 to vector<2x32xf32>
    %405 = arith.addf %404, %403 : vector<2x32xf32>
    %406 = arith.divf %404, %405 : vector<2x32xf32>
    %407 = vector.extract_strided_slice %394 {offsets = [0, 64], sizes = [2, 32], strides = [1, 1]} : vector<2x128xf32> to vector<2x32xf32>
    %408 = math.tanh %407 : vector<2x32xf32>
    %409 = vector.extract_strided_slice %394 {offsets = [0, 96], sizes = [2, 32], strides = [1, 1]} : vector<2x128xf32> to vector<2x32xf32>
    %410 = arith.negf %409 : vector<2x32xf32>
    %411 = math.exp %410 : vector<2x32xf32>
    %cst_86 = arith.constant 1.000000e+00 : f32
    %412 = vector.broadcast %cst_86 : f32 to vector<2x32xf32>
    %413 = arith.addf %412, %411 : vector<2x32xf32>
    %414 = arith.divf %412, %413 : vector<2x32xf32>
    %415 = arith.mulf %406, %366 : vector<2x32xf32>
    %416 = arith.mulf %400, %408 : vector<2x32xf32>
    %417 = arith.addf %415, %416 : vector<2x32xf32>
    %418 = math.tanh %417 : vector<2x32xf32>
    %419 = arith.mulf %414, %418 : vector<2x32xf32>
    %cst_87 = arith.constant dense<0.000000e+00> : vector<2xf32>
    %420 = vector.multi_reduction <add>, %419, %cst_87 [1] : vector<2x32xf32> to vector<2xf32>
    %421 = vector.shape_cast %420 : vector<2xf32> to vector<2x1xf32>
    %cst_88 = arith.constant 3.200000e+01 : f32
    %422 = vector.broadcast %cst_88 : f32 to vector<2x1xf32>
    %423 = arith.divf %421, %422 : vector<2x1xf32>
    %424 = vector.broadcast %423 : vector<2x1xf32> to vector<2x32xf32>
    %425 = arith.subf %419, %424 : vector<2x32xf32>
    %426 = arith.mulf %425, %425 : vector<2x32xf32>
    %cst_89 = arith.constant dense<0.000000e+00> : vector<2xf32>
    %427 = vector.multi_reduction <add>, %426, %cst_89 [1] : vector<2x32xf32> to vector<2xf32>
    %428 = vector.shape_cast %427 : vector<2xf32> to vector<2x1xf32>
    %cst_90 = arith.constant 3.200000e+01 : f32
    %429 = vector.broadcast %cst_90 : f32 to vector<2x1xf32>
    %430 = arith.divf %428, %429 : vector<2x1xf32>
    %431 = vector.broadcast %423 : vector<2x1xf32> to vector<2x32xf32>
    %432 = arith.subf %419, %431 : vector<2x32xf32>
    %cst_91 = arith.constant 9.99999974E-6 : f32
    %433 = vector.broadcast %cst_91 : f32 to vector<2x1xf32>
    %434 = arith.addf %430, %433 : vector<2x1xf32>
    %435 = math.rsqrt %434 : vector<2x1xf32>
    %436 = vector.broadcast %435 : vector<2x1xf32> to vector<2x32xf32>
    %437 = arith.mulf %432, %436 : vector<2x32xf32>
    %438 = vector.broadcast %30 : vector<1x32xf32> to vector<2x32xf32>
    %439 = arith.mulf %437, %438 : vector<2x32xf32>
    %440 = vector.broadcast %31 : vector<1x32xf32> to vector<2x32xf32>
    %441 = arith.addf %439, %440 : vector<2x32xf32>
    %442 = vector.shape_cast %84 : vector<2x32xf32> to vector<2x1x32xf32>
    %443 = vector.shape_cast %135 : vector<2x32xf32> to vector<2x1x32xf32>
    %444 = vector.shape_cast %186 : vector<2x32xf32> to vector<2x1x32xf32>
    %445 = vector.shape_cast %237 : vector<2x32xf32> to vector<2x1x32xf32>
    %446 = vector.shape_cast %288 : vector<2x32xf32> to vector<2x1x32xf32>
    %447 = vector.shape_cast %339 : vector<2x32xf32> to vector<2x1x32xf32>
    %448 = vector.shape_cast %390 : vector<2x32xf32> to vector<2x1x32xf32>
    %449 = vector.shape_cast %441 : vector<2x32xf32> to vector<2x1x32xf32>
    %450 = tpu.concatenate %442, %443, %444, %445, %446, %447, %448, %449 in 1 : vector<2x1x32xf32>, vector<2x1x32xf32>, vector<2x1x32xf32>, vector<2x1x32xf32>, vector<2x1x32xf32>, vector<2x1x32xf32>, vector<2x1x32xf32>, vector<2x1x32xf32> -> vector<2x8x32xf32>
    %451 = vector.shape_cast %450 : vector<2x8x32xf32> to vector<16x32xf32>
    %c0_92 = arith.constant 0 : index
    %c0_93 = arith.constant 0 : index
    %c0_94 = arith.constant 0 : index
    %452 = vector.load %arg7[%c0_92, %c0_93, %c0_94] : memref<2x32x96xf32, #tpu.memory_space<vmem>>, vector<1x32x96xf32>
    %453 = vector.shape_cast %452 : vector<1x32x96xf32> to vector<32x96xf32>
    %cst_95 = arith.constant dense<0.000000e+00> : vector<16x96xf32>
    %454 = tpu.matmul %451, %453, %cst_95 {dimension_numbers = #tpu.dot_dimension_numbers<[1], [0], [0], [1], [0, 0, 1, 1], [], []>} : vector<16x32xf32>, vector<32x96xf32>, vector<16x96xf32> -> vector<16x96xf32>
    %455 = vector.extract_strided_slice %0 {offsets = [5, 0], sizes = [1, 96], strides = [1, 1]} : vector<22x128xf32> to vector<1x96xf32>
    %456 = vector.broadcast %455 : vector<1x96xf32> to vector<16x96xf32>
    %457 = arith.addf %454, %456 : vector<16x96xf32>
    %458 = vector.extract_strided_slice %457 {offsets = [0, 0], sizes = [16, 8], strides = [1, 1]} : vector<16x96xf32> to vector<16x8xf32>
    %459 = vector.shape_cast %458 : vector<16x8xf32> to vector<2x8x8xf32>
    %460 = vector.extract_strided_slice %457 {offsets = [0, 32], sizes = [16, 8], strides = [1, 1]} : vector<16x96xf32> to vector<16x8xf32>
    %461 = vector.shape_cast %460 : vector<16x8xf32> to vector<2x8x8xf32>
    %462 = vector.extract_strided_slice %457 {offsets = [0, 64], sizes = [16, 8], strides = [1, 1]} : vector<16x96xf32> to vector<16x8xf32>
    %463 = vector.shape_cast %462 : vector<16x8xf32> to vector<2x8x8xf32>
    "tpu.trace_start"() <{level = 10 : i32, message = "bqd,bkd->bqk"}> : () -> ()
    %cst_96 = arith.constant dense<0.000000e+00> : vector<2x8x8xf32>
    %464 = tpu.matmul %459, %461, %cst_96 {dimension_numbers = #tpu.dot_dimension_numbers<[2], [2], [1], [1], [0, 0, 0, 1, 1, 1], [0], [0]>} : vector<2x8x8xf32>, vector<2x8x8xf32>, vector<2x8x8xf32> -> vector<2x8x8xf32>
    "tpu.trace_stop"() : () -> ()
    %cst_97 = arith.constant 0.353553385 : f32
    %465 = vector.broadcast %cst_97 : f32 to vector<2x8x8xf32>
    %466 = arith.mulf %464, %465 : vector<2x8x8xf32>
    %cst_98 = arith.constant dense<0xFF800000> : vector<2x8xf32>
    %467 = vector.multi_reduction <maximumf>, %466, %cst_98 [2] : vector<2x8x8xf32> to vector<2x8xf32>
    %468 = vector.shape_cast %467 : vector<2x8xf32> to vector<2x8x1xf32>
    %469 = vector.broadcast %468 : vector<2x8x1xf32> to vector<2x8x8xf32>
    %470 = arith.subf %466, %469 : vector<2x8x8xf32>
    %471 = math.exp %470 : vector<2x8x8xf32>
    %cst_99 = arith.constant dense<0.000000e+00> : vector<2x8xf32>
    %472 = vector.multi_reduction <add>, %471, %cst_99 [2] : vector<2x8x8xf32> to vector<2x8xf32>
    %473 = vector.shape_cast %472 : vector<2x8xf32> to vector<2x8x1xf32>
    %474 = tpu.reciprocal %473 {approx = true} : vector<2x8x1xf32> -> vector<2x8x1xf32>
    %475 = vector.broadcast %474 : vector<2x8x1xf32> to vector<2x8x8xf32>
    %476 = arith.mulf %471, %475 : vector<2x8x8xf32>
    "tpu.trace_start"() <{level = 10 : i32, message = "bqk,bkd->bqd"}> : () -> ()
    %cst_100 = arith.constant dense<0.000000e+00> : vector<2x8x8xf32>
    %477 = tpu.matmul %476, %463, %cst_100 {dimension_numbers = #tpu.dot_dimension_numbers<[2], [1], [1], [2], [0, 0, 0, 1, 1, 2], [0], [0]>} : vector<2x8x8xf32>, vector<2x8x8xf32>, vector<2x8x8xf32> -> vector<2x8x8xf32>
    "tpu.trace_stop"() : () -> ()
    %478 = vector.shape_cast %477 : vector<2x8x8xf32> to vector<16x8xf32>
    %479 = vector.extract_strided_slice %457 {offsets = [0, 8], sizes = [16, 8], strides = [1, 1]} : vector<16x96xf32> to vector<16x8xf32>
    %480 = vector.shape_cast %479 : vector<16x8xf32> to vector<2x8x8xf32>
    %481 = vector.extract_strided_slice %457 {offsets = [0, 40], sizes = [16, 8], strides = [1, 1]} : vector<16x96xf32> to vector<16x8xf32>
    %482 = vector.shape_cast %481 : vector<16x8xf32> to vector<2x8x8xf32>
    %483 = vector.extract_strided_slice %457 {offsets = [0, 72], sizes = [16, 8], strides = [1, 1]} : vector<16x96xf32> to vector<16x8xf32>
    %484 = vector.shape_cast %483 : vector<16x8xf32> to vector<2x8x8xf32>
    "tpu.trace_start"() <{level = 10 : i32, message = "bqd,bkd->bqk"}> : () -> ()
    %cst_101 = arith.constant dense<0.000000e+00> : vector<2x8x8xf32>
    %485 = tpu.matmul %480, %482, %cst_101 {dimension_numbers = #tpu.dot_dimension_numbers<[2], [2], [1], [1], [0, 0, 0, 1, 1, 1], [0], [0]>} : vector<2x8x8xf32>, vector<2x8x8xf32>, vector<2x8x8xf32> -> vector<2x8x8xf32>
    "tpu.trace_stop"() : () -> ()
    %cst_102 = arith.constant 0.353553385 : f32
    %486 = vector.broadcast %cst_102 : f32 to vector<2x8x8xf32>
    %487 = arith.mulf %485, %486 : vector<2x8x8xf32>
    %cst_103 = arith.constant dense<0xFF800000> : vector<2x8xf32>
    %488 = vector.multi_reduction <maximumf>, %487, %cst_103 [2] : vector<2x8x8xf32> to vector<2x8xf32>
    %489 = vector.shape_cast %488 : vector<2x8xf32> to vector<2x8x1xf32>
    %490 = vector.broadcast %489 : vector<2x8x1xf32> to vector<2x8x8xf32>
    %491 = arith.subf %487, %490 : vector<2x8x8xf32>
    %492 = math.exp %491 : vector<2x8x8xf32>
    %cst_104 = arith.constant dense<0.000000e+00> : vector<2x8xf32>
    %493 = vector.multi_reduction <add>, %492, %cst_104 [2] : vector<2x8x8xf32> to vector<2x8xf32>
    %494 = vector.shape_cast %493 : vector<2x8xf32> to vector<2x8x1xf32>
    %495 = tpu.reciprocal %494 {approx = true} : vector<2x8x1xf32> -> vector<2x8x1xf32>
    %496 = vector.broadcast %495 : vector<2x8x1xf32> to vector<2x8x8xf32>
    %497 = arith.mulf %492, %496 : vector<2x8x8xf32>
    "tpu.trace_start"() <{level = 10 : i32, message = "bqk,bkd->bqd"}> : () -> ()
    %cst_105 = arith.constant dense<0.000000e+00> : vector<2x8x8xf32>
    %498 = tpu.matmul %497, %484, %cst_105 {dimension_numbers = #tpu.dot_dimension_numbers<[2], [1], [1], [2], [0, 0, 0, 1, 1, 2], [0], [0]>} : vector<2x8x8xf32>, vector<2x8x8xf32>, vector<2x8x8xf32> -> vector<2x8x8xf32>
    "tpu.trace_stop"() : () -> ()
    %499 = vector.shape_cast %498 : vector<2x8x8xf32> to vector<16x8xf32>
    %500 = vector.extract_strided_slice %457 {offsets = [0, 16], sizes = [16, 8], strides = [1, 1]} : vector<16x96xf32> to vector<16x8xf32>
    %501 = vector.shape_cast %500 : vector<16x8xf32> to vector<2x8x8xf32>
    %502 = vector.extract_strided_slice %457 {offsets = [0, 48], sizes = [16, 8], strides = [1, 1]} : vector<16x96xf32> to vector<16x8xf32>
    %503 = vector.shape_cast %502 : vector<16x8xf32> to vector<2x8x8xf32>
    %504 = vector.extract_strided_slice %457 {offsets = [0, 80], sizes = [16, 8], strides = [1, 1]} : vector<16x96xf32> to vector<16x8xf32>
    %505 = vector.shape_cast %504 : vector<16x8xf32> to vector<2x8x8xf32>
    "tpu.trace_start"() <{level = 10 : i32, message = "bqd,bkd->bqk"}> : () -> ()
    %cst_106 = arith.constant dense<0.000000e+00> : vector<2x8x8xf32>
    %506 = tpu.matmul %501, %503, %cst_106 {dimension_numbers = #tpu.dot_dimension_numbers<[2], [2], [1], [1], [0, 0, 0, 1, 1, 1], [0], [0]>} : vector<2x8x8xf32>, vector<2x8x8xf32>, vector<2x8x8xf32> -> vector<2x8x8xf32>
    "tpu.trace_stop"() : () -> ()
    %cst_107 = arith.constant 0.353553385 : f32
    %507 = vector.broadcast %cst_107 : f32 to vector<2x8x8xf32>
    %508 = arith.mulf %506, %507 : vector<2x8x8xf32>
    %cst_108 = arith.constant dense<0xFF800000> : vector<2x8xf32>
    %509 = vector.multi_reduction <maximumf>, %508, %cst_108 [2] : vector<2x8x8xf32> to vector<2x8xf32>
    %510 = vector.shape_cast %509 : vector<2x8xf32> to vector<2x8x1xf32>
    %511 = vector.broadcast %510 : vector<2x8x1xf32> to vector<2x8x8xf32>
    %512 = arith.subf %508, %511 : vector<2x8x8xf32>
    %513 = math.exp %512 : vector<2x8x8xf32>
    %cst_109 = arith.constant dense<0.000000e+00> : vector<2x8xf32>
    %514 = vector.multi_reduction <add>, %513, %cst_109 [2] : vector<2x8x8xf32> to vector<2x8xf32>
    %515 = vector.shape_cast %514 : vector<2x8xf32> to vector<2x8x1xf32>
    %516 = tpu.reciprocal %515 {approx = true} : vector<2x8x1xf32> -> vector<2x8x1xf32>
    %517 = vector.broadcast %516 : vector<2x8x1xf32> to vector<2x8x8xf32>
    %518 = arith.mulf %513, %517 : vector<2x8x8xf32>
    "tpu.trace_start"() <{level = 10 : i32, message = "bqk,bkd->bqd"}> : () -> ()
    %cst_110 = arith.constant dense<0.000000e+00> : vector<2x8x8xf32>
    %519 = tpu.matmul %518, %505, %cst_110 {dimension_numbers = #tpu.dot_dimension_numbers<[2], [1], [1], [2], [0, 0, 0, 1, 1, 2], [0], [0]>} : vector<2x8x8xf32>, vector<2x8x8xf32>, vector<2x8x8xf32> -> vector<2x8x8xf32>
    "tpu.trace_stop"() : () -> ()
    %520 = vector.shape_cast %519 : vector<2x8x8xf32> to vector<16x8xf32>
    %521 = vector.extract_strided_slice %457 {offsets = [0, 24], sizes = [16, 8], strides = [1, 1]} : vector<16x96xf32> to vector<16x8xf32>
    %522 = vector.shape_cast %521 : vector<16x8xf32> to vector<2x8x8xf32>
    %523 = vector.extract_strided_slice %457 {offsets = [0, 56], sizes = [16, 8], strides = [1, 1]} : vector<16x96xf32> to vector<16x8xf32>
    %524 = vector.shape_cast %523 : vector<16x8xf32> to vector<2x8x8xf32>
    %525 = vector.extract_strided_slice %457 {offsets = [0, 88], sizes = [16, 8], strides = [1, 1]} : vector<16x96xf32> to vector<16x8xf32>
    %526 = vector.shape_cast %525 : vector<16x8xf32> to vector<2x8x8xf32>
    "tpu.trace_start"() <{level = 10 : i32, message = "bqd,bkd->bqk"}> : () -> ()
    %cst_111 = arith.constant dense<0.000000e+00> : vector<2x8x8xf32>
    %527 = tpu.matmul %522, %524, %cst_111 {dimension_numbers = #tpu.dot_dimension_numbers<[2], [2], [1], [1], [0, 0, 0, 1, 1, 1], [0], [0]>} : vector<2x8x8xf32>, vector<2x8x8xf32>, vector<2x8x8xf32> -> vector<2x8x8xf32>
    "tpu.trace_stop"() : () -> ()
    %cst_112 = arith.constant 0.353553385 : f32
    %528 = vector.broadcast %cst_112 : f32 to vector<2x8x8xf32>
    %529 = arith.mulf %527, %528 : vector<2x8x8xf32>
    %cst_113 = arith.constant dense<0xFF800000> : vector<2x8xf32>
    %530 = vector.multi_reduction <maximumf>, %529, %cst_113 [2] : vector<2x8x8xf32> to vector<2x8xf32>
    %531 = vector.shape_cast %530 : vector<2x8xf32> to vector<2x8x1xf32>
    %532 = vector.broadcast %531 : vector<2x8x1xf32> to vector<2x8x8xf32>
    %533 = arith.subf %529, %532 : vector<2x8x8xf32>
    %534 = math.exp %533 : vector<2x8x8xf32>
    %cst_114 = arith.constant dense<0.000000e+00> : vector<2x8xf32>
    %535 = vector.multi_reduction <add>, %534, %cst_114 [2] : vector<2x8x8xf32> to vector<2x8xf32>
    %536 = vector.shape_cast %535 : vector<2x8xf32> to vector<2x8x1xf32>
    %537 = tpu.reciprocal %536 {approx = true} : vector<2x8x1xf32> -> vector<2x8x1xf32>
    %538 = vector.broadcast %537 : vector<2x8x1xf32> to vector<2x8x8xf32>
    %539 = arith.mulf %534, %538 : vector<2x8x8xf32>
    "tpu.trace_start"() <{level = 10 : i32, message = "bqk,bkd->bqd"}> : () -> ()
    %cst_115 = arith.constant dense<0.000000e+00> : vector<2x8x8xf32>
    %540 = tpu.matmul %539, %526, %cst_115 {dimension_numbers = #tpu.dot_dimension_numbers<[2], [1], [1], [2], [0, 0, 0, 1, 1, 2], [0], [0]>} : vector<2x8x8xf32>, vector<2x8x8xf32>, vector<2x8x8xf32> -> vector<2x8x8xf32>
    "tpu.trace_stop"() : () -> ()
    %541 = vector.shape_cast %540 : vector<2x8x8xf32> to vector<16x8xf32>
    %542 = tpu.concatenate %478, %499, %520, %541 in 1 : vector<16x8xf32>, vector<16x8xf32>, vector<16x8xf32>, vector<16x8xf32> -> vector<16x32xf32>
    %c0_116 = arith.constant 0 : index
    %c0_117 = arith.constant 0 : index
    %c0_118 = arith.constant 0 : index
    %543 = vector.load %arg8[%c0_116, %c0_117, %c0_118] : memref<2x32x32xf32, #tpu.memory_space<vmem>>, vector<1x32x32xf32>
    %544 = vector.shape_cast %543 : vector<1x32x32xf32> to vector<32x32xf32>
    %cst_119 = arith.constant dense<0.000000e+00> : vector<16x32xf32>
    %545 = tpu.matmul %542, %544, %cst_119 {dimension_numbers = #tpu.dot_dimension_numbers<[1], [0], [0], [1], [0, 0, 1, 1], [], []>} : vector<16x32xf32>, vector<32x32xf32>, vector<16x32xf32> -> vector<16x32xf32>
    %546 = vector.extract_strided_slice %0 {offsets = [6, 0], sizes = [1, 32], strides = [1, 1]} : vector<22x128xf32> to vector<1x32xf32>
    %547 = vector.broadcast %546 : vector<1x32xf32> to vector<16x32xf32>
    %548 = arith.addf %545, %547 : vector<16x32xf32>
    %549 = arith.addf %451, %548 : vector<16x32xf32>
    %550 = vector.extract_strided_slice %0 {offsets = [7, 0], sizes = [1, 32], strides = [1, 1]} : vector<22x128xf32> to vector<1x32xf32>
    %551 = vector.extract_strided_slice %0 {offsets = [8, 0], sizes = [1, 32], strides = [1, 1]} : vector<22x128xf32> to vector<1x32xf32>
    %cst_120 = arith.constant dense<0.000000e+00> : vector<16xf32>
    %552 = vector.multi_reduction <add>, %549, %cst_120 [1] : vector<16x32xf32> to vector<16xf32>
    %553 = vector.shape_cast %552 : vector<16xf32> to vector<16x1xf32>
    %cst_121 = arith.constant 3.200000e+01 : f32
    %554 = vector.broadcast %cst_121 : f32 to vector<16x1xf32>
    %555 = arith.divf %553, %554 : vector<16x1xf32>
    %556 = vector.broadcast %555 : vector<16x1xf32> to vector<16x32xf32>
    %557 = arith.subf %549, %556 : vector<16x32xf32>
    %558 = arith.mulf %557, %557 : vector<16x32xf32>
    %cst_122 = arith.constant dense<0.000000e+00> : vector<16xf32>
    %559 = vector.multi_reduction <add>, %558, %cst_122 [1] : vector<16x32xf32> to vector<16xf32>
    %560 = vector.shape_cast %559 : vector<16xf32> to vector<16x1xf32>
    %cst_123 = arith.constant 3.200000e+01 : f32
    %561 = vector.broadcast %cst_123 : f32 to vector<16x1xf32>
    %562 = arith.divf %560, %561 : vector<16x1xf32>
    %563 = vector.broadcast %555 : vector<16x1xf32> to vector<16x32xf32>
    %564 = arith.subf %549, %563 : vector<16x32xf32>
    %cst_124 = arith.constant 9.99999974E-6 : f32
    %565 = vector.broadcast %cst_124 : f32 to vector<16x1xf32>
    %566 = arith.addf %562, %565 : vector<16x1xf32>
    %567 = math.rsqrt %566 : vector<16x1xf32>
    %568 = vector.broadcast %567 : vector<16x1xf32> to vector<16x32xf32>
    %569 = arith.mulf %564, %568 : vector<16x32xf32>
    %570 = vector.broadcast %550 : vector<1x32xf32> to vector<16x32xf32>
    %571 = arith.mulf %569, %570 : vector<16x32xf32>
    %572 = vector.broadcast %551 : vector<1x32xf32> to vector<16x32xf32>
    %573 = arith.addf %571, %572 : vector<16x32xf32>
    %c0_125 = arith.constant 0 : index
    %c0_126 = arith.constant 0 : index
    %c0_127 = arith.constant 0 : index
    %574 = vector.load %arg9[%c0_125, %c0_126, %c0_127] : memref<2x32x64xf32, #tpu.memory_space<vmem>>, vector<1x32x64xf32>
    %575 = vector.shape_cast %574 : vector<1x32x64xf32> to vector<32x64xf32>
    %cst_128 = arith.constant dense<0.000000e+00> : vector<16x64xf32>
    %576 = tpu.matmul %573, %575, %cst_128 {dimension_numbers = #tpu.dot_dimension_numbers<[1], [0], [0], [1], [0, 0, 1, 1], [], []>} : vector<16x32xf32>, vector<32x64xf32>, vector<16x64xf32> -> vector<16x64xf32>
    %577 = vector.extract_strided_slice %0 {offsets = [9, 0], sizes = [1, 64], strides = [1, 1]} : vector<22x128xf32> to vector<1x64xf32>
    %578 = vector.broadcast %577 : vector<1x64xf32> to vector<16x64xf32>
    %579 = arith.addf %576, %578 : vector<16x64xf32>
    %cst_129 = arith.constant 0.000000e+00 : f32
    %580 = vector.broadcast %cst_129 : f32 to vector<16x64xf32>
    %581 = arith.maximumf %579, %580 : vector<16x64xf32>
    %c0_130 = arith.constant 0 : index
    %c0_131 = arith.constant 0 : index
    %c0_132 = arith.constant 0 : index
    %582 = vector.load %arg10[%c0_130, %c0_131, %c0_132] : memref<2x64x32xf32, #tpu.memory_space<vmem>>, vector<1x64x32xf32>
    %583 = vector.shape_cast %582 : vector<1x64x32xf32> to vector<64x32xf32>
    %cst_133 = arith.constant dense<0.000000e+00> : vector<16x32xf32>
    %584 = tpu.matmul %581, %583, %cst_133 {dimension_numbers = #tpu.dot_dimension_numbers<[1], [0], [0], [1], [0, 0, 1, 1], [], []>} : vector<16x64xf32>, vector<64x32xf32>, vector<16x32xf32> -> vector<16x32xf32>
    %585 = vector.extract_strided_slice %0 {offsets = [10, 0], sizes = [1, 32], strides = [1, 1]} : vector<22x128xf32> to vector<1x32xf32>
    %586 = vector.broadcast %585 : vector<1x32xf32> to vector<16x32xf32>
    %587 = arith.addf %584, %586 : vector<16x32xf32>
    %588 = arith.addf %573, %587 : vector<16x32xf32>
    %589 = vector.extract_strided_slice %0 {offsets = [11, 0], sizes = [1, 32], strides = [1, 1]} : vector<22x128xf32> to vector<1x32xf32>
    %590 = vector.extract_strided_slice %0 {offsets = [12, 0], sizes = [1, 32], strides = [1, 1]} : vector<22x128xf32> to vector<1x32xf32>
    %cst_134 = arith.constant dense<0.000000e+00> : vector<16xf32>
    %591 = vector.multi_reduction <add>, %588, %cst_134 [1] : vector<16x32xf32> to vector<16xf32>
    %592 = vector.shape_cast %591 : vector<16xf32> to vector<16x1xf32>
    %cst_135 = arith.constant 3.200000e+01 : f32
    %593 = vector.broadcast %cst_135 : f32 to vector<16x1xf32>
    %594 = arith.divf %592, %593 : vector<16x1xf32>
    %595 = vector.broadcast %594 : vector<16x1xf32> to vector<16x32xf32>
    %596 = arith.subf %588, %595 : vector<16x32xf32>
    %597 = arith.mulf %596, %596 : vector<16x32xf32>
    %cst_136 = arith.constant dense<0.000000e+00> : vector<16xf32>
    %598 = vector.multi_reduction <add>, %597, %cst_136 [1] : vector<16x32xf32> to vector<16xf32>
    %599 = vector.shape_cast %598 : vector<16xf32> to vector<16x1xf32>
    %cst_137 = arith.constant 3.200000e+01 : f32
    %600 = vector.broadcast %cst_137 : f32 to vector<16x1xf32>
    %601 = arith.divf %599, %600 : vector<16x1xf32>
    %602 = vector.broadcast %594 : vector<16x1xf32> to vector<16x32xf32>
    %603 = arith.subf %588, %602 : vector<16x32xf32>
    %cst_138 = arith.constant 9.99999974E-6 : f32
    %604 = vector.broadcast %cst_138 : f32 to vector<16x1xf32>
    %605 = arith.addf %601, %604 : vector<16x1xf32>
    %606 = math.rsqrt %605 : vector<16x1xf32>
    %607 = vector.broadcast %606 : vector<16x1xf32> to vector<16x32xf32>
    %608 = arith.mulf %603, %607 : vector<16x32xf32>
    %609 = vector.broadcast %589 : vector<1x32xf32> to vector<16x32xf32>
    %610 = arith.mulf %608, %609 : vector<16x32xf32>
    %611 = vector.broadcast %590 : vector<1x32xf32> to vector<16x32xf32>
    %612 = arith.addf %610, %611 : vector<16x32xf32>
    %c1 = arith.constant 1 : index
    %c0_139 = arith.constant 0 : index
    %c0_140 = arith.constant 0 : index
    %613 = vector.load %arg7[%c1, %c0_139, %c0_140] : memref<2x32x96xf32, #tpu.memory_space<vmem>>, vector<1x32x96xf32>
    %614 = vector.shape_cast %613 : vector<1x32x96xf32> to vector<32x96xf32>
    %cst_141 = arith.constant dense<0.000000e+00> : vector<16x96xf32>
    %615 = tpu.matmul %612, %614, %cst_141 {dimension_numbers = #tpu.dot_dimension_numbers<[1], [0], [0], [1], [0, 0, 1, 1], [], []>} : vector<16x32xf32>, vector<32x96xf32>, vector<16x96xf32> -> vector<16x96xf32>
    %616 = vector.extract_strided_slice %0 {offsets = [13, 0], sizes = [1, 96], strides = [1, 1]} : vector<22x128xf32> to vector<1x96xf32>
    %617 = vector.broadcast %616 : vector<1x96xf32> to vector<16x96xf32>
    %618 = arith.addf %615, %617 : vector<16x96xf32>
    %619 = vector.extract_strided_slice %618 {offsets = [0, 0], sizes = [16, 8], strides = [1, 1]} : vector<16x96xf32> to vector<16x8xf32>
    %620 = vector.shape_cast %619 : vector<16x8xf32> to vector<2x8x8xf32>
    %621 = vector.extract_strided_slice %618 {offsets = [0, 32], sizes = [16, 8], strides = [1, 1]} : vector<16x96xf32> to vector<16x8xf32>
    %622 = vector.shape_cast %621 : vector<16x8xf32> to vector<2x8x8xf32>
    %623 = vector.extract_strided_slice %618 {offsets = [0, 64], sizes = [16, 8], strides = [1, 1]} : vector<16x96xf32> to vector<16x8xf32>
    %624 = vector.shape_cast %623 : vector<16x8xf32> to vector<2x8x8xf32>
    "tpu.trace_start"() <{level = 10 : i32, message = "bqd,bkd->bqk"}> : () -> ()
    %cst_142 = arith.constant dense<0.000000e+00> : vector<2x8x8xf32>
    %625 = tpu.matmul %620, %622, %cst_142 {dimension_numbers = #tpu.dot_dimension_numbers<[2], [2], [1], [1], [0, 0, 0, 1, 1, 1], [0], [0]>} : vector<2x8x8xf32>, vector<2x8x8xf32>, vector<2x8x8xf32> -> vector<2x8x8xf32>
    "tpu.trace_stop"() : () -> ()
    %cst_143 = arith.constant 0.353553385 : f32
    %626 = vector.broadcast %cst_143 : f32 to vector<2x8x8xf32>
    %627 = arith.mulf %625, %626 : vector<2x8x8xf32>
    %cst_144 = arith.constant dense<0xFF800000> : vector<2x8xf32>
    %628 = vector.multi_reduction <maximumf>, %627, %cst_144 [2] : vector<2x8x8xf32> to vector<2x8xf32>
    %629 = vector.shape_cast %628 : vector<2x8xf32> to vector<2x8x1xf32>
    %630 = vector.broadcast %629 : vector<2x8x1xf32> to vector<2x8x8xf32>
    %631 = arith.subf %627, %630 : vector<2x8x8xf32>
    %632 = math.exp %631 : vector<2x8x8xf32>
    %cst_145 = arith.constant dense<0.000000e+00> : vector<2x8xf32>
    %633 = vector.multi_reduction <add>, %632, %cst_145 [2] : vector<2x8x8xf32> to vector<2x8xf32>
    %634 = vector.shape_cast %633 : vector<2x8xf32> to vector<2x8x1xf32>
    %635 = tpu.reciprocal %634 {approx = true} : vector<2x8x1xf32> -> vector<2x8x1xf32>
    %636 = vector.broadcast %635 : vector<2x8x1xf32> to vector<2x8x8xf32>
    %637 = arith.mulf %632, %636 : vector<2x8x8xf32>
    "tpu.trace_start"() <{level = 10 : i32, message = "bqk,bkd->bqd"}> : () -> ()
    %cst_146 = arith.constant dense<0.000000e+00> : vector<2x8x8xf32>
    %638 = tpu.matmul %637, %624, %cst_146 {dimension_numbers = #tpu.dot_dimension_numbers<[2], [1], [1], [2], [0, 0, 0, 1, 1, 2], [0], [0]>} : vector<2x8x8xf32>, vector<2x8x8xf32>, vector<2x8x8xf32> -> vector<2x8x8xf32>
    "tpu.trace_stop"() : () -> ()
    %639 = vector.shape_cast %638 : vector<2x8x8xf32> to vector<16x8xf32>
    %640 = vector.extract_strided_slice %618 {offsets = [0, 8], sizes = [16, 8], strides = [1, 1]} : vector<16x96xf32> to vector<16x8xf32>
    %641 = vector.shape_cast %640 : vector<16x8xf32> to vector<2x8x8xf32>
    %642 = vector.extract_strided_slice %618 {offsets = [0, 40], sizes = [16, 8], strides = [1, 1]} : vector<16x96xf32> to vector<16x8xf32>
    %643 = vector.shape_cast %642 : vector<16x8xf32> to vector<2x8x8xf32>
    %644 = vector.extract_strided_slice %618 {offsets = [0, 72], sizes = [16, 8], strides = [1, 1]} : vector<16x96xf32> to vector<16x8xf32>
    %645 = vector.shape_cast %644 : vector<16x8xf32> to vector<2x8x8xf32>
    "tpu.trace_start"() <{level = 10 : i32, message = "bqd,bkd->bqk"}> : () -> ()
    %cst_147 = arith.constant dense<0.000000e+00> : vector<2x8x8xf32>
    %646 = tpu.matmul %641, %643, %cst_147 {dimension_numbers = #tpu.dot_dimension_numbers<[2], [2], [1], [1], [0, 0, 0, 1, 1, 1], [0], [0]>} : vector<2x8x8xf32>, vector<2x8x8xf32>, vector<2x8x8xf32> -> vector<2x8x8xf32>
    "tpu.trace_stop"() : () -> ()
    %cst_148 = arith.constant 0.353553385 : f32
    %647 = vector.broadcast %cst_148 : f32 to vector<2x8x8xf32>
    %648 = arith.mulf %646, %647 : vector<2x8x8xf32>
    %cst_149 = arith.constant dense<0xFF800000> : vector<2x8xf32>
    %649 = vector.multi_reduction <maximumf>, %648, %cst_149 [2] : vector<2x8x8xf32> to vector<2x8xf32>
    %650 = vector.shape_cast %649 : vector<2x8xf32> to vector<2x8x1xf32>
    %651 = vector.broadcast %650 : vector<2x8x1xf32> to vector<2x8x8xf32>
    %652 = arith.subf %648, %651 : vector<2x8x8xf32>
    %653 = math.exp %652 : vector<2x8x8xf32>
    %cst_150 = arith.constant dense<0.000000e+00> : vector<2x8xf32>
    %654 = vector.multi_reduction <add>, %653, %cst_150 [2] : vector<2x8x8xf32> to vector<2x8xf32>
    %655 = vector.shape_cast %654 : vector<2x8xf32> to vector<2x8x1xf32>
    %656 = tpu.reciprocal %655 {approx = true} : vector<2x8x1xf32> -> vector<2x8x1xf32>
    %657 = vector.broadcast %656 : vector<2x8x1xf32> to vector<2x8x8xf32>
    %658 = arith.mulf %653, %657 : vector<2x8x8xf32>
    "tpu.trace_start"() <{level = 10 : i32, message = "bqk,bkd->bqd"}> : () -> ()
    %cst_151 = arith.constant dense<0.000000e+00> : vector<2x8x8xf32>
    %659 = tpu.matmul %658, %645, %cst_151 {dimension_numbers = #tpu.dot_dimension_numbers<[2], [1], [1], [2], [0, 0, 0, 1, 1, 2], [0], [0]>} : vector<2x8x8xf32>, vector<2x8x8xf32>, vector<2x8x8xf32> -> vector<2x8x8xf32>
    "tpu.trace_stop"() : () -> ()
    %660 = vector.shape_cast %659 : vector<2x8x8xf32> to vector<16x8xf32>
    %661 = vector.extract_strided_slice %618 {offsets = [0, 16], sizes = [16, 8], strides = [1, 1]} : vector<16x96xf32> to vector<16x8xf32>
    %662 = vector.shape_cast %661 : vector<16x8xf32> to vector<2x8x8xf32>
    %663 = vector.extract_strided_slice %618 {offsets = [0, 48], sizes = [16, 8], strides = [1, 1]} : vector<16x96xf32> to vector<16x8xf32>
    %664 = vector.shape_cast %663 : vector<16x8xf32> to vector<2x8x8xf32>
    %665 = vector.extract_strided_slice %618 {offsets = [0, 80], sizes = [16, 8], strides = [1, 1]} : vector<16x96xf32> to vector<16x8xf32>
    %666 = vector.shape_cast %665 : vector<16x8xf32> to vector<2x8x8xf32>
    "tpu.trace_start"() <{level = 10 : i32, message = "bqd,bkd->bqk"}> : () -> ()
    %cst_152 = arith.constant dense<0.000000e+00> : vector<2x8x8xf32>
    %667 = tpu.matmul %662, %664, %cst_152 {dimension_numbers = #tpu.dot_dimension_numbers<[2], [2], [1], [1], [0, 0, 0, 1, 1, 1], [0], [0]>} : vector<2x8x8xf32>, vector<2x8x8xf32>, vector<2x8x8xf32> -> vector<2x8x8xf32>
    "tpu.trace_stop"() : () -> ()
    %cst_153 = arith.constant 0.353553385 : f32
    %668 = vector.broadcast %cst_153 : f32 to vector<2x8x8xf32>
    %669 = arith.mulf %667, %668 : vector<2x8x8xf32>
    %cst_154 = arith.constant dense<0xFF800000> : vector<2x8xf32>
    %670 = vector.multi_reduction <maximumf>, %669, %cst_154 [2] : vector<2x8x8xf32> to vector<2x8xf32>
    %671 = vector.shape_cast %670 : vector<2x8xf32> to vector<2x8x1xf32>
    %672 = vector.broadcast %671 : vector<2x8x1xf32> to vector<2x8x8xf32>
    %673 = arith.subf %669, %672 : vector<2x8x8xf32>
    %674 = math.exp %673 : vector<2x8x8xf32>
    %cst_155 = arith.constant dense<0.000000e+00> : vector<2x8xf32>
    %675 = vector.multi_reduction <add>, %674, %cst_155 [2] : vector<2x8x8xf32> to vector<2x8xf32>
    %676 = vector.shape_cast %675 : vector<2x8xf32> to vector<2x8x1xf32>
    %677 = tpu.reciprocal %676 {approx = true} : vector<2x8x1xf32> -> vector<2x8x1xf32>
    %678 = vector.broadcast %677 : vector<2x8x1xf32> to vector<2x8x8xf32>
    %679 = arith.mulf %674, %678 : vector<2x8x8xf32>
    "tpu.trace_start"() <{level = 10 : i32, message = "bqk,bkd->bqd"}> : () -> ()
    %cst_156 = arith.constant dense<0.000000e+00> : vector<2x8x8xf32>
    %680 = tpu.matmul %679, %666, %cst_156 {dimension_numbers = #tpu.dot_dimension_numbers<[2], [1], [1], [2], [0, 0, 0, 1, 1, 2], [0], [0]>} : vector<2x8x8xf32>, vector<2x8x8xf32>, vector<2x8x8xf32> -> vector<2x8x8xf32>
    "tpu.trace_stop"() : () -> ()
    %681 = vector.shape_cast %680 : vector<2x8x8xf32> to vector<16x8xf32>
    %682 = vector.extract_strided_slice %618 {offsets = [0, 24], sizes = [16, 8], strides = [1, 1]} : vector<16x96xf32> to vector<16x8xf32>
    %683 = vector.shape_cast %682 : vector<16x8xf32> to vector<2x8x8xf32>
    %684 = vector.extract_strided_slice %618 {offsets = [0, 56], sizes = [16, 8], strides = [1, 1]} : vector<16x96xf32> to vector<16x8xf32>
    %685 = vector.shape_cast %684 : vector<16x8xf32> to vector<2x8x8xf32>
    %686 = vector.extract_strided_slice %618 {offsets = [0, 88], sizes = [16, 8], strides = [1, 1]} : vector<16x96xf32> to vector<16x8xf32>
    %687 = vector.shape_cast %686 : vector<16x8xf32> to vector<2x8x8xf32>
    "tpu.trace_start"() <{level = 10 : i32, message = "bqd,bkd->bqk"}> : () -> ()
    %cst_157 = arith.constant dense<0.000000e+00> : vector<2x8x8xf32>
    %688 = tpu.matmul %683, %685, %cst_157 {dimension_numbers = #tpu.dot_dimension_numbers<[2], [2], [1], [1], [0, 0, 0, 1, 1, 1], [0], [0]>} : vector<2x8x8xf32>, vector<2x8x8xf32>, vector<2x8x8xf32> -> vector<2x8x8xf32>
    "tpu.trace_stop"() : () -> ()
    %cst_158 = arith.constant 0.353553385 : f32
    %689 = vector.broadcast %cst_158 : f32 to vector<2x8x8xf32>
    %690 = arith.mulf %688, %689 : vector<2x8x8xf32>
    %cst_159 = arith.constant dense<0xFF800000> : vector<2x8xf32>
    %691 = vector.multi_reduction <maximumf>, %690, %cst_159 [2] : vector<2x8x8xf32> to vector<2x8xf32>
    %692 = vector.shape_cast %691 : vector<2x8xf32> to vector<2x8x1xf32>
    %693 = vector.broadcast %692 : vector<2x8x1xf32> to vector<2x8x8xf32>
    %694 = arith.subf %690, %693 : vector<2x8x8xf32>
    %695 = math.exp %694 : vector<2x8x8xf32>
    %cst_160 = arith.constant dense<0.000000e+00> : vector<2x8xf32>
    %696 = vector.multi_reduction <add>, %695, %cst_160 [2] : vector<2x8x8xf32> to vector<2x8xf32>
    %697 = vector.shape_cast %696 : vector<2x8xf32> to vector<2x8x1xf32>
    %698 = tpu.reciprocal %697 {approx = true} : vector<2x8x1xf32> -> vector<2x8x1xf32>
    %699 = vector.broadcast %698 : vector<2x8x1xf32> to vector<2x8x8xf32>
    %700 = arith.mulf %695, %699 : vector<2x8x8xf32>
    "tpu.trace_start"() <{level = 10 : i32, message = "bqk,bkd->bqd"}> : () -> ()
    %cst_161 = arith.constant dense<0.000000e+00> : vector<2x8x8xf32>
    %701 = tpu.matmul %700, %687, %cst_161 {dimension_numbers = #tpu.dot_dimension_numbers<[2], [1], [1], [2], [0, 0, 0, 1, 1, 2], [0], [0]>} : vector<2x8x8xf32>, vector<2x8x8xf32>, vector<2x8x8xf32> -> vector<2x8x8xf32>
    "tpu.trace_stop"() : () -> ()
    %702 = vector.shape_cast %701 : vector<2x8x8xf32> to vector<16x8xf32>
    %703 = tpu.concatenate %639, %660, %681, %702 in 1 : vector<16x8xf32>, vector<16x8xf32>, vector<16x8xf32>, vector<16x8xf32> -> vector<16x32xf32>
    %c1_162 = arith.constant 1 : index
    %c0_163 = arith.constant 0 : index
    %c0_164 = arith.constant 0 : index
    %704 = vector.load %arg8[%c1_162, %c0_163, %c0_164] : memref<2x32x32xf32, #tpu.memory_space<vmem>>, vector<1x32x32xf32>
    %705 = vector.shape_cast %704 : vector<1x32x32xf32> to vector<32x32xf32>
    %cst_165 = arith.constant dense<0.000000e+00> : vector<16x32xf32>
    %706 = tpu.matmul %703, %705, %cst_165 {dimension_numbers = #tpu.dot_dimension_numbers<[1], [0], [0], [1], [0, 0, 1, 1], [], []>} : vector<16x32xf32>, vector<32x32xf32>, vector<16x32xf32> -> vector<16x32xf32>
    %707 = vector.extract_strided_slice %0 {offsets = [14, 0], sizes = [1, 32], strides = [1, 1]} : vector<22x128xf32> to vector<1x32xf32>
    %708 = vector.broadcast %707 : vector<1x32xf32> to vector<16x32xf32>
    %709 = arith.addf %706, %708 : vector<16x32xf32>
    %710 = arith.addf %612, %709 : vector<16x32xf32>
    %711 = vector.extract_strided_slice %0 {offsets = [15, 0], sizes = [1, 32], strides = [1, 1]} : vector<22x128xf32> to vector<1x32xf32>
    %712 = vector.extract_strided_slice %0 {offsets = [16, 0], sizes = [1, 32], strides = [1, 1]} : vector<22x128xf32> to vector<1x32xf32>
    %cst_166 = arith.constant dense<0.000000e+00> : vector<16xf32>
    %713 = vector.multi_reduction <add>, %710, %cst_166 [1] : vector<16x32xf32> to vector<16xf32>
    %714 = vector.shape_cast %713 : vector<16xf32> to vector<16x1xf32>
    %cst_167 = arith.constant 3.200000e+01 : f32
    %715 = vector.broadcast %cst_167 : f32 to vector<16x1xf32>
    %716 = arith.divf %714, %715 : vector<16x1xf32>
    %717 = vector.broadcast %716 : vector<16x1xf32> to vector<16x32xf32>
    %718 = arith.subf %710, %717 : vector<16x32xf32>
    %719 = arith.mulf %718, %718 : vector<16x32xf32>
    %cst_168 = arith.constant dense<0.000000e+00> : vector<16xf32>
    %720 = vector.multi_reduction <add>, %719, %cst_168 [1] : vector<16x32xf32> to vector<16xf32>
    %721 = vector.shape_cast %720 : vector<16xf32> to vector<16x1xf32>
    %cst_169 = arith.constant 3.200000e+01 : f32
    %722 = vector.broadcast %cst_169 : f32 to vector<16x1xf32>
    %723 = arith.divf %721, %722 : vector<16x1xf32>
    %724 = vector.broadcast %716 : vector<16x1xf32> to vector<16x32xf32>
    %725 = arith.subf %710, %724 : vector<16x32xf32>
    %cst_170 = arith.constant 9.99999974E-6 : f32
    %726 = vector.broadcast %cst_170 : f32 to vector<16x1xf32>
    %727 = arith.addf %723, %726 : vector<16x1xf32>
    %728 = math.rsqrt %727 : vector<16x1xf32>
    %729 = vector.broadcast %728 : vector<16x1xf32> to vector<16x32xf32>
    %730 = arith.mulf %725, %729 : vector<16x32xf32>
    %731 = vector.broadcast %711 : vector<1x32xf32> to vector<16x32xf32>
    %732 = arith.mulf %730, %731 : vector<16x32xf32>
    %733 = vector.broadcast %712 : vector<1x32xf32> to vector<16x32xf32>
    %734 = arith.addf %732, %733 : vector<16x32xf32>
    %c1_171 = arith.constant 1 : index
    %c0_172 = arith.constant 0 : index
    %c0_173 = arith.constant 0 : index
    %735 = vector.load %arg9[%c1_171, %c0_172, %c0_173] : memref<2x32x64xf32, #tpu.memory_space<vmem>>, vector<1x32x64xf32>
    %736 = vector.shape_cast %735 : vector<1x32x64xf32> to vector<32x64xf32>
    %cst_174 = arith.constant dense<0.000000e+00> : vector<16x64xf32>
    %737 = tpu.matmul %734, %736, %cst_174 {dimension_numbers = #tpu.dot_dimension_numbers<[1], [0], [0], [1], [0, 0, 1, 1], [], []>} : vector<16x32xf32>, vector<32x64xf32>, vector<16x64xf32> -> vector<16x64xf32>
    %738 = vector.extract_strided_slice %0 {offsets = [17, 0], sizes = [1, 64], strides = [1, 1]} : vector<22x128xf32> to vector<1x64xf32>
    %739 = vector.broadcast %738 : vector<1x64xf32> to vector<16x64xf32>
    %740 = arith.addf %737, %739 : vector<16x64xf32>
    %cst_175 = arith.constant 0.000000e+00 : f32
    %741 = vector.broadcast %cst_175 : f32 to vector<16x64xf32>
    %742 = arith.maximumf %740, %741 : vector<16x64xf32>
    %c1_176 = arith.constant 1 : index
    %c0_177 = arith.constant 0 : index
    %c0_178 = arith.constant 0 : index
    %743 = vector.load %arg10[%c1_176, %c0_177, %c0_178] : memref<2x64x32xf32, #tpu.memory_space<vmem>>, vector<1x64x32xf32>
    %744 = vector.shape_cast %743 : vector<1x64x32xf32> to vector<64x32xf32>
    %cst_179 = arith.constant dense<0.000000e+00> : vector<16x32xf32>
    %745 = tpu.matmul %742, %744, %cst_179 {dimension_numbers = #tpu.dot_dimension_numbers<[1], [0], [0], [1], [0, 0, 1, 1], [], []>} : vector<16x64xf32>, vector<64x32xf32>, vector<16x32xf32> -> vector<16x32xf32>
    %746 = vector.extract_strided_slice %0 {offsets = [18, 0], sizes = [1, 32], strides = [1, 1]} : vector<22x128xf32> to vector<1x32xf32>
    %747 = vector.broadcast %746 : vector<1x32xf32> to vector<16x32xf32>
    %748 = arith.addf %745, %747 : vector<16x32xf32>
    %749 = arith.addf %734, %748 : vector<16x32xf32>
    %750 = vector.extract_strided_slice %0 {offsets = [19, 0], sizes = [1, 32], strides = [1, 1]} : vector<22x128xf32> to vector<1x32xf32>
    %751 = vector.extract_strided_slice %0 {offsets = [20, 0], sizes = [1, 32], strides = [1, 1]} : vector<22x128xf32> to vector<1x32xf32>
    %cst_180 = arith.constant dense<0.000000e+00> : vector<16xf32>
    %752 = vector.multi_reduction <add>, %749, %cst_180 [1] : vector<16x32xf32> to vector<16xf32>
    %753 = vector.shape_cast %752 : vector<16xf32> to vector<16x1xf32>
    %cst_181 = arith.constant 3.200000e+01 : f32
    %754 = vector.broadcast %cst_181 : f32 to vector<16x1xf32>
    %755 = arith.divf %753, %754 : vector<16x1xf32>
    %756 = vector.broadcast %755 : vector<16x1xf32> to vector<16x32xf32>
    %757 = arith.subf %749, %756 : vector<16x32xf32>
    %758 = arith.mulf %757, %757 : vector<16x32xf32>
    %cst_182 = arith.constant dense<0.000000e+00> : vector<16xf32>
    %759 = vector.multi_reduction <add>, %758, %cst_182 [1] : vector<16x32xf32> to vector<16xf32>
    %760 = vector.shape_cast %759 : vector<16xf32> to vector<16x1xf32>
    %cst_183 = arith.constant 3.200000e+01 : f32
    %761 = vector.broadcast %cst_183 : f32 to vector<16x1xf32>
    %762 = arith.divf %760, %761 : vector<16x1xf32>
    %763 = vector.broadcast %755 : vector<16x1xf32> to vector<16x32xf32>
    %764 = arith.subf %749, %763 : vector<16x32xf32>
    %cst_184 = arith.constant 9.99999974E-6 : f32
    %765 = vector.broadcast %cst_184 : f32 to vector<16x1xf32>
    %766 = arith.addf %762, %765 : vector<16x1xf32>
    %767 = math.rsqrt %766 : vector<16x1xf32>
    %768 = vector.broadcast %767 : vector<16x1xf32> to vector<16x32xf32>
    %769 = arith.mulf %764, %768 : vector<16x32xf32>
    %770 = vector.broadcast %750 : vector<1x32xf32> to vector<16x32xf32>
    %771 = arith.mulf %769, %770 : vector<16x32xf32>
    %772 = vector.broadcast %751 : vector<1x32xf32> to vector<16x32xf32>
    %773 = arith.addf %771, %772 : vector<16x32xf32>
    %774 = vector.shape_cast %773 : vector<16x32xf32> to vector<2x8x32xf32>
    %775 = vector.extract_strided_slice %774 {offsets = [0, 0, 0], sizes = [2, 1, 32], strides = [1, 1, 1]} : vector<2x8x32xf32> to vector<2x1x32xf32>
    %776 = vector.shape_cast %775 : vector<2x1x32xf32> to vector<2x32xf32>
    %777 = vector.extract_strided_slice %774 {offsets = [0, 1, 0], sizes = [2, 1, 32], strides = [1, 1, 1]} : vector<2x8x32xf32> to vector<2x1x32xf32>
    %778 = vector.shape_cast %777 : vector<2x1x32xf32> to vector<2x32xf32>
    %779 = vector.extract_strided_slice %774 {offsets = [0, 2, 0], sizes = [2, 1, 32], strides = [1, 1, 1]} : vector<2x8x32xf32> to vector<2x1x32xf32>
    %780 = vector.shape_cast %779 : vector<2x1x32xf32> to vector<2x32xf32>
    %781 = vector.extract_strided_slice %774 {offsets = [0, 3, 0], sizes = [2, 1, 32], strides = [1, 1, 1]} : vector<2x8x32xf32> to vector<2x1x32xf32>
    %782 = vector.shape_cast %781 : vector<2x1x32xf32> to vector<2x32xf32>
    %783 = vector.extract_strided_slice %774 {offsets = [0, 4, 0], sizes = [2, 1, 32], strides = [1, 1, 1]} : vector<2x8x32xf32> to vector<2x1x32xf32>
    %784 = vector.shape_cast %783 : vector<2x1x32xf32> to vector<2x32xf32>
    %785 = vector.extract_strided_slice %774 {offsets = [0, 5, 0], sizes = [2, 1, 32], strides = [1, 1, 1]} : vector<2x8x32xf32> to vector<2x1x32xf32>
    %786 = vector.shape_cast %785 : vector<2x1x32xf32> to vector<2x32xf32>
    %787 = vector.extract_strided_slice %774 {offsets = [0, 6, 0], sizes = [2, 1, 32], strides = [1, 1, 1]} : vector<2x8x32xf32> to vector<2x1x32xf32>
    %788 = vector.shape_cast %787 : vector<2x1x32xf32> to vector<2x32xf32>
    %789 = vector.extract_strided_slice %774 {offsets = [0, 7, 0], sizes = [2, 1, 32], strides = [1, 1, 1]} : vector<2x8x32xf32> to vector<2x1x32xf32>
    %790 = vector.shape_cast %789 : vector<2x1x32xf32> to vector<2x32xf32>
    %791 = tpu.concatenate %776, %778, %780, %782, %784, %786, %788, %790 in 1 : vector<2x32xf32>, vector<2x32xf32>, vector<2x32xf32>, vector<2x32xf32>, vector<2x32xf32>, vector<2x32xf32>, vector<2x32xf32>, vector<2x32xf32> -> vector<2x256xf32>
    %c0_185 = arith.constant 0 : index
    %c0_186 = arith.constant 0 : index
    %792 = vector.load %arg11[%c0_185, %c0_186] : memref<256x4xf32, #tpu.memory_space<vmem>>, vector<256x4xf32>
    %cst_187 = arith.constant dense<0.000000e+00> : vector<2x4xf32>
    %793 = tpu.matmul %791, %792, %cst_187 {dimension_numbers = #tpu.dot_dimension_numbers<[1], [0], [0], [1], [0, 0, 1, 1], [], []>} : vector<2x256xf32>, vector<256x4xf32>, vector<2x4xf32> -> vector<2x4xf32>
    %794 = vector.extract_strided_slice %0 {offsets = [21, 0], sizes = [1, 4], strides = [1, 1]} : vector<22x128xf32> to vector<1x4xf32>
    %795 = vector.broadcast %794 : vector<1x4xf32> to vector<2x4xf32>
    %796 = arith.addf %793, %795 : vector<2x4xf32>
    %c0_188 = arith.constant 0 : index
    %c0_189 = arith.constant 0 : index
    %797 = vector.load %arg17[%c0_188, %c0_189] : memref<2x4xf32, #tpu.memory_space<vmem>>, vector<2x4xf32>
    tpu.vector_store %arg17[%c0_188, %c0_189], %796 {strides = array<i32>} : memref<2x4xf32, #tpu.memory_space<vmem>>, vector<2x4xf32>,
    %c0_190 = arith.constant 0 : index
    %c0_191 = arith.constant 0 : index
    %798 = vector.load %arg13[%c0_190, %c0_191] : memref<128x32xf32, #tpu.memory_space<vmem>>, vector<128x32xf32>
    %cst_192 = arith.constant dense<0.000000e+00> : vector<128x128xf32>
    %799 = tpu.matmul %798, %798, %cst_192 {dimension_numbers = #tpu.dot_dimension_numbers<[1], [1], [0], [0], [0, 0, 1, 0], [], []>} : vector<128x32xf32>, vector<128x32xf32>, vector<128x128xf32> -> vector<128x128xf32>
    %800 = tpu.iota {dimensions = array<i32: 0>} : vector<128x128xi32>
    %801 = tpu.iota {dimensions = array<i32: 1>} : vector<128x128xi32>
    %802 = arith.cmpi eq, %800, %801 : vector<128x128xi32>
    %803 = arith.extui %802 : vector<128x128xi1> to vector<128x128xi32>
    %804 = arith.sitofp %803 : vector<128x128xi32> to vector<128x128xf32>
    %805 = arith.subf %799, %804 : vector<128x128xf32>
    %806 = arith.mulf %805, %805 : vector<128x128xf32>
    %807 = vector.shape_cast %806 : vector<128x128xf32> to vector<1x128x128xf32>
    %cst_193 = arith.constant dense<0.000000e+00> : vector<1xf32>
    %808 = vector.multi_reduction <add>, %807, %cst_193 [1, 2] : vector<1x128x128xf32> to vector<1xf32>
    %809 = vector.shape_cast %808 : vector<1xf32> to vector<1x1x1xf32>
    %810 = vector.extract %809[0, 0, 0] : f32 from vector<1x1x1xf32>
    %811 = vector.broadcast %810 : f32 to vector<1x1xf32>
    %812 = math.sqrt %811 : vector<1x1xf32>
    %c0_194 = arith.constant 0 : index
    %c0_195 = arith.constant 0 : index
    %813 = vector.load %arg14[%c0_194, %c0_195] : memref<128x32xf32, #tpu.memory_space<vmem>>, vector<128x32xf32>
    %cst_196 = arith.constant dense<0.000000e+00> : vector<128x128xf32>
    %814 = tpu.matmul %813, %813, %cst_196 {dimension_numbers = #tpu.dot_dimension_numbers<[1], [1], [0], [0], [0, 0, 1, 0], [], []>} : vector<128x32xf32>, vector<128x32xf32>, vector<128x128xf32> -> vector<128x128xf32>
    %815 = tpu.iota {dimensions = array<i32: 0>} : vector<128x128xi32>
    %816 = tpu.iota {dimensions = array<i32: 1>} : vector<128x128xi32>
    %817 = arith.cmpi eq, %815, %816 : vector<128x128xi32>
    %818 = arith.extui %817 : vector<128x128xi1> to vector<128x128xi32>
    %819 = arith.sitofp %818 : vector<128x128xi32> to vector<128x128xf32>
    %820 = arith.subf %814, %819 : vector<128x128xf32>
    %821 = arith.mulf %820, %820 : vector<128x128xf32>
    %822 = vector.shape_cast %821 : vector<128x128xf32> to vector<1x128x128xf32>
    %cst_197 = arith.constant dense<0.000000e+00> : vector<1xf32>
    %823 = vector.multi_reduction <add>, %822, %cst_197 [1, 2] : vector<1x128x128xf32> to vector<1xf32>
    %824 = vector.shape_cast %823 : vector<1xf32> to vector<1x1x1xf32>
    %825 = vector.extract %824[0, 0, 0] : f32 from vector<1x1x1xf32>
    %826 = vector.broadcast %825 : f32 to vector<1x1xf32>
    %827 = math.sqrt %826 : vector<1x1xf32>
    %828 = arith.addf %812, %827 : vector<1x1xf32>
    %c0_198 = arith.constant 0 : index
    %c0_199 = arith.constant 0 : index
    %c0_200 = arith.constant 0 : index
    %829 = vector.load %arg15[%c0_198, %c0_199, %c0_200] : memref<3x32x32xf32, #tpu.memory_space<vmem>>, vector<1x32x32xf32>
    %830 = vector.shape_cast %829 : vector<1x32x32xf32> to vector<32x32xf32>
    %cst_201 = arith.constant dense<0.000000e+00> : vector<32x32xf32>
    %831 = tpu.matmul %830, %830, %cst_201 {dimension_numbers = #tpu.dot_dimension_numbers<[1], [1], [0], [0], [0, 0, 1, 0], [], []>} : vector<32x32xf32>, vector<32x32xf32>, vector<32x32xf32> -> vector<32x32xf32>
    %832 = tpu.iota {dimensions = array<i32: 0>} : vector<32x32xi32>
    %833 = tpu.iota {dimensions = array<i32: 1>} : vector<32x32xi32>
    %834 = arith.cmpi eq, %832, %833 : vector<32x32xi32>
    %835 = arith.extui %834 : vector<32x32xi1> to vector<32x32xi32>
    %836 = arith.sitofp %835 : vector<32x32xi32> to vector<32x32xf32>
    %837 = arith.subf %831, %836 : vector<32x32xf32>
    %838 = arith.mulf %837, %837 : vector<32x32xf32>
    %839 = vector.shape_cast %838 : vector<32x32xf32> to vector<1x32x32xf32>
    %cst_202 = arith.constant dense<0.000000e+00> : vector<1xf32>
    %840 = vector.multi_reduction <add>, %839, %cst_202 [1, 2] : vector<1x32x32xf32> to vector<1xf32>
    %841 = vector.shape_cast %840 : vector<1xf32> to vector<1x1x1xf32>
    %842 = vector.extract %841[0, 0, 0] : f32 from vector<1x1x1xf32>
    %843 = vector.broadcast %842 : f32 to vector<1x1xf32>
    %844 = math.sqrt %843 : vector<1x1xf32>
    %845 = arith.addf %828, %844 : vector<1x1xf32>
    %c1_203 = arith.constant 1 : index
    %c0_204 = arith.constant 0 : index
    %c0_205 = arith.constant 0 : index
    %846 = vector.load %arg15[%c1_203, %c0_204, %c0_205] : memref<3x32x32xf32, #tpu.memory_space<vmem>>, vector<1x32x32xf32>
    %847 = vector.shape_cast %846 : vector<1x32x32xf32> to vector<32x32xf32>
    %cst_206 = arith.constant dense<0.000000e+00> : vector<32x32xf32>
    %848 = tpu.matmul %847, %847, %cst_206 {dimension_numbers = #tpu.dot_dimension_numbers<[1], [1], [0], [0], [0, 0, 1, 0], [], []>} : vector<32x32xf32>, vector<32x32xf32>, vector<32x32xf32> -> vector<32x32xf32>
    %849 = tpu.iota {dimensions = array<i32: 0>} : vector<32x32xi32>
    %850 = tpu.iota {dimensions = array<i32: 1>} : vector<32x32xi32>
    %851 = arith.cmpi eq, %849, %850 : vector<32x32xi32>
    %852 = arith.extui %851 : vector<32x32xi1> to vector<32x32xi32>
    %853 = arith.sitofp %852 : vector<32x32xi32> to vector<32x32xf32>
    %854 = arith.subf %848, %853 : vector<32x32xf32>
    %855 = arith.mulf %854, %854 : vector<32x32xf32>
    %856 = vector.shape_cast %855 : vector<32x32xf32> to vector<1x32x32xf32>
    %cst_207 = arith.constant dense<0.000000e+00> : vector<1xf32>
    %857 = vector.multi_reduction <add>, %856, %cst_207 [1, 2] : vector<1x32x32xf32> to vector<1xf32>
    %858 = vector.shape_cast %857 : vector<1xf32> to vector<1x1x1xf32>
    %859 = vector.extract %858[0, 0, 0] : f32 from vector<1x1x1xf32>
    %860 = vector.broadcast %859 : f32 to vector<1x1xf32>
    %861 = math.sqrt %860 : vector<1x1xf32>
    %862 = arith.addf %845, %861 : vector<1x1xf32>
    %c2 = arith.constant 2 : index
    %c0_208 = arith.constant 0 : index
    %c0_209 = arith.constant 0 : index
    %863 = vector.load %arg15[%c2, %c0_208, %c0_209] : memref<3x32x32xf32, #tpu.memory_space<vmem>>, vector<1x32x32xf32>
    %864 = vector.shape_cast %863 : vector<1x32x32xf32> to vector<32x32xf32>
    %cst_210 = arith.constant dense<0.000000e+00> : vector<32x32xf32>
    %865 = tpu.matmul %864, %864, %cst_210 {dimension_numbers = #tpu.dot_dimension_numbers<[1], [1], [0], [0], [0, 0, 1, 0], [], []>} : vector<32x32xf32>, vector<32x32xf32>, vector<32x32xf32> -> vector<32x32xf32>
    %866 = tpu.iota {dimensions = array<i32: 0>} : vector<32x32xi32>
    %867 = tpu.iota {dimensions = array<i32: 1>} : vector<32x32xi32>
    %868 = arith.cmpi eq, %866, %867 : vector<32x32xi32>
    %869 = arith.extui %868 : vector<32x32xi1> to vector<32x32xi32>
    %870 = arith.sitofp %869 : vector<32x32xi32> to vector<32x32xf32>
    %871 = arith.subf %865, %870 : vector<32x32xf32>
    %872 = arith.mulf %871, %871 : vector<32x32xf32>
    %873 = vector.shape_cast %872 : vector<32x32xf32> to vector<1x32x32xf32>
    %cst_211 = arith.constant dense<0.000000e+00> : vector<1xf32>
    %874 = vector.multi_reduction <add>, %873, %cst_211 [1, 2] : vector<1x32x32xf32> to vector<1xf32>
    %875 = vector.shape_cast %874 : vector<1xf32> to vector<1x1x1xf32>
    %876 = vector.extract %875[0, 0, 0] : f32 from vector<1x1x1xf32>
    %877 = vector.broadcast %876 : f32 to vector<1x1xf32>
    %878 = math.sqrt %877 : vector<1x1xf32>
    %879 = arith.addf %862, %878 : vector<1x1xf32>
    %c0_212 = arith.constant 0 : index
    %c0_213 = arith.constant 0 : index
    %880 = vector.load %arg16[%c0_212, %c0_213] : memref<4x256xf32, #tpu.memory_space<vmem>>, vector<4x256xf32>
    %cst_214 = arith.constant dense<0.000000e+00> : vector<4x4xf32>
    %881 = tpu.matmul %880, %880, %cst_214 {dimension_numbers = #tpu.dot_dimension_numbers<[1], [1], [0], [0], [0, 0, 1, 0], [], []>} : vector<4x256xf32>, vector<4x256xf32>, vector<4x4xf32> -> vector<4x4xf32>
    %882 = tpu.iota {dimensions = array<i32: 0>} : vector<4x4xi32>
    %883 = tpu.iota {dimensions = array<i32: 1>} : vector<4x4xi32>
    %884 = arith.cmpi eq, %882, %883 : vector<4x4xi32>
    %885 = arith.extui %884 : vector<4x4xi1> to vector<4x4xi32>
    %886 = arith.sitofp %885 : vector<4x4xi32> to vector<4x4xf32>
    %887 = arith.subf %881, %886 : vector<4x4xf32>
    %888 = arith.mulf %887, %887 : vector<4x4xf32>
    %889 = vector.shape_cast %888 : vector<4x4xf32> to vector<1x4x4xf32>
    %cst_215 = arith.constant dense<0.000000e+00> : vector<1xf32>
    %890 = vector.multi_reduction <add>, %889, %cst_215 [1, 2] : vector<1x4x4xf32> to vector<1xf32>
    %891 = vector.shape_cast %890 : vector<1xf32> to vector<1x1x1xf32>
    %892 = vector.extract %891[0, 0, 0] : f32 from vector<1x1x1xf32>
    %893 = vector.broadcast %892 : f32 to vector<1x1xf32>
    %894 = math.sqrt %893 : vector<1x1xf32>
    %895 = arith.addf %879, %894 : vector<1x1xf32>
    %c0_216 = arith.constant 0 : index
    %c0_217 = arith.constant 0 : index
    %896 = vector.load %arg18[%c0_216, %c0_217] : memref<1x1xf32, #tpu.memory_space<vmem>>, vector<1x1xf32>
    tpu.vector_store %arg18[%c0_216, %c0_217], %895 {strides = array<i32>} : memref<1x1xf32, #tpu.memory_space<vmem>>, vector<1x1xf32>,
    return
  }
}

</mosaic_0001>

<bundles_post_ra>
// kernel: tpu_custom_call.1
= control target key start
LH: loop header
LB: loop body
LE: loop exit
PB: predicated region body
PF: predicated region fallthrough
CT: control target
= control target key end

     0   :  { %s10375_s0 = inlined_call_operand.vmem [shape: f32[2,8,4], index: 0, kind: input, shape index: {}]   ;;  %s10376_s1 = inlined_call_operand.vmem [shape: f32[2,2], index: 1, kind: input, shape index: {}]   ;;  %s10377_s2 = inlined_call_operand.vmem [shape: f32[4,32], index: 2, kind: input, shape index: {}]   ;;  %s10378_s3 = inlined_call_operand.vmem [shape: f32[8,32], index: 3, kind: input, shape index: {}]   ;;  %s10379_s4 = inlined_call_operand.vmem [shape: f32[2,32], index: 4, kind: input, shape index: {}]   ;;  %s10380_s5 = inlined_call_operand.vmem [shape: f32[32,128], index: 5, kind: input, shape index: {}]   ;;  %s10381_s6 = inlined_call_operand.vmem [shape: f32[32,128], index: 6, kind: input, shape index: {}]   ;;  %s10382_s7 = inlined_call_operand.vmem [shape: f32[2,32,96], index: 7, kind: input, shape index: {}]   ;;  %s10383_s8 = inlined_call_operand.vmem [shape: f32[2,32,32], index: 8, kind: input, shape index: {}]   ;;  %s10384_s9 = inlined_call_operand.vmem [shape: f32[2,32,64], index: 9, kind: input, shape index: {}]   ;;  %s10385_s10 = inlined_call_operand.vmem [shape: f32[2,64,32], index: 10, kind: input, shape index: {}]   ;;  %s10386_s11 = inlined_call_operand.vmem [shape: f32[256,4], index: 11, kind: input, shape index: {}]   ;;  %s10387_s12 = inlined_call_operand.vmem [shape: f32[22,128], index: 12, kind: input, shape index: {}]   ;;  %s10388_s13 = inlined_call_operand.vmem [shape: f32[128,32], index: 13, kind: input, shape index: {}]   ;;  %s10389_s14 = inlined_call_operand.vmem [shape: f32[128,32], index: 14, kind: input, shape index: {}]   ;;  %s10390_s15 = inlined_call_operand.vmem [shape: f32[3,32,32], index: 15, kind: input, shape index: {}]   ;;  %s10391_s16 = inlined_call_operand.vmem [shape: f32[4,256], index: 16, kind: input, shape index: {}]   ;;  %s10392_s17 = inlined_call_operand.hbm [shape: f32[2,4], index: 17, kind: output, shape index: {0}]   ;;  %s10393_s18 = inlined_call_operand.hbm [shape: f32[1,1], index: 18, kind: output, shape index: {1}]  }
   0x1   :  { %10412 = sst [smem:[#allocation8_spill]] %s10375_s0 }
   0x2   :  { %10413 = sst [smem:[#allocation9_spill]] %s10376_s1 }
   0x3   :  { %10414 = sst [smem:[#allocation10_spill]] %s10377_s2 }
   0x4   :  { %24 = vsyncpa [#allocation3], 0  ;;  %v157_v0 = vld [vmem:[%s10379_s4] sm:$0x3]  ;;  %vm10399_vm0 = vcmask 1041408   ;;  %vm162_vm1 = vcmask 15360  }
   0x5   :  { %v8597_v1 = vmov 0.0   ;;  %vm10395_vm2 = vmmov 0   ;;  %s10415_s0 = sld [smem:[#allocation9_spill]]  ;;  %s10416_s20 = sld [smem:[#allocation10_spill]]  ;;  %vm10398_vm3 = vcmask 1043456   ;;  %vm70_vm4 = vcmask 31744  }
   0x6   :  { %7438 = vmatprep.subr.mxu1 %v8597_v1  ;;  %7440 = vmatprep.mubr.msk.f32.mxu1 %vm10395_vm2, %v8597_v1  ;;  %s10417_s22 = sld [smem:[#allocation8_spill]] }
   0x7   :  { %7439 = vmatpush3.msk.msra.mxu1 %vm10399_vm0, %v157_v0 }
   0xb   :  { %v156_v2 = vld [vmem:[%s10415_s0] sm:$0x3] }
   0xc   :  { %v65_v3 = vld [vmem:[%s10416_s20] sm:$0xf]  ;;  %v64_v5 = vld [vmem:[%s10417_s22 + $0x8] sm:$0xff] }
   0xd   :  { %v63_v4 = vld [vmem:[%s10417_s22] sm:$0xff]  ;;  %7433 = vmatprep.subr.msk.mxu0 %vm10398_vm3, %v65_v3 }
   0xe   :  { %25 = vsyncpa [#allocation5], 0  ;;  %7441 = vmatmul.mubr.msk.f32.vlgmr.msra.gmra.mrb[0].mxu1 %vm162_vm1, %v156_v2  ;;  %7434 = vmatpush3.msk.msra.mxu0 %vm10398_vm3, %v65_v3  ;;  %v278_v6 = vld [vmem:[%s10380_s5] sm:$0xff]  ;;  %v279_v7 = vld [vmem:[%s10380_s5 + $0x8] sm:$0xff]  ;;  %v8599_v11 = vmov 0.0|0.0   ;;  %v66_v19 = vlaneseq  ;;  %vm10397_vm5 = vcmask 261120  }
   0xf   :  { %7435 = vmatprep.mubr.msk.f32.mxu0 %vm70_vm4, %v63_v4  ;;  %7462 = vmatprep.mubr.msk.f32.mxu1 %vm10395_vm2, %v8597_v1  ;;  %v368_v8 = vld [vmem:[%s10381_s6] sm:$0xff]  ;;  %v7960_v9 = vpack.c.bf16 %v279_v7, %v278_v6  ;;  %v369_v10 = vld [vmem:[%s10381_s6 + $0x8] sm:$0xff]  ;;  %v280_v13 = vld [vmem:[%s10380_s5 + $0x10] sm:$0xff]  ;;  %v8600_v21 = vmov 1966171168   ;;  %s8602_s26 = smov 32  }
  0x10   :  { %7436 = vmatmul.mubr.msk.f32.vlgmr.msra.gmra.mrb[0].mxu0 %vm70_vm4, %v64_v5  ;;  %7968 = vmatprep.subr.bf16.mxu1 %v8599_v11  ;;  %v8749_v12 = vpack.c.bf16 %v369_v10, %v368_v8  ;;  %v281_v14 = vld [vmem:[%s10380_s5 + $0x18] sm:$0xff]  ;;  %v370_v16 = vld [vmem:[%s10381_s6 + $0x10] sm:$0xff]  ;;  %v8778_v20 = vshrl.u32 %v66_v19, 7  ;;  %v245_v22 = vunpack.c.l.s4 %v8600_v21  ;;  %v60_v24 = vld [vmem:[%s10387_s12] sm:$0xff]  ;;  %vm502_vm6 = vcmask 1041409   ;;  %s8603_s29 = smov 96  }
  0x11   :  { %7961 = vmatprep.subr.bf16.mxu0 %v7960_v9  ;;  %v7964_v15 = vpack.c.bf16 %v281_v14, %v280_v13  ;;  %v371_v17 = vld [vmem:[%s10381_s6 + $0x18] sm:$0xff]  ;;  %v240_v35 = vld [vmem:[%s10378_s3] sm:$0xff]  ;;  %s8601_s3 = smov 64   ;;  %vm876_vm7 = vcmask 1043459   ;;  %vm695_vm8 = vcmask 1042434   ;;  %vm1240_vm9 = vcmask 1045509  }
  0x12   :  { %7970 = vmatpush3.bf16.msra.mxu1 %v8749_v12  ;;  %7963 = vmatpush3.bf16.msra.mxu0 %v7960_v9  ;;  %v8765_v18 = vpack.c.bf16 %v371_v17, %v370_v16  ;;  %v8781_v23 = vsub.s32 1, %v8778_v20  ;;  %v246_v25 = vunpack.c.0.s8 %v245_v22  ;;  %v8787_v26 = vsub.s32 0, %v8778_v20  ;;  %s8604_s2 = smov 88   ;;  %s8605_s23 = smov 120  }
  0x13   :  { %7971 = vmatprep.subr.bf16.mxu1 %v8599_v11  ;;  %7965 = vmatprep.subr.bf16.mxu0 %v7964_v15  ;;  %v8806_v50 = vsub.s32 2, %v8778_v20  ;;  %vm1058_vm10 = vcmask 1044484   ;;  %vm1604_vm11 = vcmask 1047559   ;;  %vm1422_vm12 = vcmask 1046534   ;;  %s8606_s5 = smov 56   ;;  %s8607_s6 = smov 80  }
  0x14   :  { %v161_v27 = vrot.slane %v60_v24, %v8781_v23  ;;  %v249_v28 = vsub.s32 %v246_v25, %v8778_v20  ;;  %v69_v30 = vrot.slane %v60_v24, %v8787_v26  ;;  %vm700_vm13 = vcmask 256001   ;;  %s8608_s24 = smov 112   ;;  %s8609_s25 = smov 48  }
  0x15   :  { %v285_v51 = vrot.slane %v60_v24, %v8806_v50  ;;  %vm881_vm14 = vcmask 257026   ;;  %vm507_vm15 = vcmask 254976   ;;  %vm1245_vm1 = vcmask 259076   ;;  %s10410_s27 = smov 72   ;;  %s10408_s28 = smov 104  }
  0x16   :  { %7973 = vmatpush3.bf16.msra.mxu1 %v8765_v18  ;;  %7967 = vmatpush3.bf16.msra.mxu0 %v7964_v15  ;;  %vm1063_vm4 = vcmask 258051   ;;  %vm1792_vm3 = vcmask 261127   ;;  %vm1796_vm0 = vcmask 253952   ;;  %s10404_s30 = smov 40   ;;  %s10402_s0 = smov 8  }
  0x17   :  { %7974 = vmatprep.subr.bf16.mxu0 %v8599_v11  ;;  %7980 = vmatprep.subr.bf16.mxu1 %v8599_v11  ;;  %s10400_s19 = smov 16   ;;  %s10406_s1 = smov 24  }
  0x19   :  { %7463 = vmatmul.mubr.f32.vlgmr.msra.gmra.mrb[2].mxu1 %v8597_v1 }
  0x1a   :  { %7982 = vmatpush3.bf16.msra.mxu1 %v8749_v12  ;;  %7484 = vmatprep.mubr.msk.f32.mxu1 %vm10395_vm2, %v8597_v1 }
  0x1b   :  { %7983 = vmatprep.subr.bf16.mxu1 %v8599_v11 }
  0x1e   :  { %7985 = vmatpush3.bf16.msra.mxu1 %v8765_v18 }
  0x1f   :  { %7992 = vmatprep.subr.bf16.mxu1 %v8599_v11 }
  0xe1   :  { %v236_v29 = vpop.f32.mrb[0].mxu1 }
  0xe2   :  { %v237_v31 = vadd.f32 %v236_v29, %v161_v27  ;;  %v7442_v32 = vpop.f32.mrb[1].mxu1 }
  0xe3   :  { %v7437_v33 = vpop.f32.mrb[0].mxu0 }
  0xe4   :  { %v250_v34 = vrot.slane %v237_v31, %v249_v28  ;;  %v147_v36 = vpop.f32.mrb[1].mxu0  ;;  %v153_v40 = vadd.f32 %v7437_v33, %v69_v30 }
  0xe5   :  { %v148_v37 = vadd.f32 %v147_v36, %v69_v30 }
  0xe6   :  { %v251_v38 = vcombine.high %v250_v34, %v250_v34  ;;  %v258_v39 = vrot.slane %v250_v34, %v249_v28  ;;  %v242_v44 = vadd.f32 %v240_v35, %v153_v40 }
  0xe7   :  { %v241_v41 = vadd.f32 %v240_v35, %v148_v37 }
  0xe8   :  { %v265_v42 = vrot.slane %v251_v38, %v249_v28  ;;  %v269_v43 = vrot.slane %v258_v39, %v8787_v26 }
  0xea   :  { %v273_v45 = vrot.slane %v265_v42, %v8787_v26  ;;  %v276_v46 = vadd.f32 %v269_v43, %v241_v41 }
  0xec   :  { %v277_v47 = vadd.f32 %v273_v45, %v242_v44  ;;  %7451 = vmatprep.mubr.msk.f32.mxu0 %vm10397_vm5, %v276_v46  ;;  %v441_v48 = vpop.f32.mrb[2].mxu1 }
  0xed   :  { %v7464_v49 = vpop.f32.mrb[3].mxu1  ;;  %v446_v52 = vrot.slane %v441_v48, 1 }
  0xee   :  { %7452 = vmatmul.mubr.msk.f32.vlgmr.msra.gmra.mrb[2].mxu0 %vm10397_vm5, %v277_v47 }
  0xef   :  { %7976 = vmatpush3.bf16.msra.mxu0 %v8749_v12  ;;  %7473 = vmatprep.mubr.msk.f32.mxu0 %vm10395_vm2, %v8597_v1 }
  0xf0   :  { %7977 = vmatprep.subr.bf16.mxu0 %v8599_v11 }
  0xf3   :  { %7979 = vmatpush3.bf16.msra.mxu0 %v8765_v18 }
  0xf4   :  { %7986 = vmatprep.subr.bf16.mxu0 %v8599_v11 }
 0x1c1   :  { %v7453_v53 = vpop.f32.mrb[2].mxu0 }
 0x1c2   :  { %v8809_v54 = vadd.f32 %v7453_v53, %v285_v51  ;;  %v359_v55 = vpop.f32.mrb[3].mxu0 }
 0x1c3   :  { %v8811_v56 = vadd.f32 %v359_v55, %v285_v51 }
 0x1c4   :  { %v450_v57 = vadd.f32 %v446_v52, %v8809_v54 }
 0x1c5   :  { %v449_v58 = vadd.f32 %v441_v48, %v8811_v56 }
 0x1c6   :  { %8309 = vtanh.f32 %v450_v57  ;;  %v6921_v61 = vmul.f32 -1.442695, %v450_v57 }
 0x1c7   :  { %8311 = vtanh.f32 %v449_v58  ;;  %v6920_v62 = vmul.f32 -1.442695, %v449_v58 }
 0x1c8   :  { %8313 = vpow2.f32 %v6921_v61 }
 0x1c9   :  { %8315 = vpow2.f32 %v6920_v62 }
 0x1d0   :  { %v8310_v59 = vpop.eup %8309 }
 0x1d1   :  { %471 = vrot.lane.b32.xlu0 %v8310_v59, %s8601_s3  ;;  %v8312_v60 = vpop.eup %8311 }
 0x1d2   :  { %v8314_v63 = vpop.eup %8313 }
 0x1d3   :  { %v458_v0 = vadd.f32 1.0, %v8314_v63  ;;  %v8316_v2 = vpop.eup %8315 }
 0x1d4   :  { %v457_v3 = vadd.f32 1.0, %v8316_v2 }
 0x1d5   :  { %469 = vrot.lane.b32.xlu0 %v8312_v60, %s8601_s3  ;;  %8317 = vrcp.f32 %v458_v0 }
 0x1d6   :  { %8319 = vrcp.f32 %v457_v3 }
 0x1df   :  { %v8318_v4 = vpop.eup %8317 }
 0x1e0   :  { %v8320_v7 = vpop.eup %8319  ;;  %v466_v10 = vmul.f32 0.0, %v8318_v4 }
 0x1e1   :  { %v465_v15 = vmul.f32 0.0, %v8320_v7 }
 0x243   :  { %v472_v5 = vpop.permute.xlu0 %471 }
 0x244   :  { %v476_v6 = vmul.f32 %v8318_v4, %v472_v5 }
 0x246   :  { %481 = vrot.lane.b32.xlu1 %v476_v6, %s8602_s26 }
 0x247   :  { %v470_v8 = vpop.permute.xlu0 %469 }
 0x248   :  { %v475_v9 = vmul.f32 %v8320_v7, %v470_v8 }
 0x24a   :  { %479 = vrot.lane.b32.xlu1 %v475_v9, %s8602_s26 }
 0x2b8   :  { %v482_v13 = vpop.permute.xlu1 %481 }
 0x2b9   :  { %v486_v14 = vadd.f32 %v482_v13, %v466_v10 }
 0x2bb   :  { %8321 = vtanh.f32 %v486_v14  ;;  %v655_v52 = vrot.slane %v486_v14, 7 }
 0x2bc   :  { %v480_v16 = vpop.permute.xlu1 %479 }
 0x2bd   :  { %v485_v17 = vadd.f32 %v480_v16, %v465_v15 }
 0x2bf   :  { %8323 = vtanh.f32 %v485_v17  ;;  %v654_v55 = vrot.slane %v485_v17, 7 }
 0x2c5   :  { %v8322_v21 = vpop.eup %8321 }
 0x2c6   :  { %493 = vrot.lane.b32.xlu0 %v8322_v21, %s8601_s3 }
 0x2c9   :  { %v8324_v22 = vpop.eup %8323 }
 0x2ca   :  { %491 = vrot.lane.b32.xlu1 %v8324_v22, %s8601_s3 }
 0x338   :  { %v494_v24 = vpop.permute.xlu0 %493 }
 0x339   :  { %v8821_v25 = vmul.f32 %v8318_v4, %v494_v24 }
 0x33b   :  { %v501_v28 = vrot.slane %v8821_v25, 7 }
 0x33c   :  { %v492_v27 = vpop.permute.xlu1 %491 }
 0x33d   :  { %v8824_v29 = vmul.f32 %v8320_v7, %v492_v27 }
 0x33f   :  { %v503_v30 = vsel %vm502_vm6, %v501_v28, %v8824_v29 }
 0x340   :  { %504 = vrot.lane.b32.xlu0 %v503_v30, %s8602_s26 }
 0x3b2   :  { %v8829_v31 = vpop.permute.xlu0 %504 }
 0x3b3   :  { %7474 = vmatmul.mubr.msk.f32.vlgmr.msra.gmra.mrb[4].mxu0 %vm10397_vm5, %v8829_v31 }
 0x3b4   :  { %7988 = vmatpush3.bf16.msra.mxu0 %v8749_v12  ;;  %7495 = vmatprep.mubr.msk.f32.mxu0 %vm10395_vm2, %v8597_v1 }
 0x3b5   :  { %7989 = vmatprep.subr.bf16.mxu0 %v8599_v11 }
 0x3b8   :  { %7991 = vmatpush3.bf16.msra.mxu0 %v8765_v18 }
 0x3b9   :  { %7998 = vmatprep.subr.bf16.mxu0 %v8599_v11 }
 0x486   :  { %v628_v32 = vpop.f32.mrb[4].mxu0 }
 0x487   :  { %v633_v33 = vrot.slane %v628_v32, 7  ;;  %v637_v34 = vadd.f32 %v628_v32, %v8809_v54  ;;  %v7475_v35 = vpop.f32.mrb[5].mxu0 }
 0x489   :  { %v636_v36 = vadd.f32 %v633_v33, %v8811_v56  ;;  %8325 = vtanh.f32 %v637_v34  ;;  %v6924_v39 = vmul.f32 -1.442695, %v637_v34 }
 0x48b   :  { %8327 = vtanh.f32 %v636_v36  ;;  %v6923_v40 = vmul.f32 -1.442695, %v636_v36 }
 0x48c   :  { %8329 = vpow2.f32 %v6924_v39 }
 0x48d   :  { %8331 = vpow2.f32 %v6923_v40 }
 0x493   :  { %v8326_v37 = vpop.eup %8325 }
 0x494   :  { %664 = vrot.lane.b32.xlu0 %v8326_v37, %s8601_s3 }
 0x495   :  { %v8328_v38 = vpop.eup %8327 }
 0x496   :  { %662 = vrot.lane.b32.xlu1 %v8328_v38, %s8601_s3  ;;  %v8330_v41 = vpop.eup %8329 }
 0x497   :  { %v8332_v42 = vpop.eup %8331  ;;  %v645_v43 = vadd.f32 1.0, %v8330_v41 }
 0x498   :  { %v644_v44 = vadd.f32 1.0, %v8332_v42 }
 0x499   :  { %8333 = vrcp.f32 %v645_v43 }
 0x49a   :  { %8335 = vrcp.f32 %v644_v44 }
 0x4a3   :  { %v8334_v45 = vpop.eup %8333 }
 0x4a4   :  { %v8336_v48 = vpop.eup %8335  ;;  %v659_v53 = vmul.f32 %v8334_v45, %v655_v52 }
 0x4a5   :  { %v658_v59 = vmul.f32 %v8336_v48, %v654_v55 }
 0x506   :  { %v665_v46 = vpop.permute.xlu0 %664 }
 0x507   :  { %v669_v47 = vmul.f32 %v8334_v45, %v665_v46 }
 0x508   :  { %v663_v49 = vpop.permute.xlu1 %662 }
 0x509   :  { %674 = vrot.lane.b32.xlu0 %v669_v47, %s8602_s26  ;;  %v668_v51 = vmul.f32 %v8336_v48, %v663_v49 }
 0x50b   :  { %672 = vrot.lane.b32.xlu1 %v668_v51, %s8602_s26 }
 0x57b   :  { %v675_v57 = vpop.permute.xlu0 %674 }
 0x57c   :  { %v679_v58 = vadd.f32 %v675_v57, %v659_v53 }
 0x57d   :  { %v673_v60 = vpop.permute.xlu1 %672 }
 0x57e   :  { %8337 = vtanh.f32 %v679_v58  ;;  %v678_v61 = vadd.f32 %v673_v60, %v658_v59  ;;  %v836_v39 = vrot.slane %v679_v58, 7 }
 0x580   :  { %8339 = vtanh.f32 %v678_v61  ;;  %v835_v38 = vrot.slane %v678_v61, 7 }
 0x588   :  { %v8338_v62 = vpop.eup %8337 }
 0x589   :  { %686 = vrot.lane.b32.xlu0 %v8338_v62, %s8601_s3 }
 0x58a   :  { %v8340_v63 = vpop.eup %8339 }
 0x58b   :  { %684 = vrot.lane.b32.xlu1 %v8340_v63, %s8601_s3 }
 0x5fb   :  { %v687_v0 = vpop.permute.xlu0 %686 }
 0x5fc   :  { %v8849_v4 = vmul.f32 %v8334_v45, %v687_v0 }
 0x5fd   :  { %v685_v2 = vpop.permute.xlu1 %684 }
 0x5fe   :  { %v8847_v3 = vmul.f32 %v8336_v48, %v685_v2 }
 0x600   :  { %v736_v5 = vrot.slane %v8847_v3, 1 }
 0x602   :  { %v737_v6 = vsel %vm502_vm6, %v8849_v4, %v736_v5 }
 0x603   :  { %738 = vrot.lane.b32.xlu1 %v737_v6, %s8602_s26 }
 0x675   :  { %v739_v7 = vpop.permute.xlu1 %738 }
 0x676   :  { %7485 = vmatmul.mubr.msk.f32.vlgmr.msra.gmra.mrb[4].mxu1 %vm10397_vm5, %v739_v7 }
 0x677   :  { %7994 = vmatpush3.bf16.msra.mxu1 %v8749_v12  ;;  %7506 = vmatprep.mubr.msk.f32.mxu1 %vm10395_vm2, %v8597_v1 }
 0x678   :  { %7995 = vmatprep.subr.bf16.mxu1 %v8599_v11 }
 0x67b   :  { %7997 = vmatpush3.bf16.msra.mxu1 %v8765_v18 }
 0x67c   :  { %8004 = vmatprep.subr.bf16.mxu1 %v8599_v11 }
 0x749   :  { %v808_v8 = vpop.f32.mrb[4].mxu1 }
 0x74a   :  { %v813_v9 = vrot.slane %v808_v8, 6  ;;  %v814_v10 = vrot.slane %v808_v8, 7  ;;  %v7486_v13 = vpop.f32.mrb[5].mxu1 }
 0x74c   :  { %v817_v14 = vadd.f32 %v813_v9, %v8811_v56  ;;  %v818_v15 = vadd.f32 %v814_v10, %v8809_v54 }
 0x74e   :  { %8341 = vtanh.f32 %v817_v14  ;;  %v6926_v21 = vmul.f32 -1.442695, %v817_v14  ;;  %v6927_v22 = vmul.f32 -1.442695, %v818_v15 }
 0x74f   :  { %8343 = vtanh.f32 %v818_v15 }
 0x750   :  { %8345 = vpow2.f32 %v6926_v21 }
 0x751   :  { %8347 = vpow2.f32 %v6927_v22 }
 0x758   :  { %v8342_v16 = vpop.eup %8341 }
 0x759   :  { %v8344_v17 = vpop.eup %8343  ;;  %843 = vrot.lane.b32.xlu0 %v8342_v16, %s8601_s3 }
 0x75a   :  { %845 = vrot.lane.b32.xlu1 %v8344_v17, %s8601_s3  ;;  %v8346_v24 = vpop.eup %8345 }
 0x75b   :  { %v8348_v27 = vpop.eup %8347  ;;  %v825_v28 = vadd.f32 1.0, %v8346_v24 }
 0x75c   :  { %v826_v30 = vadd.f32 1.0, %v8348_v27 }
 0x75d   :  { %8349 = vrcp.f32 %v825_v28 }
 0x75e   :  { %8351 = vrcp.f32 %v826_v30 }
 0x767   :  { %v8350_v32 = vpop.eup %8349 }
 0x768   :  { %v8352_v34 = vpop.eup %8351  ;;  %v839_v40 = vmul.f32 %v8350_v32, %v835_v38 }
 0x769   :  { %v840_v41 = vmul.f32 %v8352_v34, %v836_v39 }
 0x7cb   :  { %v844_v33 = vpop.permute.xlu0 %843 }
 0x7cc   :  { %v846_v35 = vpop.permute.xlu1 %845  ;;  %v849_v36 = vmul.f32 %v8350_v32, %v844_v33 }
 0x7cd   :  { %v850_v37 = vmul.f32 %v8352_v34, %v846_v35 }
 0x7ce   :  { %853 = vrot.lane.b32.xlu0 %v849_v36, %s8602_s26 }
 0x7cf   :  { %855 = vrot.lane.b32.xlu1 %v850_v37, %s8602_s26 }
 0x840   :  { %v854_v42 = vpop.permute.xlu0 %853 }
 0x841   :  { %v856_v43 = vpop.permute.xlu1 %855  ;;  %v859_v44 = vadd.f32 %v854_v42, %v839_v40 }
 0x842   :  { %v860_v45 = vadd.f32 %v856_v43, %v840_v41 }
 0x843   :  { %8353 = vtanh.f32 %v859_v44  ;;  %v1017_v24 = vrot.slane %v859_v44, 7 }
 0x844   :  { %8355 = vtanh.f32 %v860_v45  ;;  %v1018_v27 = vrot.slane %v860_v45, 7 }
 0x84d   :  { %v8354_v46 = vpop.eup %8353 }
 0x84e   :  { %v8356_v47 = vpop.eup %8355  ;;  %865 = vrot.lane.b32.xlu0 %v8354_v46, %s8601_s3 }
 0x84f   :  { %867 = vrot.lane.b32.xlu1 %v8356_v47, %s8601_s3 }
 0x8c0   :  { %v866_v48 = vpop.permute.xlu0 %865 }
 0x8c1   :  { %v868_v49 = vpop.permute.xlu1 %867  ;;  %v8870_v51 = vmul.f32 %v8350_v32, %v866_v48 }
 0x8c2   :  { %v8872_v52 = vmul.f32 %v8352_v34, %v868_v49 }
 0x8c3   :  { %v917_v53 = vrot.slane %v8870_v51, 2 }
 0x8c4   :  { %v918_v55 = vrot.slane %v8872_v52, 1 }
 0x8c6   :  { %v919_v57 = vsel %vm502_vm6, %v918_v55, %v917_v53 }
 0x8c7   :  { %920 = vrot.lane.b32.xlu0 %v919_v57, %s8602_s26 }
 0x939   :  { %v921_v58 = vpop.permute.xlu0 %920 }
 0x93a   :  { %7496 = vmatmul.mubr.msk.f32.vlgmr.msra.gmra.mrb[6].mxu0 %vm10397_vm5, %v921_v58 }
 0x93b   :  { %8000 = vmatpush3.bf16.msra.mxu0 %v8749_v12  ;;  %7517 = vmatprep.mubr.msk.f32.mxu0 %vm10395_vm2, %v8597_v1 }
 0x93c   :  { %8001 = vmatprep.subr.bf16.mxu0 %v8599_v11 }
 0x93f   :  { %8003 = vmatpush3.bf16.msra.mxu0 %v8765_v18 }
 0x940   :  { %8010 = vmatprep.subr.bf16.mxu0 %v8599_v11 }
 0xa0d   :  { %v990_v59 = vpop.f32.mrb[6].mxu0 }
 0xa0e   :  { %v995_v60 = vrot.slane %v990_v59, 5  ;;  %v996_v61 = vrot.slane %v990_v59, 6  ;;  %v7497_v62 = vpop.f32.mrb[7].mxu0 }
 0xa10   :  { %v999_v63 = vadd.f32 %v995_v60, %v8811_v56  ;;  %v1000_v0 = vadd.f32 %v996_v61, %v8809_v54 }
 0xa12   :  { %8357 = vtanh.f32 %v999_v63  ;;  %v6929_v6 = vmul.f32 -1.442695, %v999_v63  ;;  %v6930_v7 = vmul.f32 -1.442695, %v1000_v0 }
 0xa13   :  { %8359 = vtanh.f32 %v1000_v0 }
 0xa14   :  { %8361 = vpow2.f32 %v6929_v6 }
 0xa15   :  { %8363 = vpow2.f32 %v6930_v7 }
 0xa1c   :  { %v8358_v2 = vpop.eup %8357 }
 0xa1d   :  { %v8360_v5 = vpop.eup %8359  ;;  %1025 = vrot.lane.b32.xlu1 %v8358_v2, %s8601_s3 }
 0xa1e   :  { %1027 = vrot.lane.b32.xlu0 %v8360_v5, %s8601_s3  ;;  %v8362_v8 = vpop.eup %8361 }
 0xa1f   :  { %v8364_v9 = vpop.eup %8363  ;;  %v1007_v10 = vadd.f32 1.0, %v8362_v8 }
 0xa20   :  { %v1008_v13 = vadd.f32 1.0, %v8364_v9 }
 0xa21   :  { %8365 = vrcp.f32 %v1007_v10 }
 0xa22   :  { %8367 = vrcp.f32 %v1008_v13 }
 0xa2b   :  { %v8366_v14 = vpop.eup %8365 }
 0xa2c   :  { %v8368_v16 = vpop.eup %8367  ;;  %v1021_v28 = vmul.f32 %v8366_v14, %v1017_v24 }
 0xa2d   :  { %v1022_v30 = vmul.f32 %v8368_v16, %v1018_v27 }
 0xa8f   :  { %v1026_v15 = vpop.permute.xlu1 %1025 }
 0xa90   :  { %v1028_v17 = vpop.permute.xlu0 %1027  ;;  %v1031_v21 = vmul.f32 %v8366_v14, %v1026_v15 }
 0xa91   :  { %v1032_v22 = vmul.f32 %v8368_v16, %v1028_v17 }
 0xa92   :  { %1035 = vrot.lane.b32.xlu1 %v1031_v21, %s8602_s26 }
 0xa93   :  { %1037 = vrot.lane.b32.xlu0 %v1032_v22, %s8602_s26 }
 0xb04   :  { %v1036_v32 = vpop.permute.xlu1 %1035 }
 0xb05   :  { %v1038_v33 = vpop.permute.xlu0 %1037  ;;  %v1041_v34 = vadd.f32 %v1036_v32, %v1021_v28 }
 0xb06   :  { %v1042_v35 = vadd.f32 %v1038_v33, %v1022_v30 }
 0xb07   :  { %8369 = vtanh.f32 %v1041_v34  ;;  %v1199_v10 = vrot.slane %v1041_v34, 7 }
 0xb08   :  { %8371 = vtanh.f32 %v1042_v35  ;;  %v1200_v13 = vrot.slane %v1042_v35, 7 }
 0xb11   :  { %v8370_v36 = vpop.eup %8369 }
 0xb12   :  { %v8372_v37 = vpop.eup %8371  ;;  %1047 = vrot.lane.b32.xlu1 %v8370_v36, %s8601_s3 }
 0xb13   :  { %1049 = vrot.lane.b32.xlu0 %v8372_v37, %s8601_s3 }
 0xb84   :  { %v1048_v38 = vpop.permute.xlu1 %1047 }
 0xb85   :  { %v1050_v39 = vpop.permute.xlu0 %1049  ;;  %v8893_v40 = vmul.f32 %v8366_v14, %v1048_v38 }
 0xb86   :  { %v8895_v41 = vmul.f32 %v8368_v16, %v1050_v39 }
 0xb87   :  { %v1099_v42 = vrot.slane %v8893_v40, 3 }
 0xb88   :  { %v1100_v43 = vrot.slane %v8895_v41, 2 }
 0xb8a   :  { %v1101_v44 = vsel %vm502_vm6, %v1100_v43, %v1099_v42 }
 0xb8b   :  { %1102 = vrot.lane.b32.xlu1 %v1101_v44, %s8602_s26 }
 0xbfd   :  { %v1103_v45 = vpop.permute.xlu1 %1102 }
 0xbfe   :  { %7507 = vmatmul.mubr.msk.f32.vlgmr.msra.gmra.mrb[6].mxu1 %vm10397_vm5, %v1103_v45 }
 0xbff   :  { %8006 = vmatpush3.bf16.msra.mxu1 %v8749_v12  ;;  %7528 = vmatprep.mubr.msk.f32.mxu1 %vm10395_vm2, %v8597_v1 }
 0xc00   :  { %8007 = vmatprep.subr.bf16.mxu1 %v8599_v11 }
 0xc03   :  { %8009 = vmatpush3.bf16.msra.mxu1 %v8765_v18 }
 0xcd1   :  { %v1172_v46 = vpop.f32.mrb[6].mxu1 }
 0xcd2   :  { %v1177_v47 = vrot.slane %v1172_v46, 4  ;;  %v1178_v48 = vrot.slane %v1172_v46, 5  ;;  %v7508_v49 = vpop.f32.mrb[7].mxu1 }
 0xcd4   :  { %v1181_v53 = vadd.f32 %v1177_v47, %v8811_v56  ;;  %v1182_v55 = vadd.f32 %v1178_v48, %v8809_v54 }
 0xcd6   :  { %8373 = vtanh.f32 %v1181_v53  ;;  %v6932_v59 = vmul.f32 -1.442695, %v1181_v53  ;;  %v6933_v60 = vmul.f32 -1.442695, %v1182_v55 }
 0xcd7   :  { %8375 = vtanh.f32 %v1182_v55 }
 0xcd8   :  { %8377 = vpow2.f32 %v6932_v59 }
 0xcd9   :  { %8379 = vpow2.f32 %v6933_v60 }
 0xce0   :  { %v8374_v57 = vpop.eup %8373 }
 0xce1   :  { %v8376_v58 = vpop.eup %8375  ;;  %1207 = vrot.lane.b32.xlu0 %v8374_v57, %s8601_s3 }
 0xce2   :  { %1209 = vrot.lane.b32.xlu1 %v8376_v58, %s8601_s3  ;;  %v8378_v61 = vpop.eup %8377 }
 0xce3   :  { %v8380_v62 = vpop.eup %8379  ;;  %v1189_v63 = vadd.f32 1.0, %v8378_v61 }
 0xce4   :  { %v1190_v0 = vadd.f32 1.0, %v8380_v62 }
 0xce5   :  { %8381 = vrcp.f32 %v1189_v63 }
 0xce6   :  { %8383 = vrcp.f32 %v1190_v0 }
 0xcef   :  { %v8382_v2 = vpop.eup %8381 }
 0xcf0   :  { %v8384_v6 = vpop.eup %8383  ;;  %v1203_v14 = vmul.f32 %v8382_v2, %v1199_v10 }
 0xcf1   :  { %v1204_v15 = vmul.f32 %v8384_v6, %v1200_v13 }
 0xd53   :  { %v1208_v5 = vpop.permute.xlu0 %1207 }
 0xd54   :  { %v1210_v7 = vpop.permute.xlu1 %1209  ;;  %v1213_v8 = vmul.f32 %v8382_v2, %v1208_v5 }
 0xd55   :  { %v1214_v9 = vmul.f32 %v8384_v6, %v1210_v7 }
 0xd56   :  { %1217 = vrot.lane.b32.xlu0 %v1213_v8, %s8602_s26 }
 0xd57   :  { %1219 = vrot.lane.b32.xlu1 %v1214_v9, %s8602_s26 }
 0xdc8   :  { %v1218_v16 = vpop.permute.xlu0 %1217 }
 0xdc9   :  { %v1220_v17 = vpop.permute.xlu1 %1219  ;;  %v1223_v21 = vadd.f32 %v1218_v16, %v1203_v14 }
 0xdca   :  { %v1224_v22 = vadd.f32 %v1220_v17, %v1204_v15 }
 0xdcb   :  { %8385 = vtanh.f32 %v1223_v21  ;;  %v1381_v62 = vrot.slane %v1223_v21, 7 }
 0xdcc   :  { %8387 = vtanh.f32 %v1224_v22  ;;  %v1382_v63 = vrot.slane %v1224_v22, 7 }
 0xdd5   :  { %v8386_v24 = vpop.eup %8385 }
 0xdd6   :  { %v8388_v27 = vpop.eup %8387  ;;  %1229 = vrot.lane.b32.xlu0 %v8386_v24, %s8601_s3 }
 0xdd7   :  { %1231 = vrot.lane.b32.xlu1 %v8388_v27, %s8601_s3 }
 0xe48   :  { %v1230_v28 = vpop.permute.xlu0 %1229 }
 0xe49   :  { %v1232_v30 = vpop.permute.xlu1 %1231  ;;  %v8915_v32 = vmul.f32 %v8382_v2, %v1230_v28 }
 0xe4a   :  { %v8917_v33 = vmul.f32 %v8384_v6, %v1232_v30 }
 0xe4b   :  { %v1281_v34 = vrot.slane %v8915_v32, 4 }
 0xe4c   :  { %v1282_v35 = vrot.slane %v8917_v33, 3 }
 0xe4e   :  { %v1283_v36 = vsel %vm502_vm6, %v1282_v35, %v1281_v34 }
 0xe4f   :  { %1284 = vrot.lane.b32.xlu0 %v1283_v36, %s8602_s26 }
 0xec1   :  { %v1285_v37 = vpop.permute.xlu0 %1284 }
 0xec2   :  { %7518 = vmatmul.mubr.msk.f32.vlgmr.msra.gmra.mrb[8].mxu0 %vm10397_vm5, %v1285_v37 }
 0xec3   :  { %8012 = vmatpush3.bf16.msra.mxu0 %v8749_v12  ;;  %7539 = vmatprep.mubr.msk.f32.mxu0 %vm10395_vm2, %v8597_v1 }
 0xec4   :  { %8013 = vmatprep.subr.bf16.mxu0 %v8599_v11 }
 0xec7   :  { %8015 = vmatpush3.bf16.msra.mxu0 %v8765_v18 }
 0xec8   :  { %7553 = vmatprep.subr.mxu0 %v8597_v1 }
 0xf95   :  { %v1354_v38 = vpop.f32.mrb[8].mxu0 }
 0xf96   :  { %v1359_v39 = vrot.slane %v1354_v38, 3  ;;  %v1360_v42 = vrot.slane %v1354_v38, 4  ;;  %v7519_v43 = vpop.f32.mrb[9].mxu0 }
 0xf98   :  { %v1363_v44 = vadd.f32 %v1359_v39, %v8811_v56  ;;  %v1364_v45 = vadd.f32 %v1360_v42, %v8809_v54 }
 0xf9a   :  { %8389 = vtanh.f32 %v1363_v44  ;;  %v6935_v11 = vmul.f32 -1.442695, %v1363_v44  ;;  %v6936_v18 = vmul.f32 -1.442695, %v1364_v45 }
 0xf9b   :  { %8391 = vtanh.f32 %v1364_v45 }
 0xf9c   :  { %8393 = vpow2.f32 %v6935_v11 }
 0xf9d   :  { %8395 = vpow2.f32 %v6936_v18 }
 0xfa4   :  { %v8390_v12 = vpop.eup %8389 }
 0xfa5   :  { %v8392_v46 = vpop.eup %8391  ;;  %1389 = vrot.lane.b32.xlu1 %v8390_v12, %s8601_s3 }
 0xfa6   :  { %1391 = vrot.lane.b32.xlu0 %v8392_v46, %s8601_s3  ;;  %v8394_v47 = vpop.eup %8393 }
 0xfa7   :  { %v8396_v48 = vpop.eup %8395  ;;  %v1371_v49 = vadd.f32 1.0, %v8394_v47 }
 0xfa8   :  { %v1372_v53 = vadd.f32 1.0, %v8396_v48 }
 0xfa9   :  { %8397 = vrcp.f32 %v1371_v49 }
 0xfaa   :  { %8399 = vrcp.f32 %v1372_v53 }
 0xfb3   :  { %v8398_v55 = vpop.eup %8397 }
 0xfb4   :  { %v8400_v58 = vpop.eup %8399  ;;  %v1385_v0 = vmul.f32 %v8398_v55, %v1381_v62 }
 0xfb5   :  { %v1386_v2 = vmul.f32 %v8400_v58, %v1382_v63 }
0x1017   :  { %v1390_v57 = vpop.permute.xlu1 %1389 }
0x1018   :  { %v1392_v59 = vpop.permute.xlu0 %1391  ;;  %v1395_v60 = vmul.f32 %v8398_v55, %v1390_v57 }
0x1019   :  { %v1396_v61 = vmul.f32 %v8400_v58, %v1392_v59 }
0x101a   :  { %1399 = vrot.lane.b32.xlu1 %v1395_v60, %s8602_s26 }
0x101b   :  { %1401 = vrot.lane.b32.xlu0 %v1396_v61, %s8602_s26 }
0x108c   :  { %v1400_v5 = vpop.permute.xlu1 %1399 }
0x108d   :  { %v1402_v6 = vpop.permute.xlu0 %1401  ;;  %v1405_v7 = vadd.f32 %v1400_v5, %v1385_v0 }
0x108e   :  { %v1406_v8 = vadd.f32 %v1402_v6, %v1386_v2 }
0x108f   :  { %8401 = vtanh.f32 %v1405_v7  ;;  %v1563_v53 = vrot.slane %v1405_v7, 7 }
0x1090   :  { %8403 = vtanh.f32 %v1406_v8 }
0x1099   :  { %v8402_v9 = vpop.eup %8401 }
0x109a   :  { %v8404_v10 = vpop.eup %8403  ;;  %1411 = vrot.lane.b32.xlu1 %v8402_v9, %s8601_s3 }
0x109b   :  { %1413 = vrot.lane.b32.xlu0 %v8404_v10, %s8601_s3 }
0x110c   :  { %v1412_v13 = vpop.permute.xlu1 %1411 }
0x110d   :  { %v1414_v14 = vpop.permute.xlu0 %1413  ;;  %v8938_v15 = vmul.f32 %v8398_v55, %v1412_v13  ;;  %v1564_v55 = vrot.slane %v1406_v8, 7 }
0x110e   :  { %v8940_v16 = vmul.f32 %v8400_v58, %v1414_v14 }
0x110f   :  { %v1463_v17 = vrot.slane %v8938_v15, 5 }
0x1110   :  { %v1464_v21 = vrot.slane %v8940_v16, 4 }
0x1112   :  { %v1465_v22 = vsel %vm502_vm6, %v1464_v21, %v1463_v17 }
0x1113   :  { %1466 = vrot.lane.b32.xlu1 %v1465_v22, %s8602_s26 }
0x1185   :  { %v1467_v24 = vpop.permute.xlu1 %1466 }
0x1186   :  { %7529 = vmatmul.mubr.msk.f32.vlgmr.msra.gmra.mrb[8].mxu1 %vm10397_vm5, %v1467_v24 }
0x1259   :  { %v1536_v27 = vpop.f32.mrb[8].mxu1 }
0x125a   :  { %v1541_v28 = vrot.slane %v1536_v27, 2  ;;  %v1542_v30 = vrot.slane %v1536_v27, 3  ;;  %v7530_v34 = vpop.f32.mrb[9].mxu1 }
0x125c   :  { %v1545_v35 = vadd.f32 %v1541_v28, %v8811_v56  ;;  %v1546_v36 = vadd.f32 %v1542_v30, %v8809_v54 }
0x125e   :  { %8405 = vtanh.f32 %v1545_v35  ;;  %v6938_v39 = vmul.f32 -1.442695, %v1545_v35  ;;  %v6939_v42 = vmul.f32 -1.442695, %v1546_v36 }
0x125f   :  { %8407 = vtanh.f32 %v1546_v36 }
0x1260   :  { %8409 = vpow2.f32 %v6938_v39 }
0x1261   :  { %8411 = vpow2.f32 %v6939_v42 }
0x1268   :  { %v8406_v37 = vpop.eup %8405 }
0x1269   :  { %v8408_v38 = vpop.eup %8407  ;;  %1571 = vrot.lane.b32.xlu0 %v8406_v37, %s8601_s3 }
0x126a   :  { %1573 = vrot.lane.b32.xlu1 %v8408_v38, %s8601_s3  ;;  %v8410_v43 = vpop.eup %8409 }
0x126b   :  { %v8412_v44 = vpop.eup %8411  ;;  %v1553_v45 = vadd.f32 1.0, %v8410_v43 }
0x126c   :  { %v1554_v12 = vadd.f32 1.0, %v8412_v44 }
0x126d   :  { %8413 = vrcp.f32 %v1553_v45 }
0x126e   :  { %8415 = vrcp.f32 %v1554_v12 }
0x1277   :  { %v8414_v46 = vpop.eup %8413 }
0x1278   :  { %v8416_v18 = vpop.eup %8415  ;;  %v1567_v57 = vmul.f32 %v8414_v46, %v1563_v53 }
0x1279   :  { %v1568_v58 = vmul.f32 %v8416_v18, %v1564_v55 }
0x12db   :  { %v1572_v11 = vpop.permute.xlu0 %1571 }
0x12dc   :  { %v1574_v47 = vpop.permute.xlu1 %1573  ;;  %v1577_v48 = vmul.f32 %v8414_v46, %v1572_v11 }
0x12dd   :  { %v1578_v49 = vmul.f32 %v8416_v18, %v1574_v47 }
0x12de   :  { %1581 = vrot.lane.b32.xlu0 %v1577_v48, %s8602_s26 }
0x12df   :  { %1583 = vrot.lane.b32.xlu1 %v1578_v49, %s8602_s26 }
0x1350   :  { %v1582_v59 = vpop.permute.xlu0 %1581 }
0x1351   :  { %v1584_v60 = vpop.permute.xlu1 %1583  ;;  %v1587_v61 = vadd.f32 %v1582_v59, %v1567_v57  ;;  %v875_v57 = vrot.slane %v8872_v52, 7  ;;  %v694_v59 = vrot.slane %v8849_v4, 7 }
0x1352   :  { %v1588_v62 = vadd.f32 %v1584_v60, %v1568_v58 }
0x1353   :  { %8417 = vtanh.f32 %v1587_v61  ;;  %v1745_v12 = vrot.slane %v1587_v61, 7  ;;  %v877_v60 = vsel %vm876_vm7, %v875_v57, %v8870_v51  ;;  %v1239_v61 = vrot.slane %v8917_v33, 7 }
0x1354   :  { %8419 = vtanh.f32 %v1588_v62 }
0x135d   :  { %v8418_v63 = vpop.eup %8417 }
0x135e   :  { %v8420_v0 = vpop.eup %8419  ;;  %1593 = vrot.lane.b32.xlu0 %v8418_v63, %s8601_s3  ;;  %v1057_v63 = vrot.slane %v8895_v41, 7 }
0x135f   :  { %1595 = vrot.lane.b32.xlu1 %v8420_v0, %s8601_s3  ;;  %v1241_v0 = vsel %vm1240_vm9, %v1239_v61, %v8915_v32 }
0x13d0   :  { %v1594_v2 = vpop.permute.xlu0 %1593 }
0x13d1   :  { %v1596_v5 = vpop.permute.xlu1 %1595  ;;  %v8955_v6 = vmul.f32 %v8414_v46, %v1594_v2  ;;  %v1746_v46 = vrot.slane %v1588_v62, 7  ;;  %v696_v62 = vsel %vm695_vm8, %v694_v59, %v8847_v3 }
0x13d2   :  { %v8957_v7 = vmul.f32 %v8416_v18, %v1596_v5  ;;  %v1059_v5 = vsel %vm1058_vm10, %v1057_v63, %v8893_v40 }
0x13d3   :  { %v1645_v8 = vrot.slane %v8955_v6, 6 }
0x13d4   :  { %v1646_v9 = vrot.slane %v8957_v7, 5  ;;  %v1603_v2 = vrot.slane %v8957_v7, 7 }
0x13d6   :  { %v1647_v10 = vsel %vm502_vm6, %v1646_v9, %v1645_v8  ;;  %v1421_v8 = vrot.slane %v8940_v16, 7  ;;  %v1605_v9 = vsel %vm1604_vm11, %v1603_v2, %v8955_v6 }
0x13d7   :  { %1648 = vrot.lane.b32.xlu0 %v1647_v10, %s8602_s26 }
0x13d8   :  { %v1423_v10 = vsel %vm1422_vm12, %v1421_v8, %v8938_v15 }
0x1449   :  { %v1649_v13 = vpop.permute.xlu0 %1648 }
0x144a   :  { %7540 = vmatmul.mubr.msk.f32.vlgmr.msra.gmra.mrb[10].mxu0 %vm10397_vm5, %v1649_v13  ;;  %vm1427_vm5 = vcmask 260101  }
0x144b   :  { %7555 = vmatprep.mubr.msk.f32.mxu0 %vm10395_vm2, %v8597_v1  ;;  %vm1609_vm2 = vcmask 261126  }
0x151d   :  { %v1718_v14 = vpop.f32.mrb[10].mxu0 }
0x151e   :  { %v1723_v17 = vrot.slane %v1718_v14, 1  ;;  %v1724_v21 = vrot.slane %v1718_v14, 2  ;;  %v7541_v22 = vpop.f32.mrb[11].mxu0 }
0x1520   :  { %v1727_v24 = vadd.f32 %v1723_v17, %v8811_v56  ;;  %v1728_v27 = vadd.f32 %v1724_v21, %v8809_v54 }
0x1522   :  { %8421 = vtanh.f32 %v1727_v24  ;;  %v6941_v34 = vmul.f32 -1.442695, %v1727_v24  ;;  %v6942_v35 = vmul.f32 -1.442695, %v1728_v27 }
0x1523   :  { %8423 = vtanh.f32 %v1728_v27 }
0x1524   :  { %8425 = vpow2.f32 %v6941_v34 }
0x1525   :  { %8427 = vpow2.f32 %v6942_v35 }
0x152c   :  { %v8422_v28 = vpop.eup %8421 }
0x152d   :  { %v8424_v30 = vpop.eup %8423  ;;  %1753 = vrot.lane.b32.xlu0 %v8422_v28, %s8601_s3 }
0x152e   :  { %1755 = vrot.lane.b32.xlu1 %v8424_v30, %s8601_s3  ;;  %v8426_v36 = vpop.eup %8425 }
0x152f   :  { %v8428_v37 = vpop.eup %8427  ;;  %v1735_v38 = vadd.f32 1.0, %v8426_v36  ;;  %v508_v36 = vsel %vm507_vm15, %v8829_v31, 0.0 }
0x1530   :  { %v1736_v39 = vadd.f32 1.0, %v8428_v37 }
0x1531   :  { %8429 = vrcp.f32 %v1735_v38 }
0x1532   :  { %8431 = vrcp.f32 %v1736_v39 }
0x153b   :  { %v8430_v56 = vpop.eup %8429 }
0x153c   :  { %v8432_v42 = vpop.eup %8431  ;;  %v1749_v11 = vmul.f32 %v8430_v56, %v1745_v12 }
0x153d   :  { %v1750_v18 = vmul.f32 %v8432_v42, %v1746_v46 }
0x159f   :  { %v1754_v54 = vpop.permute.xlu0 %1753 }
0x15a0   :  { %v1756_v43 = vpop.permute.xlu1 %1755  ;;  %v1759_v44 = vmul.f32 %v8430_v56, %v1754_v54 }
0x15a1   :  { %v1760_v45 = vmul.f32 %v8432_v42, %v1756_v43 }
0x15a2   :  { %1763 = vrot.lane.b32.xlu0 %v1759_v44, %s8602_s26 }
0x15a3   :  { %1765 = vrot.lane.b32.xlu1 %v1760_v45, %s8602_s26 }
0x1614   :  { %v1764_v47 = vpop.permute.xlu0 %1763 }
0x1615   :  { %v1766_v48 = vpop.permute.xlu1 %1765  ;;  %v1769_v49 = vadd.f32 %v1764_v47, %v1749_v11 }
0x1616   :  { %v1770_v53 = vadd.f32 %v1766_v48, %v1750_v18 }
0x1617   :  { %8433 = vtanh.f32 %v1769_v49 }
0x1618   :  { %8435 = vtanh.f32 %v1770_v53 }
0x1621   :  { %v8434_v55 = vpop.eup %8433 }
0x1622   :  { %v8436_v58 = vpop.eup %8435  ;;  %1775 = vrot.lane.b32.xlu0 %v8434_v55, %s8601_s3 }
0x1623   :  { %1777 = vrot.lane.b32.xlu1 %v8436_v58, %s8601_s3 }
0x1626   :  { %878 = vrot.lane.b32.xlu0 %v877_v60, %s8602_s26 }
0x1627   :  { %697 = vrot.lane.b32.xlu1 %v696_v62, %s8602_s26 }
0x162a   :  { %1242 = vrot.lane.b32.xlu0 %v1241_v0, %s8602_s26 }
0x162b   :  { %1060 = vrot.lane.b32.xlu1 %v1059_v5, %s8602_s26 }
0x162e   :  { %1606 = vrot.lane.b32.xlu0 %v1605_v9, %s8602_s26 }
0x162f   :  { %1424 = vrot.lane.b32.xlu1 %v1423_v10, %s8602_s26 }
0x1694   :  { %v1776_v13 = vpop.permute.xlu0 %1775 }
0x1695   :  { %v1778_v14 = vpop.permute.xlu1 %1777  ;;  %v8998_v17 = vmul.f32 %v8430_v56, %v1776_v13 }
0x1696   :  { %v9000_v21 = vmul.f32 %v8432_v42, %v1778_v14 }
0x1697   :  { %1786 = vrot.lane.b32.xlu0 %v8998_v17, %s8602_s26 }
0x1698   :  { %v1785_v22 = vrot.slane %v9000_v21, 7  ;;  %v879_v27 = vpop.permute.xlu0 %878 }
0x1699   :  { %v698_v24 = vpop.permute.xlu1 %697  ;;  %v882_v34 = vsel %vm881_vm14, %v879_v27, 0.0 }
0x169a   :  { %1788 = vrot.lane.b32.xlu1 %v1785_v22, %s8602_s26  ;;  %v701_v28 = vsel %vm700_vm13, %v698_v24, 0.0 }
0x169c   :  { %v1243_v30 = vpop.permute.xlu0 %1242 }
0x169d   :  { %v1061_v35 = vpop.permute.xlu1 %1060  ;;  %v1246_v37 = vsel %vm1245_vm1, %v1243_v30, 0.0 }
0x169e   :  { %v1064_v39 = vsel %vm1063_vm4, %v1061_v35, 0.0 }
0x16a0   :  { %v1607_v38 = vpop.permute.xlu0 %1606 }
0x16a1   :  { %v1610_v56 = vsel %vm1609_vm2, %v1607_v38, 0.0  ;;  %v1425_v54 = vpop.permute.xlu1 %1424 }
0x16a2   :  { %v1428_v42 = vsel %vm1427_vm5, %v1425_v54, 0.0 }
0x16b6   :  { %702 = vadd.xlane.f32.xlu0 %v701_v28 }
0x16ba   :  { %883 = vadd.xlane.f32.xlu0 %v882_v34 }
0x16be   :  { %509 = vadd.xlane.f32.xlu1 %v508_v36  ;;  %1247 = vadd.xlane.f32.xlu0 %v1246_v37 }
0x16c2   :  { %1065 = vadd.xlane.f32.xlu1 %v1064_v39  ;;  %1611 = vadd.xlane.f32.xlu0 %v1610_v56 }
0x16c6   :  { %1429 = vadd.xlane.f32.xlu1 %v1428_v42 }
0x1709   :  { %v1787_v31 = vpop.permute.xlu0 %1786 }
0x170a   :  { %v1793_v43 = vsel %vm1792_vm3, %v1787_v31, 0.0 }
0x170b   :  { %1794 = vadd.xlane.f32.xlu0 %v1793_v43 }
0x170c   :  { %v1789_v44 = vpop.permute.xlu1 %1788 }
0x170d   :  { %v1797_v45 = vsel %vm1796_vm0, %v1789_v44, 0.0 }
0x170e   :  { %1798 = vadd.xlane.f32.xlu1 %v1797_v45 }
0x1743   :  { %v703_v12 = vpop.xlane.xlu0 %702 }
0x1744   :  { %v704_v46 = vmul.f32 0.03125, %v703_v12 }
0x1746   :  { %v706_v11 = vrot.slane %v704_v46, 1  ;;  %v9020_v49 = vsub.f32 %v8847_v3, %v704_v46 }
0x1747   :  { %v884_v18 = vpop.xlane.xlu0 %883 }
0x1748   :  { %v9017_v47 = vsub.f32 %v8849_v4, %v706_v11  ;;  %v885_v48 = vmul.f32 0.03125, %v884_v18  ;;  %v711_v61 = vmul.f32 %v9020_v49, %v9020_v49 }
0x174a   :  { %v887_v53 = vrot.slane %v885_v48, 1  ;;  %v712_v55 = vmul.f32 %v9017_v47, %v9017_v47  ;;  %v9050_v24 = vsub.f32 %v8870_v51, %v885_v48 }
0x174b   :  { %v510_v57 = vpop.xlane.xlu1 %509  ;;  %v1248_v58 = vpop.xlane.xlu0 %1247 }
0x174c   :  { %v512_v59 = vmul.f32 0.03125, %v510_v57  ;;  %v1249_v60 = vmul.f32 0.03125, %v1248_v58  ;;  %v715_v62 = vrot.slane %v712_v55, 7  ;;  %v9027_v63 = vsub.f32 %v8872_v52, %v887_v53 }
0x174e   :  { %v514_v4 = vrot.slane %v512_v59, 1  ;;  %v1251_v0 = vrot.slane %v1249_v60, 1  ;;  %v9030_v3 = vsub.f32 %v8824_v29, %v512_v59  ;;  %v716_v5 = vsel %vm695_vm8, %v715_v62, %v711_v61 }
0x174f   :  { %v1066_v2 = vpop.xlane.xlu1 %1065  ;;  %v1612_v8 = vpop.xlane.xlu0 %1611  ;;  %v9037_v10 = vsub.f32 %v8915_v32, %v1249_v60  ;;  %717 = vrot.lane.b32.xlu0 %v716_v5, %s8602_s26  ;;  %vm10418_vm8 = vcmask 1041408  }
0x1750   :  { %v9034_v9 = vsub.f32 %v8821_v25, %v514_v4  ;;  %v9040_v13 = vsub.f32 %v8917_v33, %v1251_v0  ;;  %v1067_v52 = vmul.f32 0.03125, %v1066_v2  ;;  %v1613_v14 = vmul.f32 0.03125, %v1612_v8 }
0x1751   :  { %v893_v25 = vmul.f32 %v9027_v63, %v9027_v63  ;;  %v519_v32 = vmul.f32 %v9030_v3, %v9030_v3  ;;  %v1256_v30 = vmul.f32 %v9037_v10, %v9037_v10 }
0x1752   :  { %v520_v29 = vmul.f32 %v9034_v9, %v9034_v9  ;;  %v1257_v22 = vmul.f32 %v9040_v13, %v9040_v13  ;;  %v1069_v33 = vrot.slane %v1067_v52, 1  ;;  %v1615_v27 = vrot.slane %v1613_v14, 1 }
0x1753   :  { %v1430_v28 = vpop.xlane.xlu1 %1429  ;;  %v9060_v38 = vsub.f32 %v8955_v6, %v1613_v14  ;;  %v896_v42 = vrot.slane %v893_v25, 7  ;;  %v9076_v31 = vsub.f32 %v8893_v40, %v1067_v52 }
0x1754   :  { %v1431_v34 = vmul.f32 0.03125, %v1430_v28  ;;  %v523_v35 = vrot.slane %v520_v29, 7  ;;  %v1260_v36 = vrot.slane %v1257_v22, 7  ;;  %v9057_v37 = vsub.f32 %v8895_v41, %v1069_v33 }
0x1755   :  { %v9063_v51 = vsub.f32 %v8957_v7, %v1615_v27  ;;  %v892_v7 = vmul.f32 %v9050_v24, %v9050_v24  ;;  %v1620_v44 = vmul.f32 %v9060_v38, %v9060_v38  ;;  %v1074_v40 = vmul.f32 %v9076_v31, %v9076_v31 }
0x1756   :  { %v1433_v39 = vrot.slane %v1431_v34, 1  ;;  %v524_v56 = vsel %vm502_vm6, %v523_v35, %v519_v32  ;;  %v1261_v54 = vsel %vm1240_vm9, %v1260_v36, %v1256_v30  ;;  %v1075_v6 = vmul.f32 %v9057_v37, %v9057_v37 }
0x1757   :  { %525 = vrot.lane.b32.xlu1 %v524_v56, %s8602_s26  ;;  %1262 = vrot.lane.b32.xlu0 %v1261_v54, %s8602_s26  ;;  %v1621_v41 = vmul.f32 %v9063_v51, %v9063_v51  ;;  %v897_v12 = vsel %vm876_vm7, %v896_v42, %v892_v7  ;;  %v9122_v54 = vsub.s32 4, %v8778_v20  ;;  %v9125_v42 = vsub.s32 3, %v8778_v20 }
0x1758   :  { %v9079_v43 = vsub.f32 %v8940_v16, %v1433_v39  ;;  %v1078_v46 = vrot.slane %v1075_v6, 7  ;;  %v9091_v16 = vsub.f32 %v8938_v15, %v1431_v34  ;;  %vm1859_vm7 = vcmask 1046528  }
0x1759   :  { %v1624_v45 = vrot.slane %v1621_v41, 7  ;;  %v9130_v41 = vld [vmem:[%s10387_s12] sm:$0xff]  ;;  %vm10419_vm9 = vcmask 1043456  }
0x175a   :  { %v1439_v11 = vmul.f32 %v9079_v43, %v9079_v43  ;;  %v1079_v48 = vsel %vm1058_vm10, %v1078_v46, %v1074_v40  ;;  %v1438_v55 = vmul.f32 %v9091_v16, %v9091_v16  ;;  %v553_v6 = vrot.slane %v9130_v41, %v9122_v54  ;;  %vm10420_vm10 = vmmov %vm10418_vm8 }
0x175b   :  { %898 = vrot.lane.b32.xlu1 %v897_v12, %s8602_s26  ;;  %v1625_v18 = vsel %vm1604_vm11, %v1624_v45, %v1620_v44  ;;  %v543_v7 = vrot.slane %v9130_v41, %v9125_v42  ;;  %vm10421_vm11 = vmmov %vm10419_vm9 }
0x175c   :  { %1626 = vrot.lane.b32.xlu0 %v1625_v18, %s8602_s26  ;;  %v1442_v53 = vrot.slane %v1439_v11, 7 }
0x175e   :  { %v1443_v57 = vsel %vm1422_vm12, %v1442_v53, %v1438_v55  ;;  %vm10422_vm12 = vcmask 261120  }
0x175f   :  { %1080 = vrot.lane.b32.xlu1 %v1079_v48, %s8602_s26 }
0x1763   :  { %1444 = vrot.lane.b32.xlu1 %v1443_v57, %s8602_s26 }
0x1798   :  { %v1795_v58 = vpop.xlane.xlu0 %1794 }
0x1799   :  { %v1800_v59 = vmul.f32 0.03125, %v1795_v58 }
0x179b   :  { %v9101_v60 = vsub.f32 %v8998_v17, %v1800_v59  ;;  %v1799_v15 = vpop.xlane.xlu1 %1798 }
0x179c   :  { %v1801_v61 = vmul.f32 0.03125, %v1799_v15 }
0x179d   :  { %v1809_v62 = vmul.f32 %v9101_v60, %v9101_v60 }
0x179e   :  { %v1804_v4 = vrot.slane %v1801_v61, 1 }
0x179f   :  { %1814 = vrot.lane.b32.xlu0 %v1809_v62, %s8602_s26 }
0x17a0   :  { %v9107_v0 = vsub.f32 %v9000_v21, %v1804_v4 }
0x17a2   :  { %v1810_v2 = vmul.f32 %v9107_v0, %v9107_v0 }
0x17a4   :  { %v1813_v5 = vrot.slane %v1810_v2, 7 }
0x17a6   :  { %1816 = vrot.lane.b32.xlu1 %v1813_v5, %s8602_s26 }
0x17c1   :  { %v718_v8 = vpop.permute.xlu0 %717 }
0x17c2   :  { %v720_v17 = vsel %vm700_vm13, %v718_v8, 0.0  ;;  %vm10423_vm13 = vmmov %vm10422_vm12 }
0x17c3   :  { %721 = vadd.xlane.f32.xlu0 %v720_v17 }
0x17c9   :  { %v526_v52 = vpop.permute.xlu1 %525  ;;  %v1263_v29 = vpop.permute.xlu0 %1262 }
0x17ca   :  { %v528_v14 = vsel %vm507_vm15, %v526_v52, 0.0  ;;  %v1265_v32 = vsel %vm1245_vm1, %v1263_v29, 0.0  ;;  %vm1958_vm15 = vcmask 64512   ;;  %vm3308_vm1 = vcmask 130048  }
0x17cb   :  { %529 = vadd.xlane.f32.xlu1 %v528_v14 }
0x17cd   :  { %v899_v22 = vpop.permute.xlu1 %898 }
0x17ce   :  { %v901_v25 = vsel %vm881_vm14, %v899_v22, 0.0  ;;  %v1627_v27 = vpop.permute.xlu0 %1626  ;;  %vm10424_vm14 = vmmov 0  }
0x17cf   :  { %902 = vadd.xlane.f32.xlu0 %v901_v25  ;;  %v1629_v30 = vsel %vm1609_vm2, %v1627_v27, 0.0  ;;  %vm1848_vm2 = vcmask 1042432  }
0x17d1   :  { %v1081_v21 = vpop.permute.xlu1 %1080 }
0x17d2   :  { %v1083_v33 = vsel %vm1063_vm4, %v1081_v21, 0.0  ;;  %vm3311_vm4 = vcmask 195584  }
0x17d3   :  { %1266 = vadd.xlane.f32.xlu0 %v1265_v32  ;;  %1084 = vadd.xlane.f32.xlu1 %v1083_v33 }
0x17d5   :  { %v1445_v28 = vpop.permute.xlu1 %1444 }
0x17d6   :  { %v1447_v34 = vsel %vm1427_vm5, %v1445_v28, 0.0  ;;  %vm1856_vm5 = vcmask 1045504  }
0x17d7   :  { %1630 = vadd.xlane.f32.xlu0 %v1629_v30  ;;  %1448 = vadd.xlane.f32.xlu1 %v1447_v34 }
0x1811   :  { %v1815_v35 = vpop.permute.xlu0 %1814 }
0x1812   :  { %v1820_v36 = vsel %vm1792_vm3, %v1815_v35, 0.0  ;;  %vm1853_vm3 = vcmask 1044480  }
0x1813   :  { %1821 = vadd.xlane.f32.xlu0 %v1820_v36 }
0x1818   :  { %v1817_v39 = vpop.permute.xlu1 %1816 }
0x1819   :  { %v1823_v56 = vsel %vm1796_vm0, %v1817_v39, 0.0  ;;  %vm1843_vm0 = vcmask 1040384  }
0x181a   :  { %1824 = vadd.xlane.f32.xlu1 %v1823_v56 }
0x1829   :  { %555 = vrot.lane.b32.xlu0 %v553_v6, %s8603_s29 }
0x182b   :  { %545 = vrot.lane.b32.xlu1 %v543_v7, %s8603_s29 }
0x1850   :  { %v722_v44 = vpop.xlane.xlu0 %721 }
0x1851   :  { %v723_v18 = vmul.f32 0.03125, %v722_v44 }
0x1853   :  { %v724_v55 = vadd.f32 1e-05, %v723_v18 }
0x1855   :  { %8437 = vrsqrt.f32 %v724_v55 }
0x1858   :  { %v530_v12 = vpop.xlane.xlu1 %529 }
0x1859   :  { %v531_v40 = vmul.f32 0.03125, %v530_v12 }
0x185b   :  { %v532_v59 = vadd.f32 1e-05, %v531_v40  ;;  %v1862_v40 = vld [vmem:[%s10382_s7] sm:$0xff] }
0x185c   :  { %v903_v45 = vpop.xlane.xlu0 %902 }
0x185d   :  { %v904_v48 = vmul.f32 0.03125, %v903_v45  ;;  %8439 = vrsqrt.f32 %v532_v59 }
0x185f   :  { %v905_v61 = vadd.f32 1e-05, %v904_v48  ;;  %v8438_v52 = vpop.eup %8437 }
0x1860   :  { %v1267_v46 = vpop.xlane.xlu0 %1266  ;;  %v1085_v11 = vpop.xlane.xlu1 %1084  ;;  %v727_v27 = vrot.slane %v8438_v52, 1  ;;  %v730_v6 = vmul.f32 %v8438_v52, %v9020_v49 }
0x1861   :  { %v1268_v53 = vmul.f32 0.03125, %v1267_v46  ;;  %v1086_v57 = vmul.f32 0.03125, %v1085_v11  ;;  %8441 = vrsqrt.f32 %v905_v61 }
0x1862   :  { %v731_v7 = vmul.f32 %v727_v27, %v9017_v47  ;;  %v1863_v47 = vld [vmem:[%s10382_s7 + $0x8] sm:$0xff] }
0x1863   :  { %v1269_v62 = vadd.f32 1e-05, %v1268_v53  ;;  %v1087_v2 = vadd.f32 1e-05, %v1086_v57 }
0x1864   :  { %v1631_v58 = vpop.xlane.xlu0 %1630  ;;  %v1449_v15 = vpop.xlane.xlu1 %1448 }
0x1865   :  { %v1632_v4 = vmul.f32 0.03125, %v1631_v58  ;;  %v1450_v5 = vmul.f32 0.03125, %v1449_v15  ;;  %8443 = vrsqrt.f32 %v1269_v62 }
0x1866   :  { %8445 = vrsqrt.f32 %v1087_v2 }
0x1867   :  { %v1633_v8 = vadd.f32 1e-05, %v1632_v4  ;;  %v1451_v17 = vadd.f32 1e-05, %v1450_v5  ;;  %v8440_v29 = vpop.eup %8439 }
0x1868   :  { %v535_v28 = vrot.slane %v8440_v29, 1  ;;  %v538_v44 = vmul.f32 %v8440_v29, %v9030_v3 }
0x1869   :  { %8447 = vrsqrt.f32 %v1633_v8 }
0x186a   :  { %8449 = vrsqrt.f32 %v1451_v17  ;;  %v539_v12 = vmul.f32 %v535_v28, %v9034_v9 }
0x186b   :  { %v8442_v25 = vpop.eup %8441 }
0x186c   :  { %v908_v30 = vrot.slane %v8442_v25, 1  ;;  %v911_v46 = vmul.f32 %v8442_v25, %v9050_v24  ;;  %v8016_v24 = vpack.c.bf16 %v1863_v47, %v1862_v40 }
0x186e   :  { %v912_v11 = vmul.f32 %v908_v30, %v9027_v63  ;;  %v1864_v63 = vld [vmem:[%s10382_s7 + $0x10] sm:$0xff]  ;;  %8017 = vmatprep.subr.bf16.mxu1 %v8016_v24 }
0x186f   :  { %v8444_v21 = vpop.eup %8443  ;;  %8019 = vmatpush3.bf16.msra.mxu1 %v8016_v24 }
0x1870   :  { %v8446_v33 = vpop.eup %8445  ;;  %v1272_v34 = vrot.slane %v8444_v21, 1  ;;  %v1275_v18 = vmul.f32 %v8444_v21, %v9037_v10  ;;  %v1865_v10 = vld [vmem:[%s10382_s7 + $0x18] sm:$0xff] }
0x1871   :  { %v1090_v36 = vrot.slane %v8446_v33, 1  ;;  %v1093_v3 = vmul.f32 %v8446_v33, %v9076_v31  ;;  %v8020_v57 = vpack.c.bf16 %v1865_v10, %v1864_v63 }
0x1872   :  { %v1276_v49 = vmul.f32 %v1272_v34, %v9040_v13 }
0x1873   :  { %v9138_v35 = vpop.eup %8447  ;;  %v1094_v48 = vmul.f32 %v1090_v36, %v9057_v37  ;;  %8021 = vmatprep.subr.bf16.mxu1 %v8020_v57 }
0x1874   :  { %v9140_v56 = vpop.eup %8449  ;;  %v1636_v53 = vrot.slane %v9138_v35, 1  ;;  %v1639_v37 = vmul.f32 %v9138_v35, %v9060_v38  ;;  %8023 = vmatpush3.bf16.msra.mxu1 %v8020_v57 }
0x1875   :  { %v1457_v13 = vmul.f32 %v9140_v56, %v9091_v16  ;;  %v1454_v52 = vrot.slane %v9140_v56, 1  ;;  %7558 = vmatprep.subr.mxu1 %v8597_v1 }
0x18a0   :  { %v1822_v14 = vpop.xlane.xlu0 %1821 }
0x18a1   :  { %v1826_v22 = vmul.f32 0.03125, %v1822_v14 }
0x18a3   :  { %v1828_v32 = vadd.f32 1e-05, %v1826_v22 }
0x18a4   :  { %v556_v31 = vpop.permute.xlu0 %555 }
0x18a5   :  { %8451 = vrsqrt.f32 %v1828_v32 }
0x18a7   :  { %v1825_v39 = vpop.xlane.xlu1 %1824 }
0x18a8   :  { %v1827_v45 = vmul.f32 0.03125, %v1825_v39 }
0x18aa   :  { %v1829_v9 = vadd.f32 1e-05, %v1827_v45 }
0x18ab   :  { %v546_v55 = vpop.permute.xlu1 %545 }
0x18ac   :  { %8453 = vrsqrt.f32 %v1829_v9  ;;  %v548_v58 = vmul.f32 %v546_v55, %v538_v44  ;;  %v732_v59 = vmul.f32 %v730_v6, %v546_v55  ;;  %v913_v15 = vmul.f32 %v911_v46, %v546_v55 }
0x18ad   :  { %v1095_v61 = vmul.f32 %v1093_v3, %v546_v55  ;;  %v1277_v62 = vmul.f32 %v1275_v18, %v546_v55  ;;  %v1459_v4 = vmul.f32 %v1457_v13, %v546_v55  ;;  %v549_v16 = vmul.f32 %v546_v55, %v539_v12 }
0x18ae   :  { %v558_v2 = vadd.f32 %v556_v31, %v548_v58  ;;  %v734_v5 = vadd.f32 %v732_v59, %v556_v31  ;;  %v915_v8 = vadd.f32 %v913_v15, %v556_v31  ;;  %v1641_v22 = vmul.f32 %v1639_v37, %v546_v55 }
0x18af   :  { %v8452_v17 = vpop.eup %8451  ;;  %v1097_v14 = vadd.f32 %v1095_v61, %v556_v31  ;;  %v1279_v29 = vadd.f32 %v1277_v62, %v556_v31  ;;  %v1461_v25 = vadd.f32 %v1459_v4, %v556_v31  ;;  %v733_v33 = vmul.f32 %v731_v7, %v546_v55 }
0x18b0   :  { %v1837_v21 = vmul.f32 %v8452_v17, %v9101_v60  ;;  %v1844_v32 = vsel %vm1843_vm0, %v558_v2, %v734_v5  ;;  %v559_v27 = vadd.f32 %v556_v31, %v549_v16  ;;  %v914_v28 = vmul.f32 %v912_v11, %v546_v55 }
0x18b1   :  { %v1846_v38 = vsel %vm10418_vm8, %v1844_v32, %v915_v8  ;;  %v1096_v30 = vmul.f32 %v1094_v48, %v546_v55  ;;  %v735_v36 = vadd.f32 %v733_v33, %v556_v31  ;;  %v1278_v39 = vmul.f32 %v1276_v49, %v546_v55 }
0x18b2   :  { %v1839_v34 = vmul.f32 %v1837_v21, %v546_v55  ;;  %v1849_v35 = vsel %vm1848_vm2, %v1846_v38, %v1097_v14  ;;  %v1643_v56 = vadd.f32 %v1641_v22, %v556_v31  ;;  %v916_v60 = vadd.f32 %v914_v28, %v556_v31 }
0x18b3   :  { %v1851_v6 = vsel %vm10419_vm9, %v1849_v35, %v1279_v29  ;;  %v1458_v44 = vmul.f32 %v1454_v52, %v9079_v43  ;;  %v1098_v46 = vadd.f32 %v1096_v30, %v556_v31  ;;  %v1845_v18 = vsel %vm1843_vm0, %v559_v27, %v735_v36  ;;  %vm10425_vm0 = vmmov %vm10422_vm12 }
0x18b4   :  { %v1841_v7 = vadd.f32 %v1839_v34, %v556_v31  ;;  %v1854_v45 = vsel %vm1853_vm3, %v1851_v6, %v1461_v25  ;;  %v1280_v49 = vadd.f32 %v1278_v39, %v556_v31  ;;  %v1640_v3 = vmul.f32 %v1636_v53, %v9063_v51  ;;  %vm10430_vm8 = vmmov %vm10425_vm0 }
0x18b5   :  { %v1857_v12 = vsel %vm1856_vm5, %v1854_v45, %v1643_v56  ;;  %v1460_v11 = vmul.f32 %v1458_v44, %v546_v55  ;;  %v1847_v9 = vsel %vm10420_vm10, %v1845_v18, %v916_v60  ;;  %vm10431_vm9 = vmmov %vm10425_vm0 }
0x18b6   :  { %v8454_v40 = vpop.eup %8453  ;;  %v9181_v47 = vsel %vm1859_vm7, %v1857_v12, %v1841_v7  ;;  %v1850_v43 = vsel %vm1848_vm2, %v1847_v9, %v1098_v46  ;;  %v1642_v63 = vmul.f32 %v1640_v3, %v546_v55  ;;  %vm10426_vm2 = vmmov %vm10425_vm0 }
0x18b7   :  { %v1834_v24 = vrot.slane %v8454_v40, 1  ;;  %1872 = vrot.lane.b32.xlu1 %v9181_v47, %s8602_s26  ;;  %v1852_v10 = vsel %vm10421_vm11, %v1850_v43, %v1280_v49  ;;  %v1462_v13 = vadd.f32 %v1460_v11, %v556_v31  ;;  %vm10432_vm10 = vmmov %vm10425_vm0  ;;  %vm3582_vm11 = vcmask 523264  }
0x18b8   :  { %v1644_v59 = vadd.f32 %v1642_v63, %v556_v31 }
0x18b9   :  { %v1838_v48 = vmul.f32 %v1834_v24, %v9107_v0  ;;  %v1855_v58 = vsel %vm1853_vm3, %v1852_v10, %v1462_v13  ;;  %v9202_v0 = vsub.s32 5, %v8778_v20  ;;  %vm10427_vm3 = vmmov %vm10425_vm0 }
0x18ba   :  { %v1858_v51 = vsel %vm1856_vm5, %v1855_v58, %v1644_v59  ;;  %vm10428_vm5 = vmmov %vm10425_vm0 }
0x18bb   :  { %v1840_v57 = vmul.f32 %v1838_v48, %v546_v55  ;;  %v1869_v55 = vrot.slane %v9130_v41, %v9202_v0 }
0x18bd   :  { %v1842_v15 = vadd.f32 %v1840_v57, %v556_v31 }
0x18bf   :  { %v9193_v53 = vsel %vm1859_vm7, %v1858_v51, %v1842_v15  ;;  %vm10429_vm7 = vmmov %vm10425_vm0 }
0x18c0   :  { %1874 = vrot.lane.b32.xlu1 %v9193_v53, %s8602_s26 }
0x1929   :  { %v1873_v61 = vpop.permute.xlu1 %1872 }
0x192a   :  { %7550 = vmatprep.mubr.msk.f32.mxu1 %vm10422_vm12, %v1873_v61  ;;  %vm10433_vm12 = vmmov %vm10425_vm0 }
0x1932   :  { %v1875_v62 = vpop.permute.xlu1 %1874 }
0x1933   :  { %7551 = vmatmul.mubr.msk.f32.vlgmr.msra.gmra.mrb[10].mxu1 %vm10423_vm13, %v1875_v62  ;;  %vm10434_vm13 = vmmov %vm10425_vm0 }
0x1934   :  { %7560 = vmatprep.mubr.msk.f32.mxu1 %vm10424_vm14, %v8597_v1 }
0x1a06   :  { %v7552_v31 = vpop.f32.mrb[10].mxu1 }
0x1a07   :  { %v9206_v4 = vadd.f32 %v7552_v31, %v1869_v55  ;;  %v1946_v37 = vpop.f32.mrb[11].mxu1 }
0x1a08   :  { %v9208_v2 = vadd.f32 %v1946_v37, %v1869_v55 }
0x1a09   :  { %2034 = vrot.lane.b32.xlu1 %v9206_v4, %s8603_s29 }
0x1a0a   :  { %1956 = vrot.lane.b32.xlu0 %v9208_v2, %s8603_s29 }
0x1a7b   :  { %v2035_v5 = vpop.permute.xlu1 %2034 }
0x1a7c   :  { %7559 = vmatpush3.xpose.msk.msra.mxu1 %vm1958_vm15, %v2035_v5  ;;  %v1957_v8 = vpop.permute.xlu0 %1956 }
0x1a7d   :  { %7554 = vmatpush3.xpose.msk.msra.mxu0 %vm1958_vm15, %v1957_v8  ;;  %7568 = vmatprep.subr.mxu1 %v8597_v1 }
0x1a7e   :  { %7563 = vmatprep.subr.mxu0 %v8597_v1 }
0x1a7f   :  { %7561 = vmatmul.mubr.msk.f32.vlgmr.msra.gmra.mrb[12].mxu1 %vm1958_vm15, %v9206_v4 }
0x1a80   :  { %7556 = vmatmul.mubr.msk.f32.vlgmr.msra.gmra.mrb[12].mxu0 %vm1958_vm15, %v9208_v2  ;;  %7570 = vmatprep.mubr.msk.f32.mxu1 %vm10424_vm14, %v8597_v1 }
0x1a81   :  { %7565 = vmatprep.mubr.msk.f32.mxu0 %vm10424_vm14, %v8597_v1 }
0x1b52   :  { %v2106_v16 = vpop.f32.mrb[12].mxu1 }
0x1b53   :  { %v2111_v17 = vmul.f32 0.35355338, %v2106_v16  ;;  %v2029_v52 = vpop.f32.mrb[12].mxu0  ;;  %v7562_v14 = vpop.f32.mrb[13].mxu1 }
0x1b54   :  { %v2110_v29 = vmul.f32 0.35355338, %v2029_v52  ;;  %v7557_v22 = vpop.f32.mrb[13].mxu0 }
0x1b55   :  { %v2115_v25 = vsel %vm1958_vm15, %v2111_v17, -inf }
0x1b56   :  { %2116 = vmax.xlane.f32.xlu1 %v2115_v25  ;;  %v2112_v21 = vsel %vm1958_vm15, %v2110_v29, -inf }
0x1b57   :  { %2113 = vmax.xlane.f32.xlu0 %v2112_v21 }
0x1b67   :  { %2134 = vrot.lane.b32.xlu1 %v9208_v2, %s8601_s3 }
0x1b6b   :  { %2288 = vrot.lane.b32.xlu1 %v9208_v2, %s8604_s2 }
0x1b6d   :  { %2210 = vrot.lane.b32.xlu0 %v9206_v4, %s8601_s3 }
0x1b6f   :  { %2366 = vrot.lane.b32.xlu1 %v9206_v4, %s8604_s2 }
0x1b73   :  { %2364 = vrot.lane.b32.xlu1 %v9206_v4, %s8605_s23 }
0x1be3   :  { %v2117_v32 = vpop.xlane.xlu1 %2116 }
0x1be4   :  { %v2119_v33 = vsub.f32 %v2111_v17, %v2117_v32  ;;  %v2114_v38 = vpop.xlane.xlu0 %2113 }
0x1be5   :  { %v2118_v27 = vsub.f32 %v2110_v29, %v2114_v38 }
0x1be6   :  { %v2122_v28 = vmul.f32 1.442695, %v2119_v33 }
0x1be7   :  { %v2120_v30 = vmul.f32 1.442695, %v2118_v27  ;;  %v2135_v34 = vpop.permute.xlu1 %2134 }
0x1be8   :  { %8455 = vpow2.f32 %v2122_v28  ;;  %7564 = vmatpush3.msra.mxu0 %v2135_v34  ;;  %v2211_v35 = vpop.permute.xlu0 %2210 }
0x1be9   :  { %7569 = vmatpush3.msra.mxu1 %v2211_v35  ;;  %7573 = vmatprep.subr.mxu0 %v8597_v1  ;;  %8457 = vpow2.f32 %v2120_v30 }
0x1bea   :  { %7578 = vmatprep.subr.mxu1 %v8597_v1 }
0x1beb   :  { %v2289_v7 = vpop.permute.xlu1 %2288 }
0x1bef   :  { %v2367_v12 = vpop.permute.xlu1 %2366 }
0x1bf2   :  { %v8456_v36 = vpop.eup %8455 }
0x1bf3   :  { %v2127_v39 = vsel %vm1958_vm15, %v8456_v36, 0.0  ;;  %v8458_v56 = vpop.eup %8457  ;;  %v2365_v40 = vpop.permute.xlu1 %2364 }
0x1bf4   :  { %2128 = vadd.xlane.f32.xlu0 %v2127_v39  ;;  %v2124_v6 = vsel %vm1958_vm15, %v8458_v56, 0.0 }
0x1bf8   :  { %2125 = vadd.xlane.f32.xlu0 %v2124_v6 }
0x1c0e   :  { %2286 = vrot.lane.b32.xlu0 %v9208_v2, %s8605_s23 }
0x1c81   :  { %v2129_v60 = vpop.xlane.xlu0 %2128 }
0x1c82   :  { %8459 = vrcp.f32 %v2129_v60 }
0x1c85   :  { %v2126_v44 = vpop.xlane.xlu0 %2125 }
0x1c86   :  { %8461 = vrcp.f32 %v2126_v44 }
0x1c89   :  { %v2287_v49 = vpop.permute.xlu0 %2286 }
0x1c8c   :  { %v8460_v45 = vpop.eup %8459 }
0x1c8d   :  { %v2133_v46 = vmul.f32 %v8460_v45, %v8456_v36 }
0x1c8f   :  { %7571 = vmatmul.mubr.msk.f32.vlgmr.msra.gmra.mrb[14].mxu1 %vm1958_vm15, %v2133_v46 }
0x1c90   :  { %v8462_v11 = vpop.eup %8461  ;;  %7579 = vmatpush3.xpose.msk.msra.mxu1 %vm1958_vm15, %v2367_v12  ;;  %7580 = vmatprep.mubr.msk.f32.mxu1 %vm10424_vm14, %v8597_v1 }
0x1c91   :  { %v2132_v18 = vmul.f32 %v8462_v11, %v8458_v56  ;;  %7588 = vmatprep.subr.mxu1 %v8597_v1 }
0x1c93   :  { %7566 = vmatmul.mubr.msk.f32.vlgmr.msra.gmra.mrb[14].mxu0 %vm1958_vm15, %v2132_v18  ;;  %7581 = vmatmul.mubr.msk.f32.vlgmr.msra.gmra.mrb[16].mxu1 %vm1958_vm15, %v2365_v40 }
0x1c94   :  { %7574 = vmatpush3.xpose.msk.msra.mxu0 %vm1958_vm15, %v2289_v7  ;;  %7575 = vmatprep.mubr.msk.f32.mxu0 %vm10424_vm14, %v8597_v1 }
0x1c95   :  { %7583 = vmatprep.subr.mxu0 %v8597_v1  ;;  %7590 = vmatprep.mubr.msk.f32.mxu1 %vm10424_vm14, %v8597_v1 }
0x1c97   :  { %7576 = vmatmul.mubr.msk.f32.vlgmr.msra.gmra.mrb[16].mxu0 %vm1958_vm15, %v2287_v49 }
0x1c98   :  { %7585 = vmatprep.mubr.msk.f32.mxu0 %vm10424_vm14, %v8597_v1 }
0x1d62   :  { %v9260_v3 = vpop.f32.mrb[14].mxu1 }
0x1d63   :  { %v7572_v9 = vpop.f32.mrb[15].mxu1 }
0x1d66   :  { %v9262_v24 = vpop.f32.mrb[14].mxu0  ;;  %v2438_v43 = vpop.f32.mrb[16].mxu1 }
0x1d67   :  { %v2443_v63 = vmul.f32 0.35355338, %v2438_v43  ;;  %v7567_v10 = vpop.f32.mrb[15].mxu0  ;;  %v7582_v48 = vpop.f32.mrb[17].mxu1 }
0x1d69   :  { %v2447_v13 = vsel %vm1958_vm15, %v2443_v63, -inf }
0x1d6a   :  { %2448 = vmax.xlane.f32.xlu1 %v2447_v13  ;;  %v2360_v57 = vpop.f32.mrb[16].mxu0 }
0x1d6b   :  { %v2442_v58 = vmul.f32 0.35355338, %v2360_v57  ;;  %v7577_v59 = vpop.f32.mrb[17].mxu0 }
0x1d6d   :  { %v2444_v15 = vsel %vm1958_vm15, %v2442_v58, -inf }
0x1d6e   :  { %2445 = vmax.xlane.f32.xlu0 %v2444_v15 }
0x1d7b   :  { %2466 = vrot.lane.b32.xlu1 %v9208_v2, %s8606_s5 }
0x1d7f   :  { %2620 = vrot.lane.b32.xlu1 %v9208_v2, %s8607_s6 }
0x1d83   :  { %2698 = vrot.lane.b32.xlu1 %v9206_v4, %s8607_s6 }
0x1d84   :  { %2542 = vrot.lane.b32.xlu0 %v9206_v4, %s8606_s5 }
0x1d87   :  { %2696 = vrot.lane.b32.xlu1 %v9206_v4, %s8608_s24 }
0x1df7   :  { %v2449_v51 = vpop.xlane.xlu1 %2448 }
0x1df8   :  { %v2451_v61 = vsub.f32 %v2443_v63, %v2449_v51 }
0x1dfa   :  { %v2454_v62 = vmul.f32 1.442695, %v2451_v61 }
0x1dfb   :  { %v2467_v55 = vpop.permute.xlu1 %2466  ;;  %v2446_v31 = vpop.xlane.xlu0 %2445 }
0x1dfc   :  { %8463 = vpow2.f32 %v2454_v62  ;;  %v2450_v37 = vsub.f32 %v2442_v58, %v2446_v31  ;;  %7584 = vmatpush3.msra.mxu0 %v2467_v55 }
0x1dfd   :  { %7593 = vmatprep.subr.mxu0 %v8597_v1 }
0x1dfe   :  { %v2452_v5 = vmul.f32 1.442695, %v2450_v37 }
0x1dff   :  { %v2543_v8 = vpop.permute.xlu0 %2542  ;;  %v2621_v25 = vpop.permute.xlu1 %2620 }
0x1e00   :  { %8465 = vpow2.f32 %v2452_v5  ;;  %7589 = vmatpush3.msra.mxu1 %v2543_v8 }
0x1e01   :  { %7598 = vmatprep.subr.mxu1 %v8597_v1 }
0x1e03   :  { %v2699_v32 = vpop.permute.xlu1 %2698 }
0x1e06   :  { %v8464_v16 = vpop.eup %8463 }
0x1e07   :  { %v2459_v17 = vsel %vm1958_vm15, %v8464_v16, 0.0  ;;  %v2697_v28 = vpop.permute.xlu1 %2696 }
0x1e08   :  { %2460 = vadd.xlane.f32.xlu0 %v2459_v17 }
0x1e0a   :  { %v8466_v52 = vpop.eup %8465 }
0x1e0b   :  { %v2456_v14 = vsel %vm1958_vm15, %v8466_v52, 0.0 }
0x1e0c   :  { %2457 = vadd.xlane.f32.xlu0 %v2456_v14 }
0x1e22   :  { %2618 = vrot.lane.b32.xlu0 %v9208_v2, %s8608_s24 }
0x1e95   :  { %v2461_v29 = vpop.xlane.xlu0 %2460 }
0x1e96   :  { %8467 = vrcp.f32 %v2461_v29 }
0x1e99   :  { %v2458_v22 = vpop.xlane.xlu0 %2457 }
0x1e9a   :  { %8469 = vrcp.f32 %v2458_v22 }
0x1e9d   :  { %v2619_v30 = vpop.permute.xlu0 %2618 }
0x1ea0   :  { %v8468_v21 = vpop.eup %8467 }
0x1ea1   :  { %v2465_v33 = vmul.f32 %v8468_v21, %v8464_v16 }
0x1ea3   :  { %7591 = vmatmul.mubr.msk.f32.vlgmr.msra.gmra.mrb[18].mxu1 %vm1958_vm15, %v2465_v33 }
0x1ea4   :  { %v8470_v38 = vpop.eup %8469  ;;  %7599 = vmatpush3.xpose.msk.msra.mxu1 %vm1958_vm15, %v2699_v32  ;;  %7600 = vmatprep.mubr.msk.f32.mxu1 %vm10424_vm14, %v8597_v1 }
0x1ea5   :  { %v2464_v27 = vmul.f32 %v8470_v38, %v8466_v52  ;;  %7608 = vmatprep.subr.mxu1 %v8597_v1 }
0x1ea7   :  { %7586 = vmatmul.mubr.msk.f32.vlgmr.msra.gmra.mrb[18].mxu0 %vm1958_vm15, %v2464_v27  ;;  %7601 = vmatmul.mubr.msk.f32.vlgmr.msra.gmra.mrb[20].mxu1 %vm1958_vm15, %v2697_v28 }
0x1ea8   :  { %7594 = vmatpush3.xpose.msk.msra.mxu0 %vm1958_vm15, %v2621_v25  ;;  %7595 = vmatprep.mubr.msk.f32.mxu0 %vm10424_vm14, %v8597_v1 }
0x1ea9   :  { %7603 = vmatprep.subr.mxu0 %v8597_v1  ;;  %7610 = vmatprep.mubr.msk.f32.mxu1 %vm10424_vm14, %v8597_v1 }
0x1eab   :  { %7596 = vmatmul.mubr.msk.f32.vlgmr.msra.gmra.mrb[20].mxu0 %vm1958_vm15, %v2619_v30 }
0x1eac   :  { %7605 = vmatprep.mubr.msk.f32.mxu0 %vm10424_vm14, %v8597_v1 }
0x1f76   :  { %v9298_v34 = vpop.f32.mrb[18].mxu1 }
0x1f77   :  { %v7592_v35 = vpop.f32.mrb[19].mxu1 }
0x1f7a   :  { %v9300_v36 = vpop.f32.mrb[18].mxu0  ;;  %v2770_v39 = vpop.f32.mrb[20].mxu1 }
0x1f7b   :  { %v2775_v56 = vmul.f32 0.35355338, %v2770_v39  ;;  %v7587_v6 = vpop.f32.mrb[19].mxu0  ;;  %v7602_v60 = vpop.f32.mrb[21].mxu1 }
0x1f7d   :  { %v2779_v44 = vsel %vm1958_vm15, %v2775_v56, -inf }
0x1f7e   :  { %2780 = vmax.xlane.f32.xlu1 %v2779_v44  ;;  %v2692_v7 = vpop.f32.mrb[20].mxu0 }
0x1f7f   :  { %v2774_v45 = vmul.f32 0.35355338, %v2692_v7  ;;  %v7597_v12 = vpop.f32.mrb[21].mxu0 }
0x1f81   :  { %v2776_v46 = vsel %vm1958_vm15, %v2774_v45, -inf }
0x1f82   :  { %2777 = vmax.xlane.f32.xlu0 %v2776_v46 }
0x1f8f   :  { %2798 = vrot.lane.b32.xlu1 %v9208_v2, %s8609_s25 }
0x1f93   :  { %2952 = vrot.lane.b32.xlu1 %v9208_v2, %s10410_s27 }
0x1f97   :  { %3030 = vrot.lane.b32.xlu1 %v9206_v4, %s10410_s27 }
0x1f98   :  { %2874 = vrot.lane.b32.xlu0 %v9206_v4, %s8609_s25 }
0x1f9b   :  { %3028 = vrot.lane.b32.xlu1 %v9206_v4, %s10408_s28 }
0x200b   :  { %v2781_v11 = vpop.xlane.xlu1 %2780 }
0x200c   :  { %v2783_v18 = vsub.f32 %v2775_v56, %v2781_v11 }
0x200e   :  { %v2786_v40 = vmul.f32 1.442695, %v2783_v18 }
0x200f   :  { %v2799_v49 = vpop.permute.xlu1 %2798  ;;  %v2778_v9 = vpop.xlane.xlu0 %2777 }
0x2010   :  { %8471 = vpow2.f32 %v2786_v40  ;;  %v2782_v43 = vsub.f32 %v2774_v45, %v2778_v9  ;;  %7604 = vmatpush3.msra.mxu0 %v2799_v49  ;;  %v3315_v49 = vld [vmem:[%s10383_s8 + $0x8] sm:$0xff] }
0x2011   :  { %7613 = vmatprep.subr.mxu0 %v8597_v1 }
0x2012   :  { %v2784_v63 = vmul.f32 1.442695, %v2782_v43  ;;  %v3316_v43 = vld [vmem:[%s10383_s8 + $0x10] sm:$0xff] }
0x2013   :  { %v2875_v10 = vpop.permute.xlu0 %2874  ;;  %v2953_v51 = vpop.permute.xlu1 %2952 }
0x2014   :  { %8473 = vpow2.f32 %v2784_v63  ;;  %7609 = vmatpush3.msra.mxu1 %v2875_v10  ;;  %v3317_v63 = vld [vmem:[%s10383_s8 + $0x18] sm:$0xff] }
0x2015   :  { %7618 = vmatprep.subr.mxu1 %v8597_v1  ;;  %v8028_v10 = vpack.c.bf16 %v3317_v63, %v3316_v43 }
0x2017   :  { %v3031_v62 = vpop.permute.xlu1 %3030 }
0x201a   :  { %v8472_v48 = vpop.eup %8471 }
0x201b   :  { %v2791_v13 = vsel %vm1958_vm15, %v8472_v48, 0.0  ;;  %v3029_v5 = vpop.permute.xlu1 %3028 }
0x201c   :  { %2792 = vadd.xlane.f32.xlu0 %v2791_v13 }
0x201e   :  { %v8474_v57 = vpop.eup %8473 }
0x201f   :  { %v2788_v58 = vsel %vm1958_vm15, %v8474_v57, 0.0 }
0x2020   :  { %2789 = vadd.xlane.f32.xlu0 %v2788_v58 }
0x2036   :  { %2950 = vrot.lane.b32.xlu0 %v9208_v2, %s10408_s28 }
0x20a9   :  { %v2793_v59 = vpop.xlane.xlu0 %2792 }
0x20aa   :  { %8475 = vrcp.f32 %v2793_v59 }
0x20ad   :  { %v2790_v15 = vpop.xlane.xlu0 %2789 }
0x20ae   :  { %8477 = vrcp.f32 %v2790_v15 }
0x20b1   :  { %v2951_v8 = vpop.permute.xlu0 %2950 }
0x20b4   :  { %v8476_v61 = vpop.eup %8475 }
0x20b5   :  { %v2797_v55 = vmul.f32 %v8476_v61, %v8472_v48 }
0x20b7   :  { %7611 = vmatmul.mubr.msk.f32.vlgmr.msra.gmra.mrb[22].mxu1 %vm1958_vm15, %v2797_v55 }
0x20b8   :  { %v8478_v31 = vpop.eup %8477  ;;  %7619 = vmatpush3.xpose.msk.msra.mxu1 %vm1958_vm15, %v3031_v62  ;;  %7620 = vmatprep.mubr.msk.f32.mxu1 %vm10424_vm14, %v8597_v1 }
0x20b9   :  { %v2796_v37 = vmul.f32 %v8478_v31, %v8474_v57  ;;  %7628 = vmatprep.subr.mxu1 %v8597_v1 }
0x20bb   :  { %7606 = vmatmul.mubr.msk.f32.vlgmr.msra.gmra.mrb[22].mxu0 %vm1958_vm15, %v2796_v37  ;;  %7621 = vmatmul.mubr.msk.f32.vlgmr.msra.gmra.mrb[24].mxu1 %vm1958_vm15, %v3029_v5 }
0x20bc   :  { %7614 = vmatpush3.xpose.msk.msra.mxu0 %vm1958_vm15, %v2953_v51  ;;  %7615 = vmatprep.mubr.msk.f32.mxu0 %vm10424_vm14, %v8597_v1 }
0x20bd   :  { %7623 = vmatprep.subr.mxu0 %v8597_v1  ;;  %7630 = vmatprep.mubr.msk.f32.mxu1 %vm10424_vm14, %v8597_v1 }
0x20bf   :  { %7616 = vmatmul.mubr.msk.f32.vlgmr.msra.gmra.mrb[24].mxu0 %vm1958_vm15, %v2951_v8 }
0x20c0   :  { %7625 = vmatprep.mubr.msk.f32.mxu0 %vm10424_vm14, %v8597_v1 }
0x218a   :  { %v2946_v16 = vpop.f32.mrb[22].mxu1 }
0x218b   :  { %v7612_v17 = vpop.f32.mrb[23].mxu1 }
0x218e   :  { %v2870_v52 = vpop.f32.mrb[22].mxu0  ;;  %v3102_v14 = vpop.f32.mrb[24].mxu1 }
0x218f   :  { %v3107_v29 = vmul.f32 0.35355338, %v3102_v14  ;;  %v7607_v22 = vpop.f32.mrb[23].mxu0  ;;  %v7622_v25 = vpop.f32.mrb[25].mxu1 }
0x2191   :  { %v3111_v21 = vsel %vm1958_vm15, %v3107_v29, -inf }
0x2192   :  { %3112 = vmax.xlane.f32.xlu1 %v3111_v21  ;;  %v3024_v32 = vpop.f32.mrb[24].mxu0 }
0x2193   :  { %v3106_v33 = vmul.f32 0.35355338, %v3024_v32  ;;  %v7617_v38 = vpop.f32.mrb[25].mxu0 }
0x2195   :  { %v3108_v27 = vsel %vm1958_vm15, %v3106_v33, -inf }
0x2196   :  { %3109 = vmax.xlane.f32.xlu0 %v3108_v27 }
0x21a3   :  { %3130 = vrot.lane.b32.xlu1 %v9208_v2, %s10404_s30 }
0x21a7   :  { %3284 = vrot.lane.b32.xlu1 %v9300_v36, %s10402_s0 }
0x21ab   :  { %3286 = vrot.lane.b32.xlu1 %v9298_v34, %s10402_s0 }
0x21af   :  { %3294 = vrot.lane.b32.xlu1 %v2946_v16, %s10400_s19 }
0x221f   :  { %v3113_v28 = vpop.xlane.xlu1 %3112 }
0x2220   :  { %v3115_v30 = vsub.f32 %v3107_v29, %v3113_v28 }
0x2222   :  { %v3118_v35 = vmul.f32 1.442695, %v3115_v30 }
0x2223   :  { %v3131_v39 = vpop.permute.xlu1 %3130  ;;  %v3110_v56 = vpop.xlane.xlu0 %3109 }
0x2224   :  { %8479 = vpow2.f32 %v3118_v35  ;;  %v3114_v6 = vsub.f32 %v3106_v33, %v3110_v56  ;;  %7624 = vmatpush3.msra.mxu0 %v3131_v39 }
0x2226   :  { %v3116_v60 = vmul.f32 1.442695, %v3114_v6 }
0x2227   :  { %v3285_v59 = vpop.permute.xlu1 %3284 }
0x2228   :  { %8481 = vpow2.f32 %v3116_v60  ;;  %v3306_v62 = vsel %vm1958_vm15, %v9262_v24, %v3285_v59  ;;  %v3320_v24 = vsub.s32 6, %v8778_v20  ;;  %v3571_v59 = vld [vmem:[%s10385_s10 + $0x8] sm:$0xff] }
0x222b   :  { %v3287_v15 = vpop.permute.xlu1 %3286 }
0x222c   :  { %v3307_v31 = vsel %vm1958_vm15, %v9260_v3, %v3287_v15  ;;  %v3572_v15 = vld [vmem:[%s10385_s10 + $0x10] sm:$0xff] }
0x222e   :  { %v8480_v2 = vpop.eup %8479 }
0x222f   :  { %v3123_v44 = vsel %vm1958_vm15, %v8480_v2, 0.0  ;;  %v3295_v51 = vpop.permute.xlu1 %3294 }
0x2230   :  { %3124 = vadd.xlane.f32.xlu0 %v3123_v44  ;;  %v3310_v8 = vsel %vm3308_vm1, %v3307_v31, %v3295_v51  ;;  %v3575_v31 = vld [vmem:[%s10385_s10 + $0x28] sm:$0xff] }
0x2232   :  { %v8482_v36 = vpop.eup %8481 }
0x2233   :  { %v3120_v34 = vsel %vm1958_vm15, %v8482_v36, 0.0 }
0x2234   :  { %3121 = vadd.xlane.f32.xlu0 %v3120_v34 }
0x224a   :  { %3206 = vrot.lane.b32.xlu0 %v9206_v4, %s10404_s30  ;;  %v3314_v4 = vld [vmem:[%s10383_s8] sm:$0xff] }
0x224b   :  { %v8024_v9 = vpack.c.bf16 %v3315_v49, %v3314_v4  ;;  %v3477_v4 = vld [vmem:[%s10384_s9 + $0x10] sm:$0xff] }
0x224d   :  { %8025 = vmatprep.subr.bf16.mxu0 %v8024_v9 }
0x224e   :  { %3292 = vrot.lane.b32.xlu0 %v2870_v52, %s10400_s19  ;;  %v3321_v52 = vrot.slane %v9130_v41, %v3320_v24  ;;  %s10443_s19 = smov 24  }
0x22bd   :  { %v3125_v7 = vpop.xlane.xlu0 %3124 }
0x22be   :  { %8483 = vrcp.f32 %v3125_v7 }
0x22c1   :  { %v3122_v45 = vpop.xlane.xlu0 %3121 }
0x22c2   :  { %8485 = vrcp.f32 %v3122_v45  ;;  %v9395_v45 = vld [vmem:[%s10387_s12 + $0x8] sm:$0xff] }
0x22c5   :  { %v3207_v12 = vpop.permute.xlu0 %3206 }
0x22c6   :  { %7629 = vmatpush3.msra.mxu1 %v3207_v12  ;;  %v3468_v12 = vrot.slane %v9395_v45, %v8787_v26 }
0x22c8   :  { %v8484_v46 = vpop.eup %8483 }
0x22c9   :  { %v3129_v11 = vmul.f32 %v8484_v46, %v8480_v2  ;;  %v3293_v61 = vpop.permute.xlu0 %3292  ;;  %v3457_v46 = vsub.s32 7, %v8778_v20 }
0x22ca   :  { %v3309_v37 = vsel %vm3308_vm1, %v3306_v62, %v3293_v61  ;;  %v3573_v61 = vld [vmem:[%s10385_s10 + $0x18] sm:$0xff] }
0x22cb   :  { %7631 = vmatmul.mubr.msk.f32.vlgmr.msra.gmra.mrb[26].mxu1 %vm1958_vm15, %v3129_v11  ;;  %v3458_v11 = vrot.slane %v9130_v41, %v3457_v46  ;;  %v8044_v62 = vpack.c.bf16 %v3573_v61, %v3572_v15  ;;  %v3729_v61 = vrot.slane %v9395_v45, %v9122_v54 }
0x22cc   :  { %v8486_v18 = vpop.eup %8485 }
0x22cd   :  { %v3128_v40 = vmul.f32 %v8486_v18, %v8482_v36  ;;  %v3475_v18 = vld [vmem:[%s10384_s9] sm:$0xff] }
0x22cf   :  { %7626 = vmatmul.mubr.msk.f32.vlgmr.msra.gmra.mrb[26].mxu0 %vm1958_vm15, %v3128_v40  ;;  %v3476_v40 = vld [vmem:[%s10384_s9 + $0x8] sm:$0xff] }
0x22d0   :  { %8027 = vmatpush3.bf16.msra.mxu0 %v8024_v9  ;;  %v8032_v49 = vpack.c.bf16 %v3476_v40, %v3475_v18  ;;  %v3478_v9 = vld [vmem:[%s10384_s9 + $0x18] sm:$0xff] }
0x22d1   :  { %8029 = vmatprep.subr.bf16.mxu0 %v8028_v10  ;;  %v8036_v41 = vpack.c.bf16 %v3478_v9, %v3477_v4 }
0x22d2   :  { %8033 = vmatprep.subr.bf16.mxu1 %v8032_v49 }
0x22d3   :  { %8035 = vmatpush3.bf16.msra.mxu1 %v8032_v49 }
0x22d4   :  { %8031 = vmatpush3.bf16.msra.mxu0 %v8028_v10  ;;  %8037 = vmatprep.subr.bf16.mxu1 %v8036_v41 }
0x22d7   :  { %8039 = vmatpush3.bf16.msra.mxu1 %v8036_v41 }
0x239e   :  { %v3278_v48 = vpop.f32.mrb[26].mxu1 }
0x239f   :  { %3302 = vrot.lane.b32.xlu1 %v3278_v48, %s10406_s1  ;;  %v7632_v13 = vpop.f32.mrb[27].mxu1 }
0x23a2   :  { %v3202_v57 = vpop.f32.mrb[26].mxu0 }
0x23a3   :  { %3300 = vrot.lane.b32.xlu0 %v3202_v57, %s10406_s1  ;;  %v7627_v58 = vpop.f32.mrb[27].mxu0 }
0x23a4   :  { %v3570_v58 = vld [vmem:[%s10385_s10] sm:$0xff] }
0x23a5   :  { %v8040_v51 = vpack.c.bf16 %v3571_v59, %v3570_v58 }
0x23a7   :  { %8041 = vmatprep.subr.bf16.mxu0 %v8040_v51 }
0x2411   :  { %v3303_v55 = vpop.permute.xlu1 %3302 }
0x2412   :  { %v3313_v17 = vsel %vm3311_vm4, %v3310_v8, %v3303_v55  ;;  %v3574_v55 = vld [vmem:[%s10385_s10 + $0x20] sm:$0xff] }
0x2415   :  { %v3301_v5 = vpop.permute.xlu0 %3300 }
0x2416   :  { %v3312_v16 = vsel %vm3311_vm4, %v3309_v37, %v3301_v5 }
0x2417   :  { %7641 = vmatprep.mubr.msk.f32.mxu0 %vm10425_vm0, %v3312_v16 }
0x2418   :  { %7642 = vmatmul.mubr.msk.f32.vlgmr.msra.gmra.mrb[28].mxu0 %vm10426_vm2, %v3313_v17  ;;  %v8048_v17 = vpack.c.bf16 %v3575_v31, %v3574_v55  ;;  %vm10435_vm2 = vmmov %vm10425_vm0  ;;  %v6975_v55 = vld [vmem:[%s10382_s7 + $0x20] sm:$0xff]  ;;  %v6976_v31 = vld [vmem:[%s10382_s7 + $0x28] sm:$0xff] }
0x2419   :  { %8043 = vmatpush3.bf16.msra.mxu0 %v8040_v51 }
0x241a   :  { %8045 = vmatprep.subr.bf16.mxu0 %v8044_v62 }
0x241d   :  { %8047 = vmatpush3.bf16.msra.mxu0 %v8044_v62  ;;  %v3719_v62 = vrot.slane %v9395_v45, %v9125_v42 }
0x241e   :  { %8049 = vmatprep.subr.bf16.mxu0 %v8048_v17 }
0x2421   :  { %8051 = vmatpush3.bf16.msra.mxu0 %v8048_v17 }
0x24eb   :  { %v7643_v3 = vpop.f32.mrb[28].mxu0 }
0x24ec   :  { %v3400_v14 = vadd.f32 %v7643_v3, %v3321_v52  ;;  %v3394_v29 = vpop.f32.mrb[29].mxu0 }
0x24ed   :  { %v3395_v22 = vadd.f32 %v3394_v29, %v3321_v52 }
0x24ee   :  { %3407 = vrot.lane.b32.xlu1 %v3400_v14, %s8603_s29 }
0x24ef   :  { %3405 = vrot.lane.b32.xlu0 %v3395_v22, %s8603_s29 }
0x2560   :  { %v3408_v25 = vpop.permute.xlu1 %3407 }
0x2561   :  { %v3412_v21 = vadd.f32 %v3408_v25, %v9193_v53  ;;  %v3406_v32 = vpop.permute.xlu0 %3405 }
0x2562   :  { %v3411_v33 = vadd.f32 %v3406_v32, %v9181_v47 }
0x2563   :  { %3417 = vrot.lane.b32.xlu1 %v3412_v21, %s8602_s26 }
0x2564   :  { %3415 = vrot.lane.b32.xlu0 %v3411_v33, %s8602_s26 }
0x25d5   :  { %v3418_v38 = vpop.permute.xlu1 %3417 }
0x25d6   :  { %v3416_v27 = vpop.permute.xlu0 %3415  ;;  %v3424_v28 = vsel %vm10427_vm3, %v3418_v38, 0.0  ;;  %v3577_v38 = vld [vmem:[%s10385_s10 + $0x38] sm:$0xff]  ;;  %vm10436_vm3 = vmmov %vm10425_vm0 }
0x25d7   :  { %3425 = vadd.xlane.f32.xlu1 %v3424_v28  ;;  %v3421_v30 = vsel %vm10428_vm5, %v3416_v27, 0.0  ;;  %v3482_v28 = vrot.slane %v9395_v45, %v8781_v23  ;;  %vm10437_vm5 = vmmov %vm10425_vm0 }
0x25d8   :  { %3422 = vadd.xlane.f32.xlu0 %v3421_v30 }
0x2664   :  { %v3426_v35 = vpop.xlane.xlu1 %3425 }
0x2665   :  { %v3428_v39 = vmul.f32 0.03125, %v3426_v35  ;;  %v3423_v56 = vpop.xlane.xlu0 %3422 }
0x2666   :  { %v3427_v6 = vmul.f32 0.03125, %v3423_v56 }
0x2667   :  { %v3430_v53 = vsub.f32 %v3412_v21, %v3428_v39 }
0x2668   :  { %v3429_v60 = vsub.f32 %v3411_v33, %v3427_v6  ;;  %v3576_v33 = vld [vmem:[%s10385_s10 + $0x30] sm:$0xff] }
0x2669   :  { %v3432_v2 = vmul.f32 %v3430_v53, %v3430_v53  ;;  %v8052_v27 = vpack.c.bf16 %v3577_v38, %v3576_v33 }
0x266a   :  { %v3431_v47 = vmul.f32 %v3429_v60, %v3429_v60 }
0x266b   :  { %3437 = vrot.lane.b32.xlu1 %v3432_v2, %s8602_s26  ;;  %8053 = vmatprep.subr.bf16.mxu0 %v8052_v27 }
0x266c   :  { %3435 = vrot.lane.b32.xlu0 %v3431_v47, %s8602_s26  ;;  %8055 = vmatpush3.bf16.msra.mxu0 %v8052_v27 }
0x266d   :  { %7695 = vmatprep.subr.mxu0 %v8597_v1 }
0x26dd   :  { %v3438_v44 = vpop.permute.xlu1 %3437 }
0x26de   :  { %v3436_v36 = vpop.permute.xlu0 %3435  ;;  %v3444_v34 = vsel %vm10429_vm7, %v3438_v44, 0.0  ;;  %vm10445_vm7 = vmmov %vm10425_vm0 }
0x26df   :  { %3445 = vadd.xlane.f32.xlu1 %v3444_v34  ;;  %v3441_v7 = vsel %vm10430_vm8, %v3436_v36, 0.0  ;;  %vm10449_vm8 = vmmov %vm10425_vm0 }
0x26e0   :  { %3442 = vadd.xlane.f32.xlu0 %v3441_v7 }
0x26f0   :  { %3470 = vrot.lane.b32.xlu1 %v3468_v12, %s8603_s29 }
0x26f6   :  { %3460 = vrot.lane.b32.xlu0 %v3458_v11, %s8603_s29 }
0x276c   :  { %v3446_v43 = vpop.xlane.xlu1 %3445 }
0x276d   :  { %v3448_v63 = vmul.f32 0.03125, %v3446_v43  ;;  %v3443_v10 = vpop.xlane.xlu0 %3442 }
0x276e   :  { %v3447_v48 = vmul.f32 0.03125, %v3443_v10 }
0x276f   :  { %v3450_v13 = vadd.f32 1e-05, %v3448_v63 }
0x2770   :  { %v3449_v57 = vadd.f32 1e-05, %v3447_v48  ;;  %v3471_v3 = vpop.permute.xlu1 %3470 }
0x2771   :  { %8487 = vrsqrt.f32 %v3450_v13  ;;  %v3461_v5 = vpop.permute.xlu0 %3460 }
0x2772   :  { %8489 = vrsqrt.f32 %v3449_v57 }
0x277b   :  { %v8488_v37 = vpop.eup %8487 }
0x277c   :  { %v8490_v8 = vpop.eup %8489  ;;  %v3454_v16 = vmul.f32 %v8488_v37, %v3430_v53  ;;  %v6977_v37 = vld [vmem:[%s10382_s7 + $0x30] sm:$0xff] }
0x277d   :  { %v3453_v52 = vmul.f32 %v8490_v8, %v3429_v60  ;;  %v3581_v60 = vrot.slane %v9395_v45, %v8806_v50  ;;  %v6978_v8 = vld [vmem:[%s10382_s7 + $0x38] sm:$0xff]  ;;  %s10438_s7 = smov 72  }
0x277e   :  { %v3464_v14 = vmul.f32 %v3461_v5, %v3454_v16  ;;  %v8060_v16 = vpack.c.bf16 %v6978_v8, %v6977_v37 }
0x277f   :  { %v3463_v29 = vmul.f32 %v3461_v5, %v3453_v52  ;;  %v8056_v5 = vpack.c.bf16 %v6976_v31, %v6975_v55 }
0x2780   :  { %v3474_v22 = vadd.f32 %v3471_v3, %v3464_v14 }
0x2781   :  { %v3473_v25 = vadd.f32 %v3471_v3, %v3463_v29  ;;  %8057 = vmatprep.subr.bf16.mxu1 %v8056_v5 }
0x2782   :  { %3487 = vrot.lane.b32.xlu1 %v3474_v22, %s8602_s26 }
0x2783   :  { %3485 = vrot.lane.b32.xlu0 %v3473_v25, %s8602_s26 }
0x27f4   :  { %v3488_v32 = vpop.permute.xlu1 %3487 }
0x27f5   :  { %v3486_v21 = vpop.permute.xlu0 %3485 }
0x27f6   :  { %7652 = vmatprep.mubr.msk.f32.mxu1 %vm10431_vm9, %v3486_v21  ;;  %vm10450_vm9 = vmmov %vm10425_vm0 }
0x27f7   :  { %7653 = vmatmul.mubr.msk.f32.vlgmr.msra.gmra.mrb[28].mxu1 %vm10432_vm10, %v3488_v32  ;;  %vm10451_vm10 = vmmov %vm10425_vm0 }
0x27f8   :  { %8059 = vmatpush3.bf16.msra.mxu1 %v8056_v5 }
0x27f9   :  { %8061 = vmatprep.subr.bf16.mxu1 %v8060_v16 }
0x27fc   :  { %8063 = vmatpush3.bf16.msra.mxu1 %v8060_v16 }
0x27fd   :  { %7685 = vmatprep.subr.mxu1 %v8597_v1 }
0x28ca   :  { %v7654_v30 = vpop.f32.mrb[28].mxu1 }
0x28cb   :  { %v3565_v35 = vadd.f32 %v7654_v30, %v3482_v28  ;;  %v3559_v39 = vpop.f32.mrb[29].mxu1 }
0x28cc   :  { %v3560_v56 = vadd.f32 %v3559_v39, %v3482_v28 }
0x28cd   :  { %v3569_v53 = vmax.f32 %v3565_v35, 0.0 }
0x28ce   :  { %v3568_v6 = vmax.f32 %v3560_v56, 0.0 }
0x28d0   :  { %7671 = vmatprep.mubr.msk.f32.mxu0 %vm3582_vm11, %v3568_v6 }
0x28d1   :  { %7672 = vmatmul.mubr.msk.f32.vlgmr.msra.gmra.mrb[30].mxu0 %vm3582_vm11, %v3569_v53  ;;  %v3744_v53 = vrot.slane %v9395_v45, %v9202_v0 }
0x28d2   :  { %7697 = vmatprep.mubr.msk.f32.mxu0 %vm10424_vm14, %v8597_v1 }
0x29a4   :  { %v7673_v2 = vpop.f32.mrb[30].mxu0 }
0x29a5   :  { %v3661_v47 = vadd.f32 %v7673_v2, %v3581_v60  ;;  %v3655_v44 = vpop.f32.mrb[31].mxu0 }
0x29a6   :  { %v3656_v36 = vadd.f32 %v3655_v44, %v3581_v60 }
0x29a7   :  { %3668 = vrot.lane.b32.xlu1 %v3661_v47, %s8603_s29 }
0x29a8   :  { %3666 = vrot.lane.b32.xlu0 %v3656_v36, %s8603_s29 }
0x2a19   :  { %v3669_v34 = vpop.permute.xlu1 %3668 }
0x2a1a   :  { %v3673_v7 = vadd.f32 %v3669_v34, %v3474_v22  ;;  %v3667_v12 = vpop.permute.xlu0 %3666 }
0x2a1b   :  { %v3672_v11 = vadd.f32 %v3667_v12, %v3473_v25 }
0x2a1c   :  { %3678 = vrot.lane.b32.xlu1 %v3673_v7, %s8602_s26 }
0x2a1d   :  { %3676 = vrot.lane.b32.xlu0 %v3672_v11, %s8602_s26 }
0x2a8e   :  { %v3679_v18 = vpop.permute.xlu1 %3678 }
0x2a8f   :  { %v3685_v40 = vsel %vm10433_vm12, %v3679_v18, 0.0  ;;  %v3677_v4 = vpop.permute.xlu0 %3676  ;;  %vm10452_vm12 = vmmov %vm10425_vm0 }
0x2a90   :  { %v3682_v49 = vsel %vm10434_vm13, %v3677_v4, 0.0  ;;  %3686 = vadd.xlane.f32.xlu1 %v3685_v40  ;;  %vm10453_vm13 = vmmov %vm10425_vm0 }
0x2a91   :  { %3683 = vadd.xlane.f32.xlu0 %v3682_v49 }
0x2b1d   :  { %v3687_v9 = vpop.xlane.xlu1 %3686 }
0x2b1e   :  { %v3689_v41 = vmul.f32 0.03125, %v3687_v9  ;;  %v3684_v43 = vpop.xlane.xlu0 %3683 }
0x2b1f   :  { %v3688_v63 = vmul.f32 0.03125, %v3684_v43 }
0x2b20   :  { %v3691_v10 = vsub.f32 %v3673_v7, %v3689_v41 }
0x2b21   :  { %v3690_v48 = vsub.f32 %v3672_v11, %v3688_v63 }
0x2b22   :  { %v3693_v13 = vmul.f32 %v3691_v10, %v3691_v10 }
0x2b23   :  { %v3692_v57 = vmul.f32 %v3690_v48, %v3690_v48 }
0x2b24   :  { %3698 = vrot.lane.b32.xlu1 %v3693_v13, %s8602_s26 }
0x2b25   :  { %3696 = vrot.lane.b32.xlu0 %v3692_v57, %s8602_s26 }
0x2b96   :  { %v3699_v58 = vpop.permute.xlu1 %3698 }
0x2b97   :  { %v3705_v59 = vsel %vm10425_vm0, %v3699_v58, 0.0  ;;  %v3697_v15 = vpop.permute.xlu0 %3696 }
0x2b98   :  { %v3702_v51 = vsel %vm10435_vm2, %v3697_v15, 0.0  ;;  %3706 = vadd.xlane.f32.xlu1 %v3705_v59  ;;  %vm10454_vm2 = vmmov %vm10425_vm0 }
0x2b99   :  { %3703 = vadd.xlane.f32.xlu0 %v3702_v51 }
0x2ba9   :  { %3731 = vrot.lane.b32.xlu1 %v3729_v61, %s8603_s29 }
0x2baf   :  { %3721 = vrot.lane.b32.xlu0 %v3719_v62, %s8603_s29 }
0x2c25   :  { %v3707_v17 = vpop.xlane.xlu1 %3706 }
0x2c26   :  { %v3709_v52 = vmul.f32 0.03125, %v3707_v17  ;;  %v3704_v3 = vpop.xlane.xlu0 %3703 }
0x2c27   :  { %v3708_v14 = vmul.f32 0.03125, %v3704_v3 }
0x2c28   :  { %v3711_v29 = vadd.f32 1e-05, %v3709_v52 }
0x2c29   :  { %v3710_v22 = vadd.f32 1e-05, %v3708_v14  ;;  %v3732_v27 = vpop.permute.xlu1 %3731 }
0x2c2a   :  { %8491 = vrsqrt.f32 %v3711_v29  ;;  %v3722_v21 = vpop.permute.xlu0 %3721 }
0x2c2b   :  { %8493 = vrsqrt.f32 %v3710_v22 }
0x2c34   :  { %v8492_v25 = vpop.eup %8491 }
0x2c35   :  { %v8494_v32 = vpop.eup %8493  ;;  %v3715_v33 = vmul.f32 %v8492_v25, %v3691_v10 }
0x2c36   :  { %v3714_v38 = vmul.f32 %v8494_v32, %v3690_v48 }
0x2c37   :  { %v3725_v28 = vmul.f32 %v3722_v21, %v3715_v33 }
0x2c38   :  { %v3724_v30 = vmul.f32 %v3722_v21, %v3714_v38 }
0x2c39   :  { %v9483_v35 = vadd.f32 %v3732_v27, %v3725_v28 }
0x2c3a   :  { %v9485_v39 = vadd.f32 %v3732_v27, %v3724_v30 }
0x2c3b   :  { %3749 = vrot.lane.b32.xlu1 %v9483_v35, %s8602_s26 }
0x2c3c   :  { %3747 = vrot.lane.b32.xlu0 %v9485_v39, %s8602_s26 }
0x2cad   :  { %v3750_v6 = vpop.permute.xlu1 %3749 }
0x2cae   :  { %v3748_v56 = vpop.permute.xlu0 %3747 }
0x2caf   :  { %7682 = vmatprep.mubr.msk.f32.mxu1 %vm10436_vm3, %v3748_v56  ;;  %vm10455_vm3 = vmmov %vm10425_vm0 }
0x2cb0   :  { %7683 = vmatmul.mubr.msk.f32.vlgmr.msra.gmra.mrb[30].mxu1 %vm10437_vm5, %v3750_v6  ;;  %vm9774_vm5 = vmpackc.low %vm10455_vm3, %vm10455_vm3 }
0x2cb1   :  { %7687 = vmatprep.mubr.msk.f32.mxu1 %vm10424_vm14, %v8597_v1  ;;  %vm10470_vm3 = vmmov %vm10425_vm0 }
0x2d83   :  { %v7684_v60 = vpop.f32.mrb[30].mxu1 }
0x2d84   :  { %v9497_v2 = vadd.f32 %v7684_v60, %v3744_v53  ;;  %v3821_v47 = vpop.f32.mrb[31].mxu1 }
0x2d85   :  { %v9499_v44 = vadd.f32 %v3821_v47, %v3744_v53 }
0x2d86   :  { %3908 = vrot.lane.b32.xlu1 %v9497_v2, %s8603_s29 }
0x2d87   :  { %3831 = vrot.lane.b32.xlu0 %v9499_v44, %s8603_s29 }
0x2df8   :  { %v3909_v34 = vpop.permute.xlu1 %3908 }
0x2df9   :  { %v3832_v36 = vpop.permute.xlu0 %3831 }
0x2dfa   :  { %7686 = vmatpush3.xpose.msk.msra.mxu1 %vm1958_vm15, %v3832_v36 }
0x2dfb   :  { %7690 = vmatprep.subr.mxu1 %v8597_v1 }
0x2dfd   :  { %7688 = vmatmul.mubr.msk.f32.vlgmr.msra.gmra.mrb[32].mxu1 %vm1958_vm15, %v9499_v44 }
0x2dfe   :  { %7691 = vmatpush3.xpose.msk.msra.mxu1 %vm1958_vm15, %v3909_v34  ;;  %7692 = vmatprep.mubr.msk.f32.mxu1 %vm10424_vm14, %v8597_v1 }
0x2dff   :  { %7700 = vmatprep.subr.mxu1 %v8597_v1 }
0x2e01   :  { %7693 = vmatmul.mubr.msk.f32.vlgmr.msra.gmra.mrb[34].mxu1 %vm1958_vm15, %v9497_v2 }
0x2e02   :  { %7702 = vmatprep.mubr.msk.f32.mxu1 %vm10424_vm14, %v8597_v1 }
0x2ed0   :  { %v3903_v7 = vpop.f32.mrb[32].mxu1 }
0x2ed1   :  { %v3984_v12 = vmul.f32 0.35355338, %v3903_v7  ;;  %v7689_v11 = vpop.f32.mrb[33].mxu1 }
0x2ed3   :  { %v3986_v18 = vsel %vm1958_vm15, %v3984_v12, -inf }
0x2ed4   :  { %3987 = vmax.xlane.f32.xlu0 %v3986_v18  ;;  %v3980_v40 = vpop.f32.mrb[34].mxu1 }
0x2ed5   :  { %v3985_v4 = vmul.f32 0.35355338, %v3980_v40  ;;  %v7694_v49 = vpop.f32.mrb[35].mxu1 }
0x2ed7   :  { %v3989_v9 = vsel %vm1958_vm15, %v3985_v4, -inf }
0x2ed8   :  { %3990 = vmax.xlane.f32.xlu1 %v3989_v9 }
0x2ee9   :  { %4008 = vrot.lane.b32.xlu1 %v9499_v44, %s8601_s3 }
0x2eea   :  { %4084 = vrot.lane.b32.xlu0 %v9497_v2, %s8601_s3 }
0x2eed   :  { %4162 = vrot.lane.b32.xlu1 %v9499_v44, %s8604_s2 }
0x2ef1   :  { %4240 = vrot.lane.b32.xlu1 %v9497_v2, %s8604_s2  ;;  %s10439_s2 = smov 104  }
0x2ef5   :  { %4238 = vrot.lane.b32.xlu1 %v9497_v2, %s8605_s23 }
0x2f61   :  { %v3988_v41 = vpop.xlane.xlu0 %3987 }
0x2f62   :  { %v3992_v43 = vsub.f32 %v3984_v12, %v3988_v41 }
0x2f64   :  { %v3994_v63 = vmul.f32 1.442695, %v3992_v43 }
0x2f65   :  { %v4085_v10 = vpop.permute.xlu0 %4084  ;;  %v3991_v48 = vpop.xlane.xlu1 %3990 }
0x2f66   :  { %8495 = vpow2.f32 %v3994_v63  ;;  %v3993_v13 = vsub.f32 %v3985_v4, %v3991_v48  ;;  %7701 = vmatpush3.msra.mxu1 %v4085_v10 }
0x2f67   :  { %7710 = vmatprep.subr.mxu1 %v8597_v1 }
0x2f68   :  { %v3996_v57 = vmul.f32 1.442695, %v3993_v13 }
0x2f69   :  { %v4009_v58 = vpop.permute.xlu1 %4008 }
0x2f6a   :  { %8497 = vpow2.f32 %v3996_v57  ;;  %7696 = vmatpush3.msra.mxu0 %v4009_v58 }
0x2f6b   :  { %7705 = vmatprep.subr.mxu0 %v8597_v1 }
0x2f6d   :  { %v4163_v31 = vpop.permute.xlu1 %4162 }
0x2f70   :  { %v8496_v59 = vpop.eup %8495 }
0x2f71   :  { %v3998_v15 = vsel %vm1958_vm15, %v8496_v59, 0.0  ;;  %v4241_v16 = vpop.permute.xlu1 %4240 }
0x2f72   :  { %3999 = vadd.xlane.f32.xlu0 %v3998_v15 }
0x2f74   :  { %v8498_v51 = vpop.eup %8497 }
0x2f75   :  { %v4001_v61 = vsel %vm1958_vm15, %v8498_v51, 0.0  ;;  %v4239_v3 = vpop.permute.xlu1 %4238 }
0x2f76   :  { %4002 = vadd.xlane.f32.xlu0 %v4001_v61 }
0x2f8c   :  { %4160 = vrot.lane.b32.xlu0 %v9499_v44, %s8605_s23  ;;  %s10440_s23 = smov 40  }
0x2fff   :  { %v4000_v62 = vpop.xlane.xlu0 %3999 }
0x3000   :  { %8499 = vrcp.f32 %v4000_v62 }
0x3003   :  { %v4003_v55 = vpop.xlane.xlu0 %4002 }
0x3004   :  { %8501 = vrcp.f32 %v4003_v55 }
0x3007   :  { %v4161_v52 = vpop.permute.xlu0 %4160 }
0x300a   :  { %v8500_v37 = vpop.eup %8499 }
0x300b   :  { %v4006_v5 = vmul.f32 %v8500_v37, %v8496_v59 }
0x300d   :  { %7698 = vmatmul.mubr.msk.f32.vlgmr.msra.gmra.mrb[32].mxu0 %vm1958_vm15, %v4006_v5 }
0x300e   :  { %v8502_v8 = vpop.eup %8501  ;;  %7706 = vmatpush3.xpose.msk.msra.mxu0 %vm1958_vm15, %v4163_v31  ;;  %7707 = vmatprep.mubr.msk.f32.mxu0 %vm10424_vm14, %v8597_v1 }
0x300f   :  { %v4007_v17 = vmul.f32 %v8502_v8, %v8498_v51  ;;  %7715 = vmatprep.subr.mxu0 %v8597_v1 }
0x3011   :  { %7703 = vmatmul.mubr.msk.f32.vlgmr.msra.gmra.mrb[36].mxu1 %vm1958_vm15, %v4007_v17  ;;  %7708 = vmatmul.mubr.msk.f32.vlgmr.msra.gmra.mrb[34].mxu0 %vm1958_vm15, %v4161_v52 }
0x3012   :  { %7711 = vmatpush3.xpose.msk.msra.mxu1 %vm1958_vm15, %v4241_v16  ;;  %7712 = vmatprep.mubr.msk.f32.mxu1 %vm10424_vm14, %v8597_v1 }
0x3013   :  { %7720 = vmatprep.subr.mxu1 %v8597_v1  ;;  %7717 = vmatprep.mubr.msk.f32.mxu0 %vm10424_vm14, %v8597_v1 }
0x3015   :  { %7713 = vmatmul.mubr.msk.f32.vlgmr.msra.gmra.mrb[38].mxu1 %vm1958_vm15, %v4239_v3 }
0x3016   :  { %7722 = vmatprep.mubr.msk.f32.mxu1 %vm10424_vm14, %v8597_v1 }
0x30e0   :  { %v9551_v14 = vpop.f32.mrb[32].mxu0 }
0x30e1   :  { %v7699_v29 = vpop.f32.mrb[33].mxu0 }
0x30e4   :  { %v9553_v22 = vpop.f32.mrb[36].mxu1  ;;  %v4234_v25 = vpop.f32.mrb[34].mxu0 }
0x30e5   :  { %v4316_v21 = vmul.f32 0.35355338, %v4234_v25  ;;  %v7704_v32 = vpop.f32.mrb[37].mxu1  ;;  %v7709_v33 = vpop.f32.mrb[35].mxu0 }
0x30e7   :  { %v4318_v38 = vsel %vm1958_vm15, %v4316_v21, -inf }
0x30e8   :  { %4319 = vmax.xlane.f32.xlu0 %v4318_v38  ;;  %v4312_v27 = vpop.f32.mrb[38].mxu1 }
0x30e9   :  { %v4317_v28 = vmul.f32 0.35355338, %v4312_v27  ;;  %v7714_v30 = vpop.f32.mrb[39].mxu1 }
0x30eb   :  { %v4321_v56 = vsel %vm1958_vm15, %v4317_v28, -inf }
0x30ec   :  { %4322 = vmax.xlane.f32.xlu1 %v4321_v56 }
0x30fd   :  { %4340 = vrot.lane.b32.xlu1 %v9499_v44, %s8606_s5 }
0x30fe   :  { %4416 = vrot.lane.b32.xlu0 %v9497_v2, %s8606_s5  ;;  %s10441_s5 = smov 8  }
0x3101   :  { %4494 = vrot.lane.b32.xlu1 %v9499_v44, %s8607_s6 }
0x3105   :  { %4572 = vrot.lane.b32.xlu1 %v9497_v2, %s8607_s6  ;;  %s10442_s6 = smov 16  }
0x3109   :  { %4570 = vrot.lane.b32.xlu1 %v9497_v2, %s8608_s24 }
0x3175   :  { %v4320_v6 = vpop.xlane.xlu0 %4319 }
0x3176   :  { %v4324_v53 = vsub.f32 %v4316_v21, %v4320_v6 }
0x3178   :  { %v4326_v60 = vmul.f32 1.442695, %v4324_v53 }
0x3179   :  { %v4417_v47 = vpop.permute.xlu0 %4416  ;;  %v4323_v36 = vpop.xlane.xlu1 %4322 }
0x317a   :  { %8503 = vpow2.f32 %v4326_v60  ;;  %v4325_v34 = vsub.f32 %v4317_v28, %v4323_v36  ;;  %7721 = vmatpush3.msra.mxu1 %v4417_v47 }
0x317b   :  { %7730 = vmatprep.subr.mxu1 %v8597_v1 }
0x317c   :  { %v4328_v7 = vmul.f32 1.442695, %v4325_v34 }
0x317d   :  { %v4341_v12 = vpop.permute.xlu1 %4340 }
0x317e   :  { %8505 = vpow2.f32 %v4328_v7  ;;  %7716 = vmatpush3.msra.mxu0 %v4341_v12 }
0x317f   :  { %7725 = vmatprep.subr.mxu0 %v8597_v1 }
0x3181   :  { %v4495_v41 = vpop.permute.xlu1 %4494 }
0x3184   :  { %v8504_v11 = vpop.eup %8503 }
0x3185   :  { %v4330_v18 = vsel %vm1958_vm15, %v8504_v11, 0.0  ;;  %v4573_v48 = vpop.permute.xlu1 %4572 }
0x3186   :  { %4331 = vadd.xlane.f32.xlu0 %v4330_v18 }
0x3188   :  { %v8506_v40 = vpop.eup %8505 }
0x3189   :  { %v4333_v4 = vsel %vm1958_vm15, %v8506_v40, 0.0  ;;  %v4571_v58 = vpop.permute.xlu1 %4570 }
0x318a   :  { %4334 = vadd.xlane.f32.xlu0 %v4333_v4 }
0x31a0   :  { %4492 = vrot.lane.b32.xlu0 %v9499_v44, %s8608_s24 }
0x3213   :  { %v4332_v49 = vpop.xlane.xlu0 %4331 }
0x3214   :  { %8507 = vrcp.f32 %v4332_v49 }
0x3217   :  { %v4335_v9 = vpop.xlane.xlu0 %4334 }
0x3218   :  { %8509 = vrcp.f32 %v4335_v9 }
0x321b   :  { %v4493_v57 = vpop.permute.xlu0 %4492 }
0x321e   :  { %v8508_v43 = vpop.eup %8507 }
0x321f   :  { %v4338_v63 = vmul.f32 %v8508_v43, %v8504_v11 }
0x3221   :  { %7718 = vmatmul.mubr.msk.f32.vlgmr.msra.gmra.mrb[36].mxu0 %vm1958_vm15, %v4338_v63 }
0x3222   :  { %v8510_v10 = vpop.eup %8509  ;;  %7726 = vmatpush3.xpose.msk.msra.mxu0 %vm1958_vm15, %v4495_v41  ;;  %7727 = vmatprep.mubr.msk.f32.mxu0 %vm10424_vm14, %v8597_v1 }
0x3223   :  { %v4339_v13 = vmul.f32 %v8510_v10, %v8506_v40  ;;  %7735 = vmatprep.subr.mxu0 %v8597_v1 }
0x3225   :  { %7723 = vmatmul.mubr.msk.f32.vlgmr.msra.gmra.mrb[40].mxu1 %vm1958_vm15, %v4339_v13  ;;  %7728 = vmatmul.mubr.msk.f32.vlgmr.msra.gmra.mrb[38].mxu0 %vm1958_vm15, %v4493_v57 }
0x3226   :  { %7731 = vmatpush3.xpose.msk.msra.mxu1 %vm1958_vm15, %v4573_v48  ;;  %7732 = vmatprep.mubr.msk.f32.mxu1 %vm10424_vm14, %v8597_v1 }
0x3227   :  { %7740 = vmatprep.subr.mxu1 %v8597_v1  ;;  %7737 = vmatprep.mubr.msk.f32.mxu0 %vm10424_vm14, %v8597_v1 }
0x3229   :  { %7733 = vmatmul.mubr.msk.f32.vlgmr.msra.gmra.mrb[42].mxu1 %vm1958_vm15, %v4571_v58 }
0x322a   :  { %7742 = vmatprep.mubr.msk.f32.mxu1 %vm10424_vm14, %v8597_v1 }
0x32f4   :  { %v9589_v59 = vpop.f32.mrb[36].mxu0 }
0x32f5   :  { %v7719_v15 = vpop.f32.mrb[37].mxu0 }
0x32f8   :  { %v9591_v51 = vpop.f32.mrb[40].mxu1  ;;  %v4566_v61 = vpop.f32.mrb[38].mxu0 }
0x32f9   :  { %v4648_v62 = vmul.f32 0.35355338, %v4566_v61  ;;  %v7724_v55 = vpop.f32.mrb[41].mxu1  ;;  %v7729_v31 = vpop.f32.mrb[39].mxu0 }
0x32fb   :  { %v4650_v37 = vsel %vm1958_vm15, %v4648_v62, -inf }
0x32fc   :  { %4651 = vmax.xlane.f32.xlu0 %v4650_v37  ;;  %v4644_v5 = vpop.f32.mrb[42].mxu1 }
0x32fd   :  { %v4649_v8 = vmul.f32 0.35355338, %v4644_v5  ;;  %v7734_v16 = vpop.f32.mrb[43].mxu1 }
0x32ff   :  { %v4653_v17 = vsel %vm1958_vm15, %v4649_v8, -inf }
0x3300   :  { %4654 = vmax.xlane.f32.xlu1 %v4653_v17 }
0x3311   :  { %4672 = vrot.lane.b32.xlu1 %v9499_v44, %s8609_s25 }
0x3312   :  { %4748 = vrot.lane.b32.xlu0 %v9497_v2, %s8609_s25 }
0x3315   :  { %4826 = vrot.lane.b32.xlu1 %v9499_v44, %s10438_s7 }
0x3319   :  { %4904 = vrot.lane.b32.xlu1 %v9497_v2, %s10438_s7 }
0x331d   :  { %4902 = vrot.lane.b32.xlu1 %v9497_v2, %s10439_s2 }
0x3389   :  { %v4652_v52 = vpop.xlane.xlu0 %4651 }
0x338a   :  { %v4656_v3 = vsub.f32 %v4648_v62, %v4652_v52 }
0x338c   :  { %v4658_v29 = vmul.f32 1.442695, %v4656_v3 }
0x338d   :  { %v4749_v25 = vpop.permute.xlu0 %4748  ;;  %v4655_v21 = vpop.xlane.xlu1 %4654 }
0x338e   :  { %8511 = vpow2.f32 %v4658_v29  ;;  %v4657_v32 = vsub.f32 %v4649_v8, %v4655_v21  ;;  %7741 = vmatpush3.msra.mxu1 %v4749_v25 }
0x338f   :  { %7750 = vmatprep.subr.mxu1 %v8597_v1 }
0x3390   :  { %v4660_v33 = vmul.f32 1.442695, %v4657_v32  ;;  %v7006_v32 = vld [vmem:[%s10383_s8 + $0x28] sm:$0xff] }
0x3391   :  { %v4673_v38 = vpop.permute.xlu1 %4672 }
0x3392   :  { %8513 = vpow2.f32 %v4660_v33  ;;  %7736 = vmatpush3.msra.mxu0 %v4673_v38  ;;  %v7007_v38 = vld [vmem:[%s10383_s8 + $0x30] sm:$0xff] }
0x3393   :  { %7745 = vmatprep.subr.mxu0 %v8597_v1 }
0x3395   :  { %v4827_v60 = vpop.permute.xlu1 %4826 }
0x3398   :  { %v8512_v27 = vpop.eup %8511 }
0x3399   :  { %v4662_v28 = vsel %vm1958_vm15, %v8512_v27, 0.0  ;;  %v4905_v7 = vpop.permute.xlu1 %4904 }
0x339a   :  { %4663 = vadd.xlane.f32.xlu0 %v4662_v28 }
0x339c   :  { %v8514_v30 = vpop.eup %8513 }
0x339d   :  { %v4665_v56 = vsel %vm1958_vm15, %v8514_v30, 0.0  ;;  %v4903_v18 = vpop.permute.xlu1 %4902 }
0x339e   :  { %4666 = vadd.xlane.f32.xlu0 %v4665_v56 }
0x33b4   :  { %4824 = vrot.lane.b32.xlu0 %v9499_v44, %s10439_s2 }
0x3427   :  { %v4664_v6 = vpop.xlane.xlu0 %4663 }
0x3428   :  { %8515 = vrcp.f32 %v4664_v6 }
0x342b   :  { %v4667_v53 = vpop.xlane.xlu0 %4666 }
0x342c   :  { %8517 = vrcp.f32 %v4667_v53 }
0x342f   :  { %v4825_v11 = vpop.permute.xlu0 %4824 }
0x3432   :  { %v8516_v47 = vpop.eup %8515 }
0x3433   :  { %v4670_v36 = vmul.f32 %v8516_v47, %v8512_v27  ;;  %v7008_v27 = vld [vmem:[%s10383_s8 + $0x38] sm:$0xff] }
0x3434   :  { %v8068_v28 = vpack.c.bf16 %v7008_v27, %v7007_v38 }
0x3435   :  { %7738 = vmatmul.mubr.msk.f32.vlgmr.msra.gmra.mrb[40].mxu0 %vm1958_vm15, %v4670_v36 }
0x3436   :  { %v8518_v34 = vpop.eup %8517  ;;  %7746 = vmatpush3.xpose.msk.msra.mxu0 %vm1958_vm15, %v4827_v60  ;;  %7747 = vmatprep.mubr.msk.f32.mxu0 %vm10424_vm14, %v8597_v1 }
0x3437   :  { %v4671_v12 = vmul.f32 %v8518_v34, %v8514_v30  ;;  %7755 = vmatprep.subr.mxu0 %v8597_v1 }
0x3439   :  { %7743 = vmatmul.mubr.msk.f32.vlgmr.msra.gmra.mrb[44].mxu1 %vm1958_vm15, %v4671_v12  ;;  %7748 = vmatmul.mubr.msk.f32.vlgmr.msra.gmra.mrb[42].mxu0 %vm1958_vm15, %v4825_v11 }
0x343a   :  { %7751 = vmatpush3.xpose.msk.msra.mxu1 %vm1958_vm15, %v4905_v7  ;;  %7752 = vmatprep.mubr.msk.f32.mxu1 %vm10424_vm14, %v8597_v1 }
0x343b   :  { %7760 = vmatprep.subr.mxu1 %v8597_v1  ;;  %7757 = vmatprep.mubr.msk.f32.mxu0 %vm10424_vm14, %v8597_v1 }
0x343d   :  { %7753 = vmatmul.mubr.msk.f32.vlgmr.msra.gmra.mrb[46].mxu1 %vm1958_vm15, %v4903_v18 }
0x343e   :  { %7762 = vmatprep.mubr.msk.f32.mxu1 %vm10424_vm14, %v8597_v1  ;;  %vm10444_vm14 = vmmov %vm10425_vm0 }
0x3508   :  { %v4744_v40 = vpop.f32.mrb[40].mxu0 }
0x3509   :  { %v7739_v4 = vpop.f32.mrb[41].mxu0 }
0x350c   :  { %v4820_v49 = vpop.f32.mrb[44].mxu1  ;;  %v4898_v9 = vpop.f32.mrb[42].mxu0 }
0x350d   :  { %v4980_v41 = vmul.f32 0.35355338, %v4898_v9  ;;  %v7744_v43 = vpop.f32.mrb[45].mxu1  ;;  %v7749_v63 = vpop.f32.mrb[43].mxu0 }
0x350f   :  { %v4982_v10 = vsel %vm1958_vm15, %v4980_v41, -inf }
0x3510   :  { %4983 = vmax.xlane.f32.xlu0 %v4982_v10  ;;  %v4976_v48 = vpop.f32.mrb[46].mxu1 }
0x3511   :  { %v4981_v13 = vmul.f32 0.35355338, %v4976_v48  ;;  %v7754_v57 = vpop.f32.mrb[47].mxu1 }
0x3513   :  { %v4985_v58 = vsel %vm1958_vm15, %v4981_v13, -inf }
0x3514   :  { %4986 = vmax.xlane.f32.xlu1 %v4985_v58 }
0x3525   :  { %5004 = vrot.lane.b32.xlu1 %v9499_v44, %s10440_s23 }
0x3529   :  { %5158 = vrot.lane.b32.xlu1 %v9589_v59, %s10441_s5 }
0x352d   :  { %5160 = vrot.lane.b32.xlu1 %v9591_v51, %s10441_s5 }
0x3531   :  { %5168 = vrot.lane.b32.xlu1 %v4820_v49, %s10442_s6 }
0x359d   :  { %v4984_v15 = vpop.xlane.xlu0 %4983 }
0x359e   :  { %v4988_v61 = vsub.f32 %v4980_v41, %v4984_v15 }
0x35a0   :  { %v4990_v62 = vmul.f32 1.442695, %v4988_v61 }
0x35a1   :  { %v4987_v55 = vpop.xlane.xlu1 %4986 }
0x35a2   :  { %8519 = vpow2.f32 %v4990_v62  ;;  %v4989_v31 = vsub.f32 %v4981_v13, %v4987_v55 }
0x35a4   :  { %v4992_v37 = vmul.f32 1.442695, %v4989_v31 }
0x35a5   :  { %v5005_v5 = vpop.permute.xlu1 %5004 }
0x35a6   :  { %8521 = vpow2.f32 %v4992_v37  ;;  %7756 = vmatpush3.msra.mxu0 %v5005_v5 }
0x35a9   :  { %v5159_v60 = vpop.permute.xlu1 %5158 }
0x35aa   :  { %v5180_v34 = vsel %vm1958_vm15, %v9551_v14, %v5159_v60  ;;  %v5194_v14 = vrot.slane %v9395_v45, %v3320_v24  ;;  %v7020_v60 = vld [vmem:[%s10385_s10 + $0x58] sm:$0xff] }
0x35ac   :  { %v8520_v8 = vpop.eup %8519 }
0x35ad   :  { %v4994_v44 = vsel %vm1958_vm15, %v8520_v8, 0.0  ;;  %v5161_v47 = vpop.permute.xlu1 %5160 }
0x35ae   :  { %4995 = vadd.xlane.f32.xlu0 %v4994_v44 }
0x35b0   :  { %v8522_v59 = vpop.eup %8521 }
0x35b1   :  { %v4997_v16 = vsel %vm1958_vm15, %v8522_v59, 0.0  ;;  %v5169_v7 = vpop.permute.xlu1 %5168 }
0x35b2   :  { %4998 = vadd.xlane.f32.xlu0 %v4997_v16 }
0x35c8   :  { %5080 = vrot.lane.b32.xlu0 %v9497_v2, %s10440_s23  ;;  %v7005_v2 = vld [vmem:[%s10383_s8 + $0x20] sm:$0xff] }
0x35c9   :  { %v8064_v33 = vpack.c.bf16 %v7006_v32, %v7005_v2  ;;  %v7014_v2 = vld [vmem:[%s10384_s9 + $0x38] sm:$0xff] }
0x35cb   :  { %8065 = vmatprep.subr.bf16.mxu0 %v8064_v33 }
0x35cc   :  { %5166 = vrot.lane.b32.xlu0 %v4744_v40, %s10442_s6  ;;  %v5181_v40 = vsel %vm1958_vm15, %v9553_v22, %v5161_v47 }
0x35cd   :  { %v5183_v4 = vsel %vm3308_vm1, %v5181_v40, %v5169_v7 }
0x363b   :  { %v4996_v51 = vpop.xlane.xlu0 %4995 }
0x363c   :  { %8523 = vrcp.f32 %v4996_v51 }
0x363f   :  { %v4999_v17 = vpop.xlane.xlu0 %4998 }
0x3640   :  { %8525 = vrcp.f32 %v4999_v17  ;;  %v9685_v17 = vld [vmem:[%s10387_s12 + $0x10] sm:$0x3f] }
0x3643   :  { %v5081_v52 = vpop.permute.xlu0 %5080 }
0x3644   :  { %7761 = vmatpush3.msra.mxu1 %v5081_v52  ;;  %v5341_v52 = vrot.slane %v9685_v17, %v8787_v26  ;;  %v7013_v26 = vld [vmem:[%s10384_s9 + $0x30] sm:$0xff] }
0x3646   :  { %v8524_v3 = vpop.eup %8523 }
0x3647   :  { %v5002_v29 = vmul.f32 %v8524_v3, %v8520_v8  ;;  %v5167_v36 = vpop.permute.xlu0 %5166  ;;  %v5331_v3 = vrot.slane %v9395_v45, %v3457_v46  ;;  %v8076_v45 = vpack.c.bf16 %v7014_v2, %v7013_v26 }
0x3648   :  { %v5182_v12 = vsel %vm3308_vm1, %v5180_v34, %v5167_v36  ;;  %vm10447_vm1 = vmmov %vm10425_vm0  ;;  %v7021_v36 = vld [vmem:[%s10385_s10 + $0x60] sm:$0xff]  ;;  %v7022_v34 = vld [vmem:[%s10385_s10 + $0x68] sm:$0xff] }
0x3649   :  { %7758 = vmatmul.mubr.msk.f32.vlgmr.msra.gmra.mrb[44].mxu0 %vm1958_vm15, %v5002_v29  ;;  %v7011_v29 = vld [vmem:[%s10384_s9 + $0x20] sm:$0xff]  ;;  %v8088_v40 = vpack.c.bf16 %v7022_v34, %v7021_v36  ;;  %v5662_v36 = vld [vmem:[%s10386_s11 + $0x8] sm:$0xff]  ;;  %v5679_v34 = vld [vmem:[%s10386_s11 + $0x90] sm:$0xff] }
0x364a   :  { %v8526_v25 = vpop.eup %8525  ;;  %8067 = vmatpush3.bf16.msra.mxu0 %v8064_v33 }
0x364b   :  { %v5003_v21 = vmul.f32 %v8526_v25, %v8522_v59  ;;  %8069 = vmatprep.subr.bf16.mxu0 %v8068_v28  ;;  %v7012_v25 = vld [vmem:[%s10384_s9 + $0x28] sm:$0xff] }
0x364d   :  { %7763 = vmatmul.mubr.msk.f32.vlgmr.msra.gmra.mrb[48].mxu1 %vm1958_vm15, %v5003_v21  ;;  %vm10446_vm15 = vmmov %vm10425_vm0  ;;  %v8072_v21 = vpack.c.bf16 %v7012_v25, %v7011_v29 }
0x364e   :  { %8071 = vmatpush3.bf16.msra.mxu0 %v8068_v28 }
0x364f   :  { %8073 = vmatprep.subr.bf16.mxu1 %v8072_v21 }
0x3650   :  { %8075 = vmatpush3.bf16.msra.mxu1 %v8072_v21 }
0x3651   :  { %8077 = vmatprep.subr.bf16.mxu1 %v8076_v45 }
0x3654   :  { %8079 = vmatpush3.bf16.msra.mxu1 %v8076_v45 }
0x371c   :  { %v5076_v30 = vpop.f32.mrb[44].mxu0 }
0x371d   :  { %5174 = vrot.lane.b32.xlu0 %v5076_v30, %s10443_s19  ;;  %v7759_v56 = vpop.f32.mrb[45].mxu0  ;;  %v7017_v30 = vld [vmem:[%s10385_s10 + $0x40] sm:$0xff] }
0x371e   :  { %v7018_v56 = vld [vmem:[%s10385_s10 + $0x48] sm:$0xff] }
0x3720   :  { %v5152_v6 = vpop.f32.mrb[48].mxu1 }
0x3721   :  { %5176 = vrot.lane.b32.xlu1 %v5152_v6, %s10443_s19  ;;  %v7764_v53 = vpop.f32.mrb[49].mxu1  ;;  %v7019_v6 = vld [vmem:[%s10385_s10 + $0x50] sm:$0xff] }
0x3722   :  { %v8080_v53 = vpack.c.bf16 %v7018_v56, %v7017_v30  ;;  %v8084_v47 = vpack.c.bf16 %v7020_v60, %v7019_v6  ;;  %v5593_v30 = vrot.slane %v9685_v17, %v9125_v42  ;;  %v5769_v56 = vld [vmem:[%s10388_s13] sm:$0xff]  ;;  %v9770_v6 = vld [vmem:[%s10388_s13 + $0x8] sm:$0xff] }
0x3723   :  { %v5677_v42 = vld [vmem:[%s10386_s11 + $0x80] sm:$0xff] }
0x3724   :  { %8081 = vmatprep.subr.bf16.mxu0 %v8080_v53  ;;  %v5661_v60 = vld [vmem:[%s10386_s11] sm:$0xff] }
0x378f   :  { %v5175_v11 = vpop.permute.xlu0 %5174 }
0x3790   :  { %v5184_v18 = vsel %vm3311_vm4, %v5182_v12, %v5175_v11 }
0x3791   :  { %7773 = vmatprep.mubr.msk.f32.mxu0 %vm10444_vm14, %v5184_v18  ;;  %vm10458_vm14 = vmmov %vm10425_vm0 }
0x3793   :  { %v5177_v49 = vpop.permute.xlu1 %5176 }
0x3794   :  { %v5185_v9 = vsel %vm3311_vm4, %v5183_v4, %v5177_v49  ;;  %vm10448_vm4 = vmmov %vm10425_vm0 }
0x3795   :  { %7774 = vmatmul.mubr.msk.f32.vlgmr.msra.gmra.mrb[46].mxu0 %vm10445_vm7, %v5185_v9  ;;  %vm10460_vm7 = vmmov %vm10425_vm0 }
0x3796   :  { %8083 = vmatpush3.bf16.msra.mxu0 %v8080_v53  ;;  %v8128_v53 = vpack.c.bf16 %v9770_v6, %v5769_v56 }
0x3797   :  { %8085 = vmatprep.subr.bf16.mxu0 %v8084_v47 }
0x379a   :  { %8087 = vmatpush3.bf16.msra.mxu0 %v8084_v47 }
0x379b   :  { %8089 = vmatprep.subr.bf16.mxu0 %v8088_v40 }
0x379e   :  { %8091 = vmatpush3.bf16.msra.mxu0 %v8088_v40  ;;  %v5664_v40 = vld [vmem:[%s10386_s11 + $0x18] sm:$0xff] }
0x3868   :  { %v7775_v41 = vpop.f32.mrb[46].mxu0 }
0x3869   :  { %v5273_v43 = vadd.f32 %v7775_v41, %v5194_v14  ;;  %v5267_v63 = vpop.f32.mrb[47].mxu0 }
0x386a   :  { %v5268_v10 = vadd.f32 %v5267_v63, %v5194_v14 }
0x386b   :  { %5280 = vrot.lane.b32.xlu1 %v5273_v43, %s8603_s29 }
0x386c   :  { %5278 = vrot.lane.b32.xlu0 %v5268_v10, %s8603_s29 }
0x38dd   :  { %v5281_v22 = vpop.permute.xlu1 %5280 }
0x38de   :  { %v5285_v48 = vadd.f32 %v5281_v22, %v9483_v35  ;;  %v5279_v13 = vpop.permute.xlu0 %5278  ;;  %v7023_v22 = vld [vmem:[%s10385_s10 + $0x70] sm:$0xff] }
0x38df   :  { %v5284_v57 = vadd.f32 %v5279_v13, %v9485_v39 }
0x38e0   :  { %5290 = vrot.lane.b32.xlu1 %v5285_v48, %s8602_s26 }
0x38e1   :  { %5288 = vrot.lane.b32.xlu0 %v5284_v57, %s8602_s26 }
0x3952   :  { %v5291_v58 = vpop.permute.xlu1 %5290 }
0x3953   :  { %v5297_v24 = vsel %vm10446_vm15, %v5291_v58, 0.0  ;;  %v5289_v15 = vpop.permute.xlu0 %5288  ;;  %vm10461_vm15 = vmmov %vm10425_vm0 }
0x3954   :  { %v5294_v61 = vsel %vm10447_vm1, %v5289_v15, 0.0  ;;  %5298 = vadd.xlane.f32.xlu1 %v5297_v24  ;;  %vm10462_vm1 = vmmov %vm10425_vm0 }
0x3955   :  { %5295 = vadd.xlane.f32.xlu0 %v5294_v61 }
0x39e1   :  { %v5299_v62 = vpop.xlane.xlu1 %5298 }
0x39e2   :  { %v5301_v55 = vmul.f32 0.03125, %v5299_v62  ;;  %v5296_v31 = vpop.xlane.xlu0 %5295 }
0x39e3   :  { %v5300_v37 = vmul.f32 0.03125, %v5296_v31  ;;  %v5456_v31 = vrot.slane %v9685_v17, %v8806_v50 }
0x39e4   :  { %v5303_v35 = vsub.f32 %v5285_v48, %v5301_v55  ;;  %v7024_v48 = vld [vmem:[%s10385_s10 + $0x78] sm:$0xff] }
0x39e5   :  { %v5302_v5 = vsub.f32 %v5284_v57, %v5300_v37  ;;  %v8092_v13 = vpack.c.bf16 %v7024_v48, %v7023_v22  ;;  %v5356_v57 = vrot.slane %v9685_v17, %v8781_v23  ;;  %v5666_v22 = vld [vmem:[%s10386_s11 + $0x28] sm:$0xff]  ;;  %v5683_v48 = vld [vmem:[%s10386_s11 + $0xb0] sm:$0xff] }
0x39e6   :  { %v5305_v8 = vmul.f32 %v5303_v35, %v5303_v35 }
0x39e7   :  { %v5304_v39 = vmul.f32 %v5302_v5, %v5302_v5  ;;  %8093 = vmatprep.subr.bf16.mxu0 %v8092_v13 }
0x39e8   :  { %5310 = vrot.lane.b32.xlu1 %v5305_v8, %s8602_s26  ;;  %8095 = vmatpush3.bf16.msra.mxu0 %v8092_v13  ;;  %v5684_v13 = vld [vmem:[%s10386_s11 + $0xb8] sm:$0xff] }
0x39e9   :  { %5308 = vrot.lane.b32.xlu0 %v5304_v39, %s8602_s26  ;;  %8130 = vmatprep.subr.msk.bf16.mxu0 %vm9774_vm5, %v8128_v53 }
0x3a5a   :  { %v5311_v44 = vpop.permute.xlu1 %5310 }
0x3a5b   :  { %v5317_v59 = vsel %vm10448_vm4, %v5311_v44, 0.0  ;;  %v5309_v16 = vpop.permute.xlu0 %5308  ;;  %vm10463_vm4 = vmmov %vm10425_vm0 }
0x3a5c   :  { %v5314_v51 = vsel %vm10449_vm8, %v5309_v16, 0.0  ;;  %5318 = vadd.xlane.f32.xlu1 %v5317_v59  ;;  %vm10464_vm8 = vmmov %vm10425_vm0 }
0x3a5d   :  { %5315 = vadd.xlane.f32.xlu0 %v5314_v51 }
0x3a6d   :  { %5343 = vrot.lane.b32.xlu1 %v5341_v52, %s8603_s29 }
0x3a73   :  { %5333 = vrot.lane.b32.xlu0 %v5331_v3, %s8603_s29 }
0x3ae9   :  { %v5319_v46 = vpop.xlane.xlu1 %5318 }
0x3aea   :  { %v5321_v32 = vmul.f32 0.03125, %v5319_v46  ;;  %v5316_v33 = vpop.xlane.xlu0 %5315 }
0x3aeb   :  { %v5320_v38 = vmul.f32 0.03125, %v5316_v33 }
0x3aec   :  { %v5323_v27 = vadd.f32 1e-05, %v5321_v32 }
0x3aed   :  { %v5322_v28 = vadd.f32 1e-05, %v5320_v38  ;;  %v5344_v49 = vpop.permute.xlu1 %5343 }
0x3aee   :  { %8527 = vrsqrt.f32 %v5323_v27  ;;  %v5334_v12 = vpop.permute.xlu0 %5333 }
0x3aef   :  { %8529 = vrsqrt.f32 %v5322_v28  ;;  %v5603_v28 = vrot.slane %v9685_v17, %v9122_v54  ;;  %v5678_v17 = vld [vmem:[%s10386_s11 + $0x88] sm:$0xff]  ;;  %v5980_v54 = vadd.s32 8, %v8778_v20 }
0x3af0   :  { %v8096_v47 = vpack.c.bf16 %v5678_v17, %v5677_v42 }
0x3af2   :  { %8097 = vmatprep.subr.bf16.mxu1 %v8096_v47 }
0x3af8   :  { %v8528_v7 = vpop.eup %8527 }
0x3af9   :  { %v8530_v11 = vpop.eup %8529  ;;  %v5327_v18 = vmul.f32 %v8528_v7, %v5303_v35  ;;  %v5680_v7 = vld [vmem:[%s10386_s11 + $0x98] sm:$0xff] }
0x3afa   :  { %v5326_v4 = vmul.f32 %v8530_v11, %v5302_v5  ;;  %v8100_v11 = vpack.c.bf16 %v5680_v7, %v5679_v34 }
0x3afb   :  { %v5337_v9 = vmul.f32 %v5334_v12, %v5327_v18  ;;  %v5663_v18 = vld [vmem:[%s10386_s11 + $0x10] sm:$0xff] }
0x3afc   :  { %v5336_v14 = vmul.f32 %v5334_v12, %v5326_v4  ;;  %v8098_v12 = vpack.c.bf16 %v5662_v36, %v5661_v60  ;;  %v9809_v4 = vld [vmem:[%s10388_s13 + $0x10] sm:$0xff] }
0x3afd   :  { %v5347_v41 = vadd.f32 %v5344_v49, %v5337_v9  ;;  %v5681_v9 = vld [vmem:[%s10386_s11 + $0xa0] sm:$0xff] }
0x3afe   :  { %v5346_v43 = vadd.f32 %v5344_v49, %v5336_v14  ;;  %v9816_v49 = vld [vmem:[%s10388_s13 + $0x18] sm:$0xff]  ;;  %v5682_v14 = vld [vmem:[%s10386_s11 + $0xa8] sm:$0xff] }
0x3aff   :  { %5361 = vrot.lane.b32.xlu1 %v5347_v41, %s8602_s26 }
0x3b00   :  { %5359 = vrot.lane.b32.xlu0 %v5346_v43, %s8602_s26 }
0x3b71   :  { %v5362_v10 = vpop.permute.xlu1 %5361 }
0x3b72   :  { %v5360_v63 = vpop.permute.xlu0 %5359 }
0x3b73   :  { %7784 = vmatprep.mubr.msk.f32.mxu1 %vm10450_vm9, %v5360_v63  ;;  %v8104_v63 = vpack.c.bf16 %v5682_v14, %v5681_v9  ;;  %v5676_v9 = vld [vmem:[%s10386_s11 + $0x78] sm:$0xff]  ;;  %v9933_v14 = vld [vmem:[%s10388_s13 + $0x40] sm:$0xff]  ;;  %vm10465_vm9 = vmmov %vm10425_vm0 }
0x3b74   :  { %7785 = vmatmul.mubr.msk.f32.vlgmr.msra.gmra.mrb[50].mxu1 %vm10451_vm10, %v5362_v10  ;;  %v5665_v10 = vld [vmem:[%s10386_s11 + $0x20] sm:$0xff]  ;;  %vm10466_vm10 = vmmov %vm10425_vm0 }
0x3b75   :  { %8099 = vmatpush3.bf16.msra.mxu1 %v8098_v12 }
0x3b76   :  { %8101 = vmatprep.subr.bf16.mxu1 %v8100_v11 }
0x3c47   :  { %v7786_v58 = vpop.f32.mrb[50].mxu1 }
0x3c48   :  { %v5439_v24 = vadd.f32 %v7786_v58, %v5356_v57  ;;  %v5433_v15 = vpop.f32.mrb[51].mxu1  ;;  %v9848_v58 = vld [vmem:[%s10388_s13 + $0x28] sm:$0xff] }
0x3c49   :  { %v5434_v61 = vadd.f32 %v5433_v15, %v5356_v57  ;;  %v9843_v57 = vld [vmem:[%s10388_s13 + $0x20] sm:$0xff] }
0x3c4a   :  { %v5443_v55 = vmax.f32 %v5439_v24, 0.0  ;;  %v8106_v24 = vpack.c.bf16 %v5666_v22, %v5665_v10  ;;  %v8140_v15 = vpack.c.bf16 %v9848_v58, %v9843_v57 }
0x3c4b   :  { %v5442_v62 = vmax.f32 %v5434_v61, 0.0  ;;  %v8108_v61 = vpack.c.bf16 %v5684_v13, %v5683_v48 }
0x3c4d   :  { %7803 = vmatprep.mubr.msk.f32.mxu0 %vm3582_vm11, %v5442_v62  ;;  %v5667_v62 = vld [vmem:[%s10386_s11 + $0x30] sm:$0xff] }
0x3c4e   :  { %7804 = vmatmul.mubr.msk.f32.vlgmr.msra.gmra.mrb[48].mxu0 %vm3582_vm11, %v5443_v55  ;;  %v5668_v55 = vld [vmem:[%s10386_s11 + $0x38] sm:$0xff] }
0x3c4f   :  { %7838 = vmatprep.mubr.msk.f32.mxu0 %vm10458_vm14, %v5769_v56  ;;  %8133 = vmatpush3.bf16.xpose.msk.msra.mxu0 %vm9774_vm5, %v8128_v53  ;;  %vm10471_vm14 = vmmov %vm10425_vm0 }
0x3d21   :  { %v7805_v37 = vpop.f32.mrb[48].mxu0 }
0x3d22   :  { %v5535_v35 = vadd.f32 %v7805_v37, %v5456_v31  ;;  %v5529_v5 = vpop.f32.mrb[49].mxu0  ;;  %v5686_v37 = vld [vmem:[%s10386_s11 + $0xc8] sm:$0xff] }
0x3d23   :  { %v5530_v8 = vadd.f32 %v5529_v5, %v5456_v31  ;;  %v5685_v31 = vld [vmem:[%s10386_s11 + $0xc0] sm:$0xff] }
0x3d24   :  { %5542 = vrot.lane.b32.xlu1 %v5535_v35, %s8603_s29  ;;  %v8110_v35 = vpack.c.bf16 %v5668_v55, %v5667_v62  ;;  %v5669_v5 = vld [vmem:[%s10386_s11 + $0x40] sm:$0xff] }
0x3d25   :  { %5540 = vrot.lane.b32.xlu0 %v5530_v8, %s8603_s29  ;;  %v8112_v8 = vpack.c.bf16 %v5686_v37, %v5685_v31 }
0x3d96   :  { %v5543_v23 = vpop.permute.xlu1 %5542 }
0x3d97   :  { %v5547_v39 = vadd.f32 %v5543_v23, %v5347_v41  ;;  %v5541_v44 = vpop.permute.xlu0 %5540  ;;  %v8102_v41 = vpack.c.bf16 %v5664_v40, %v5663_v18  ;;  %v5670_v23 = vld [vmem:[%s10386_s11 + $0x48] sm:$0xff]  ;;  %v5675_v40 = vld [vmem:[%s10386_s11 + $0x70] sm:$0xff] }
0x3d98   :  { %v5546_v59 = vadd.f32 %v5541_v44, %v5346_v43  ;;  %v8134_v43 = vpack.c.bf16 %v9816_v49, %v9809_v4  ;;  %v9882_v44 = vld [vmem:[%s10388_s13 + $0x38] sm:$0xff] }
0x3d99   :  { %5552 = vrot.lane.b32.xlu1 %v5547_v39, %s8602_s26  ;;  %8103 = vmatpush3.bf16.msra.mxu1 %v8102_v41 }
0x3d9a   :  { %5550 = vrot.lane.b32.xlu0 %v5546_v59, %s8602_s26  ;;  %8136 = vmatprep.subr.msk.bf16.mxu0 %vm9774_vm5, %v8134_v43 }
0x3d9b   :  { %8105 = vmatprep.subr.bf16.mxu1 %v8104_v63  ;;  %8139 = vmatpush3.bf16.xpose.msk.msra.mxu0 %vm9774_vm5, %v8134_v43  ;;  %v8126_v43 = vpack.c.bf16 %v5676_v9, %v5675_v40  ;;  %v6787_v40 = vld [vmem:[%s10391_s16] sm:$0xff] }
0x3d9c   :  { %8142 = vmatprep.subr.msk.bf16.mxu0 %vm9774_vm5, %v8140_v15  ;;  %v6789_v9 = vcombine.high %v6787_v40, %v6787_v40 }
0x3d9d   :  { %8107 = vmatpush3.bf16.msra.mxu1 %v8106_v24 }
0x3d9e   :  { %8109 = vmatprep.subr.bf16.mxu1 %v8108_v61 }
0x3da1   :  { %8111 = vmatpush3.bf16.msra.mxu1 %v8110_v35 }
0x3da2   :  { %8113 = vmatprep.subr.bf16.mxu1 %v8112_v8 }
0x3da3   :  { %8145 = vmatpush3.bf16.xpose.msk.msra.mxu0 %vm9774_vm5, %v8140_v15 }
0x3e0b   :  { %v5553_v16 = vpop.permute.xlu1 %5552 }
0x3e0c   :  { %v5559_v51 = vsel %vm10452_vm12, %v5553_v16, 0.0  ;;  %v5551_v50 = vpop.permute.xlu0 %5550  ;;  %v5688_v16 = vld [vmem:[%s10386_s11 + $0xd8] sm:$0xff]  ;;  %vm10467_vm12 = vmmov %vm10425_vm0 }
0x3e0d   :  { %v5556_v52 = vsel %vm10453_vm13, %v5551_v50, 0.0  ;;  %5560 = vadd.xlane.f32.xlu1 %v5559_v51  ;;  %v8114_v51 = vpack.c.bf16 %v5670_v23, %v5669_v5  ;;  %v9950_v23 = vld [vmem:[%s10389_s14] sm:$0xff]  ;;  %vm10468_vm13 = vmmov %vm10425_vm0 }
0x3e0e   :  { %5557 = vadd.xlane.f32.xlu0 %v5556_v52 }
0x3e0f   :  { %8115 = vmatpush3.bf16.msra.mxu1 %v8114_v51 }
0x3e9a   :  { %v5561_v3 = vpop.xlane.xlu1 %5560 }
0x3e9b   :  { %v5563_v29 = vmul.f32 0.03125, %v5561_v3  ;;  %v5558_v25 = vpop.xlane.xlu0 %5557  ;;  %v5671_v3 = vld [vmem:[%s10386_s11 + $0x50] sm:$0xff] }
0x3e9c   :  { %v5562_v26 = vmul.f32 0.03125, %v5558_v25  ;;  %v5689_v25 = vld [vmem:[%s10386_s11 + $0xe0] sm:$0xff] }
0x3e9d   :  { %v9746_v21 = vsub.f32 %v5547_v39, %v5563_v29  ;;  %v9877_v39 = vld [vmem:[%s10388_s13 + $0x30] sm:$0xff]  ;;  %v5672_v29 = vld [vmem:[%s10386_s11 + $0x58] sm:$0xff] }
0x3e9e   :  { %v9748_v2 = vsub.f32 %v5546_v59, %v5562_v26  ;;  %v5687_v59 = vld [vmem:[%s10386_s11 + $0xd0] sm:$0xff]  ;;  %v8146_v50 = vpack.c.bf16 %v9882_v44, %v9877_v39  ;;  %v5690_v26 = vld [vmem:[%s10386_s11 + $0xe8] sm:$0xff] }
0x3e9f   :  { %v5567_v45 = vmul.f32 %v9746_v21, %v9746_v21  ;;  %v8116_v52 = vpack.c.bf16 %v5688_v16, %v5687_v59  ;;  %v9955_v59 = vld [vmem:[%s10389_s14 + $0x8] sm:$0xff] }
0x3ea0   :  { %v5566_v46 = vmul.f32 %v9748_v2, %v9748_v2  ;;  %8148 = vmatprep.subr.msk.bf16.mxu0 %vm9774_vm5, %v8146_v50 }
0x3ea1   :  { %5572 = vrot.lane.b32.xlu1 %v5567_v45, %s8602_s26  ;;  %v8118_v45 = vpack.c.bf16 %v5672_v29, %v5671_v3  ;;  %8117 = vmatprep.subr.bf16.mxu1 %v8116_v52  ;;  %v5779_v52 = vld [vmem:[%s10388_s13 + $0x50] sm:$0xff]  ;;  %v5780_v3 = vld [vmem:[%s10388_s13 + $0x58] sm:$0xff] }
0x3ea2   :  { %5570 = vrot.lane.b32.xlu0 %v5566_v46, %s8602_s26  ;;  %v8120_v46 = vpack.c.bf16 %v5690_v26, %v5689_v25  ;;  %8151 = vmatpush3.bf16.xpose.msk.msra.mxu0 %vm9774_vm5, %v8146_v50 }
0x3ea3   :  { %8119 = vmatpush3.bf16.msra.mxu1 %v8118_v45 }
0x3ea4   :  { %8121 = vmatprep.subr.bf16.mxu1 %v8120_v46 }
0x3f13   :  { %v5573_v32 = vpop.permute.xlu1 %5572 }
0x3f14   :  { %v5579_v33 = vsel %vm10425_vm0, %v5573_v32, 0.0  ;;  %v5571_v38 = vpop.permute.xlu0 %5570  ;;  %v5673_v32 = vld [vmem:[%s10386_s11 + $0x60] sm:$0xff] }
0x3f15   :  { %v5576_v27 = vsel %vm10454_vm2, %v5571_v38, 0.0  ;;  %5580 = vadd.xlane.f32.xlu1 %v5579_v33  ;;  %v5674_v33 = vld [vmem:[%s10386_s11 + $0x68] sm:$0xff]  ;;  %v5691_v38 = vld [vmem:[%s10386_s11 + $0xf0] sm:$0xff]  ;;  %vm10469_vm2 = vmmov %vm10425_vm0 }
0x3f16   :  { %5577 = vadd.xlane.f32.xlu0 %v5576_v27  ;;  %v5692_v27 = vld [vmem:[%s10386_s11 + $0xf8] sm:$0xff] }
0x3f26   :  { %5605 = vrot.lane.b32.xlu1 %v5603_v28, %s8603_s29  ;;  %v8122_v28 = vpack.c.bf16 %v5674_v33, %v5673_v32  ;;  %v9970_v32 = vpack.c.bf16 %v9955_v59, %v9950_v23 }
0x3f28   :  { %8123 = vmatpush3.bf16.msra.mxu1 %v8122_v28  ;;  %v8158_v28 = vpack.c.bf16 %v5780_v3, %v5779_v52 }
0x3f2c   :  { %5595 = vrot.lane.b32.xlu0 %v5593_v30, %s8603_s29  ;;  %v8124_v30 = vpack.c.bf16 %v5692_v27, %v5691_v38 }
0x3f2e   :  { %8125 = vmatprep.subr.bf16.mxu1 %v8124_v30 }
0x3f2f   :  { %8127 = vmatpush3.bf16.msra.mxu1 %v8126_v43 }
0x3f30   :  { %8178 = vmatprep.subr.msk.bf16.mxu1 %vm9774_vm5, %v9970_v32 }
0x3fa2   :  { %v5581_v56 = vpop.xlane.xlu1 %5580 }
0x3fa3   :  { %v5583_v53 = vmul.f32 0.03125, %v5581_v56  ;;  %v5578_v42 = vpop.xlane.xlu0 %5577 }
0x3fa4   :  { %v5582_v17 = vmul.f32 0.03125, %v5578_v42  ;;  %v5782_v42 = vld [vmem:[%s10388_s13 + $0x68] sm:$0xff] }
0x3fa5   :  { %v5585_v60 = vadd.f32 1e-05, %v5583_v53  ;;  %v5781_v53 = vld [vmem:[%s10388_s13 + $0x60] sm:$0xff] }
0x3fa6   :  { %v5584_v47 = vadd.f32 1e-05, %v5582_v17  ;;  %v5606_v18 = vpop.permute.xlu1 %5605  ;;  %v8164_v17 = vpack.c.bf16 %v5782_v42, %v5781_v53 }
0x3fa7   :  { %8531 = vrsqrt.f32 %v5585_v60  ;;  %v5596_v34 = vpop.permute.xlu0 %5595  ;;  %v5783_v60 = vld [vmem:[%s10388_s13 + $0x70] sm:$0xff] }
0x3fa8   :  { %8533 = vrsqrt.f32 %v5584_v47  ;;  %v5784_v47 = vld [vmem:[%s10388_s13 + $0x78] sm:$0xff] }
0x3fb1   :  { %v8532_v36 = vpop.eup %8531 }
0x3fb2   :  { %v8534_v7 = vpop.eup %8533  ;;  %v5589_v12 = vmul.f32 %v8532_v36, %v9746_v21  ;;  %v9938_v21 = vld [vmem:[%s10388_s13 + $0x48] sm:$0xff]  ;;  %v8170_v36 = vpack.c.bf16 %v5784_v47, %v5783_v60 }
0x3fb3   :  { %v5588_v11 = vmul.f32 %v8534_v7, %v9748_v2  ;;  %v8152_v63 = vpack.c.bf16 %v9938_v21, %v9933_v14 }
0x3fb4   :  { %v5599_v41 = vmul.f32 %v5596_v34, %v5589_v12  ;;  %v7117_v12 = vld [vmem:[%s10390_s15 + $0x30] sm:$0xff] }
0x3fb5   :  { %v5598_v2 = vmul.f32 %v5596_v34, %v5588_v11  ;;  %8154 = vmatprep.subr.msk.bf16.mxu0 %vm9774_vm5, %v8152_v63  ;;  %v6383_v34 = vld [vmem:[%s10390_s15] sm:$0xff]  ;;  %v7118_v11 = vld [vmem:[%s10390_s15 + $0x38] sm:$0xff] }
0x3fb6   :  { %v5609_v10 = vadd.f32 %v5606_v18, %v5599_v41  ;;  %8157 = vmatpush3.bf16.xpose.msk.msra.mxu0 %vm9774_vm5, %v8152_v63 }
0x3fb7   :  { %v5608_v22 = vadd.f32 %v5606_v18, %v5598_v2  ;;  %8160 = vmatprep.subr.msk.bf16.mxu0 %vm9774_vm5, %v8158_v28  ;;  %v8242_v18 = vpack.c.bf16 %v7118_v11, %v7117_v12 }
0x3fb8   :  { %v5639_v48 = vrot.slane %v5609_v10, 4  ;;  %v5612_v13 = vrot.slane %v5609_v10, 7  ;;  %v5633_v24 = vrot.slane %v5609_v10, 3  ;;  %v5623_v15 = vrot.slane %v5609_v10, 1 }
0x3fb9   :  { %v5617_v61 = vrot.slane %v5608_v22, 1  ;;  %v5638_v62 = vrot.slane %v5608_v22, 5  ;;  %v5632_v55 = vrot.slane %v5608_v22, 4  ;;  %v5622_v31 = vrot.slane %v5608_v22, 2 }
0x3fba   :  { %v5613_v37 = vsel %vm502_vm6, %v5612_v13, %v5608_v22  ;;  %v5644_v35 = vrot.slane %v5608_v22, 6  ;;  %v5645_v5 = vrot.slane %v5609_v10, 5  ;;  %v5650_v8 = vrot.slane %v5608_v22, 7  ;;  %v6111_v13 = vld [vmem:[%s10389_s14 + $0x10] sm:$0xff] }
0x3fbb   :  { %v5618_v16 = vsel %vm502_vm6, %v5609_v10, %v5617_v61  ;;  %v5640_v51 = vsel %vm502_vm6, %v5639_v48, %v5638_v62  ;;  %v5634_v50 = vsel %vm502_vm6, %v5633_v24, %v5632_v55  ;;  %v5624_v26 = vsel %vm502_vm6, %v5623_v15, %v5622_v31  ;;  %v6112_v24 = vld [vmem:[%s10389_s14 + $0x18] sm:$0xff] }
0x3fbc   :  { %v8298_v29 = vpack.i.bf16 %v5618_v16, %v5640_v51  ;;  %v8293_v25 = vpack.i.bf16 %v5613_v37, %v5634_v50  ;;  %v5651_v45 = vrot.slane %v5609_v10, 6  ;;  %v5646_v46 = vsel %vm502_vm6, %v5645_v5, %v5644_v35  ;;  %v6113_v5 = vld [vmem:[%s10389_s14 + $0x20] sm:$0xff]  ;;  %v6116_v51 = vld [vmem:[%s10389_s14 + $0x38] sm:$0xff] }
0x3fbd   :  { %v5628_v33 = vrot.slane %v5608_v22, 3  ;;  %v5629_v38 = vrot.slane %v5609_v10, 2  ;;  %v8303_v56 = vpack.i.bf16 %v5624_v26, %v5646_v46  ;;  %v8182_v35 = vpack.c.bf16 %v6112_v24, %v6111_v13  ;;  %v6120_v26 = vld [vmem:[%s10389_s14 + $0x58] sm:$0xff]  ;;  %v6121_v46 = vld [vmem:[%s10389_s14 + $0x60] sm:$0xff] }
0x3fbe   :  { %8299 = vrot.lane.b32.xlu1 %v8298_v29, %s8601_s3  ;;  %8294 = vrot.lane.b32.xlu0 %v8293_v25, %s8602_s26  ;;  %v9975_v27 = vsel %vm502_vm6, %v5651_v45, %v5650_v8  ;;  %v6114_v8 = vld [vmem:[%s10389_s14 + $0x28] sm:$0xff]  ;;  %v6119_v25 = vld [vmem:[%s10389_s14 + $0x50] sm:$0xff] }
0x3fbf   :  { %v9981_v30 = vsel %vm502_vm6, %v5629_v38, %v5628_v33  ;;  %8163 = vmatpush3.bf16.xpose.msk.msra.mxu0 %vm9774_vm5, %v8158_v28  ;;  %vm10459_vm6 = vmmov %vm10425_vm0  ;;  %v8188_v16 = vpack.c.bf16 %v6114_v8, %v6113_v5  ;;  %v8206_v45 = vpack.c.bf16 %v6120_v26, %v6119_v25  ;;  %v6123_v38 = vld [vmem:[%s10389_s14 + $0x70] sm:$0xff] }
0x3fc0   :  { %8166 = vmatprep.subr.msk.bf16.mxu0 %vm9774_vm5, %v8164_v17 }
0x3fc2   :  { %8304 = vrot.lane.b32.xlu0 %v8303_v56, %s8603_s29  ;;  %v7128_v56 = vld [vmem:[%s10390_s15 + $0x48] sm:$0xff] }
0x3fc7   :  { %8169 = vmatpush3.bf16.xpose.msk.msra.mxu0 %vm9774_vm5, %v8164_v17  ;;  %v7130_v17 = vld [vmem:[%s10390_s15 + $0x58] sm:$0xff] }
0x3fc8   :  { %8172 = vmatprep.subr.msk.bf16.mxu0 %vm9774_vm5, %v8170_v36 }
0x3fcf   :  { %8175 = vmatpush3.bf16.xpose.msk.msra.mxu0 %vm9774_vm5, %v8170_v36  ;;  %v5981_v36 = vadd.s32 16, %v8778_v20 }
0x3fd6   :  { %7839 = vmatmul.mubr.msk.f32.vlgmr.msra.gmra.mrb[50].mxu0 %vm10459_vm6, %v9770_v6  ;;  %v6384_v6 = vld [vmem:[%s10390_s15 + $0x8] sm:$0xff]  ;;  %vm10472_vm6 = vmmov %vm10425_vm0 }
0x3fd7   :  { %7841 = vmatprep.mubr.msk.f32.mxu0 %vm10460_vm7, %v9809_v4  ;;  %v8224_v4 = vpack.c.bf16 %v6384_v6, %v6383_v34  ;;  %vm10473_vm7 = vmmov %vm10425_vm0 }
0x3fd9   :  { %8226 = vmatprep.subr.msk.bf16.mxu0 %vm9774_vm5, %v8224_v4 }
0x3fda   :  { %7842 = vmatmul.mubr.msk.f32.gmra.mrb[52].mxu0 %vm10461_vm15, %v9816_v49  ;;  %v6385_v49 = vld [vmem:[%s10390_s15 + $0x10] sm:$0xff]  ;;  %vm10474_vm15 = vmmov %vm10425_vm0 }
0x3fdb   :  { %7844 = vmatprep.mubr.msk.f32.mxu0 %vm10462_vm1, %v9843_v57  ;;  %8229 = vmatpush3.bf16.xpose.msk.msra.mxu0 %vm9774_vm5, %v8224_v4  ;;  %v6386_v57 = vld [vmem:[%s10390_s15 + $0x18] sm:$0xff]  ;;  %vm10475_vm1 = vmmov %vm10425_vm0 }
0x3fde   :  { %7845 = vmatmul.mubr.msk.f32.gmra.mrb[54].mxu0 %vm10463_vm4, %v9848_v58  ;;  %v8230_v58 = vpack.c.bf16 %v6386_v57, %v6385_v49  ;;  %vm10476_vm4 = vmmov %vm10425_vm0 }
0x3fdf   :  { %7847 = vmatprep.mubr.msk.f32.mxu0 %vm10464_vm8, %v9877_v39  ;;  %v7115_v39 = vld [vmem:[%s10390_s15 + $0x20] sm:$0xff]  ;;  %vm10477_vm8 = vmmov %vm10425_vm0 }
0x3fe0   :  { %8232 = vmatprep.subr.msk.bf16.mxu0 %vm9774_vm5, %v8230_v58 }
0x3fe2   :  { %7848 = vmatmul.mubr.msk.f32.gmra.mrb[56].mxu0 %vm10465_vm9, %v9882_v44  ;;  %v7116_v44 = vld [vmem:[%s10390_s15 + $0x28] sm:$0xff]  ;;  %vm10478_vm9 = vmmov %vm10425_vm0 }
0x3fe3   :  { %7850 = vmatprep.mubr.msk.f32.mxu0 %vm10466_vm10, %v9933_v14  ;;  %8235 = vmatpush3.bf16.xpose.msk.msra.mxu0 %vm9774_vm5, %v8230_v58  ;;  %v8236_v7 = vpack.c.bf16 %v7116_v44, %v7115_v39  ;;  %vm10479_vm10 = vmmov %vm10425_vm0 }
0x3fe5   :  { %8238 = vmatprep.subr.msk.bf16.mxu0 %vm9774_vm5, %v8236_v7 }
0x3fe6   :  { %7851 = vmatmul.mubr.msk.f32.gmra.mrb[58].mxu0 %vm10467_vm12, %v9938_v21  ;;  %vm10480_vm12 = vmmov %vm10425_vm0 }
0x3fe7   :  { %7853 = vmatprep.mubr.msk.f32.mxu0 %vm10468_vm13, %v5779_v52  ;;  %vm5656_vm13 = vcmask 785408   ;;  %v6117_v52 = vld [vmem:[%s10389_s14 + $0x40] sm:$0xff] }
0x3fea   :  { %7854 = vmatmul.mubr.msk.f32.gmra.mrb[60].mxu0 %vm10425_vm0, %v5780_v3  ;;  %v6118_v3 = vld [vmem:[%s10389_s14 + $0x48] sm:$0xff] }
0x3feb   :  { %7856 = vmatprep.mubr.msk.f32.mxu0 %vm10469_vm2, %v5781_v53  ;;  %vm10481_vm2 = vmmov %vm10425_vm0  ;;  %v8200_v29 = vpack.c.bf16 %v6118_v3, %v6117_v52 }
0x3fee   :  { %7857 = vmatmul.mubr.msk.f32.gmra.mrb[62].mxu0 %vm10470_vm3, %v5782_v42  ;;  %vm10482_vm3 = vmmov %vm10425_vm0  ;;  %v7129_v42 = vld [vmem:[%s10390_s15 + $0x50] sm:$0xff] }
0x3fef   :  { %7859 = vmatprep.mubr.msk.f32.mxu0 %vm10471_vm14, %v5783_v60  ;;  %v8254_v60 = vpack.c.bf16 %v7130_v17, %v7129_v42  ;;  %vm10484_vm14 = vmmov %vm10425_vm0 }
0x3ff2   :  { %7860 = vmatmul.mubr.msk.f32.gmra.mrb[64].mxu0 %vm10472_vm6, %v5784_v47  ;;  %vm10485_vm6 = vmmov %vm10425_vm0  ;;  %v5982_v47 = vadd.s32 24, %v8778_v20 }
0x3ff3   :  { %7926 = vmatprep.mubr.msk.f32.mxu0 %vm10473_vm7, %v6383_v34  ;;  %vm10486_vm7 = vmmov %vm10425_vm0 }
0x3ff6   :  { %7927 = vmatmul.mubr.msk.f32.vlgmr.msra.gmra.mrb[66].mxu0 %vm10474_vm15, %v6384_v6  ;;  %vm10487_vm15 = vmmov %vm10425_vm0 }
0x3ff7   :  { %7929 = vmatprep.mubr.msk.f32.mxu0 %vm10475_vm1, %v6385_v49  ;;  %8241 = vmatpush3.bf16.xpose.msk.msra.mxu0 %vm9774_vm5, %v8236_v7  ;;  %vm10488_vm1 = vmmov %vm10425_vm0  ;;  %v5983_v49 = vadd.s32 32, %v8778_v20 }
0x3ff8   :  { %8244 = vmatprep.subr.msk.bf16.mxu0 %vm9774_vm5, %v8242_v18 }
0x3ffa   :  { %7930 = vmatmul.mubr.msk.f32.gmra.mrb[68].mxu0 %vm10476_vm4, %v6386_v57  ;;  %vm10489_vm4 = vmmov %vm10425_vm0 }
0x3ffb   :  { %7940 = vmatprep.mubr.msk.f32.mxu0 %vm10477_vm8, %v7115_v39  ;;  %vm10490_vm8 = vmmov %vm10425_vm0 }
0x3fff   :  { %8247 = vmatpush3.bf16.xpose.msk.msra.mxu0 %vm9774_vm5, %v8242_v18 }
0x4000   :  { %6791 = vmatprep.subr.mxu0 %v6789_v9 }
0x4006   :  { %7941 = vmatmul.mubr.msk.f32.vlgmr.msra.gmra.mrb[70].mxu0 %vm10478_vm9, %v7116_v44  ;;  %vm10491_vm9 = vmmov %vm10425_vm0 }
0x4007   :  { %7943 = vmatprep.mubr.msk.f32.mxu0 %vm10479_vm10, %v7117_v12  ;;  %6792 = vmatpush1.xpose.msra.mxu0 %v6787_v40  ;;  %vm10492_vm10 = vmmov %vm10425_vm0 }
0x400a   :  { %7944 = vmatmul.mubr.msk.f32.gmra.mrb[72].mxu0 %vm10480_vm12, %v7118_v11  ;;  %vm10493_vm12 = vmmov %vm10425_vm0  ;;  %v5986_v11 = vadd.s32 56, %v8778_v20 }
0x400b   :  { %6855 = vmatprep.mubr.f32.mxu0 %v6789_v9  ;;  %v5985_v9 = vadd.s32 48, %v8778_v20 }
0x400e   :  { %6856 = vmatmul.mubr.f32.vlgmr.msra.gmra.mrb[74].mxu0 %v6787_v40 }
0x4030   :  { %v8300_v14 = vpop.permute.xlu1 %8299  ;;  %v8295_v41 = vpop.permute.xlu0 %8294 }
0x4031   :  { %v8302_v43 = vunpack.i.h.bf16 %v8300_v14  ;;  %v8301_v21 = vunpack.i.l.bf16 %v8300_v14  ;;  %v8297_v2 = vunpack.i.h.bf16 %v8295_v41  ;;  %v8296_v63 = vunpack.i.l.bf16 %v8295_v41 }
0x4033   :  { %v5654_v15 = vsel %vm10425_vm0, %v8297_v2, %v8302_v43  ;;  %v5658_v61 = vsel %vm10481_vm2, %v8296_v63, %v8301_v21  ;;  %vm10495_vm2 = vmmov %vm10425_vm0 }
0x4034   :  { %v8305_v10 = vpop.permute.xlu0 %8304 }
0x4035   :  { %v8307_v22 = vunpack.i.h.bf16 %v8305_v10  ;;  %v8306_v48 = vunpack.i.l.bf16 %v8305_v10  ;;  %v5988_v10 = vadd.s32 72, %v8778_v20 }
0x4037   :  { %v5659_v62 = vsel %vm3582_vm11, %v5658_v61, %v8306_v48  ;;  %v5655_v55 = vsel %vm3582_vm11, %v5654_v15, %v8307_v22  ;;  %vm10483_vm11 = vmmov %vm10425_vm0 }
0x4038   :  { %v5660_v31 = vsel %vm5656_vm13, %v5659_v62, %v9975_v27  ;;  %v5657_v37 = vsel %vm5656_vm13, %v5655_v55, %v9981_v30  ;;  %v6124_v27 = vld [vmem:[%s10389_s14 + $0x78] sm:$0xff]  ;;  %v7127_v30 = vld [vmem:[%s10390_s15 + $0x40] sm:$0xff]  ;;  %vm10494_vm13 = vmmov %vm10425_vm0 }
0x4039   :  { %5761 = vmatprep.mubr.f32.mxu1 %v5660_v31  ;;  %v8218_v28 = vpack.c.bf16 %v6124_v27, %v6123_v38  ;;  %v8248_v53 = vpack.c.bf16 %v7128_v56, %v7127_v30 }
0x403a   :  { %5762 = vmatmul.mubr.f32.vlgmr.msra.gmra.mrb[52].mxu1 %v5657_v37 }
0x403b   :  { %8181 = vmatpush3.bf16.xpose.msk.msra.mxu1 %vm9774_vm5, %v9970_v32  ;;  %7894 = vmatprep.mubr.msk.f32.mxu1 %vm10482_vm3, %v9950_v23  ;;  %v6115_v23 = vld [vmem:[%s10389_s14 + $0x30] sm:$0xff]  ;;  %v6122_v32 = vld [vmem:[%s10389_s14 + $0x68] sm:$0xff]  ;;  %vm10496_vm3 = vmmov %vm10425_vm0 }
0x403c   :  { %8184 = vmatprep.subr.msk.bf16.mxu1 %vm9774_vm5, %v8182_v35  ;;  %v8194_v50 = vpack.c.bf16 %v6116_v51, %v6115_v23  ;;  %v8212_v33 = vpack.c.bf16 %v6122_v32, %v6121_v46 }
0x4043   :  { %8187 = vmatpush3.bf16.xpose.msk.msra.mxu1 %vm9774_vm5, %v8182_v35  ;;  %v5990_v35 = vadd.s32 88, %v8778_v20 }
0x4044   :  { %8190 = vmatprep.subr.msk.bf16.mxu1 %vm9774_vm5, %v8188_v16 }
0x404b   :  { %8193 = vmatpush3.bf16.xpose.msk.msra.mxu1 %vm9774_vm5, %v8188_v16 }
0x404c   :  { %8196 = vmatprep.subr.msk.bf16.mxu1 %vm9774_vm5, %v8194_v50 }
0x4053   :  { %8199 = vmatpush3.bf16.xpose.msk.msra.mxu1 %vm9774_vm5, %v8194_v50 }
0x4054   :  { %8202 = vmatprep.subr.msk.bf16.mxu1 %vm9774_vm5, %v8200_v29 }
0x405b   :  { %8205 = vmatpush3.bf16.xpose.msk.msra.mxu1 %vm9774_vm5, %v8200_v29 }
0x405c   :  { %8208 = vmatprep.subr.msk.bf16.mxu1 %vm9774_vm5, %v8206_v45 }
0x4063   :  { %8211 = vmatpush3.bf16.xpose.msk.msra.mxu1 %vm9774_vm5, %v8206_v45  ;;  %v5992_v45 = vadd.s32 104, %v8778_v20 }
0x4064   :  { %8214 = vmatprep.subr.msk.bf16.mxu1 %vm9774_vm5, %v8212_v33 }
0x406b   :  { %8217 = vmatpush3.bf16.xpose.msk.msra.mxu1 %vm9774_vm5, %v8212_v33 }
0x406c   :  { %8220 = vmatprep.subr.msk.bf16.mxu1 %vm9774_vm5, %v8218_v28 }
0x4073   :  { %8223 = vmatpush3.bf16.xpose.msk.msra.mxu1 %vm9774_vm5, %v8218_v28 }
0x4074   :  { %8250 = vmatprep.subr.msk.bf16.mxu1 %vm9774_vm5, %v8248_v53 }
0x407a   :  { %7895 = vmatmul.mubr.msk.f32.vlgmr.msra.gmra.mrb[54].mxu1 %vm10483_vm11, %v9955_v59  ;;  %vm10497_vm11 = vmmov %vm10425_vm0  ;;  %v10206_v59 = vand.u32 127, %v66_v19  ;;  %v5984_v19 = vadd.s32 40, %v8778_v20 }
0x407b   :  { %8253 = vmatpush3.bf16.xpose.msk.msra.mxu1 %vm9774_vm5, %v8248_v53  ;;  %7897 = vmatprep.mubr.msk.f32.mxu1 %vm10484_vm14, %v6111_v13  ;;  %vm10499_vm14 = vmmov %vm10425_vm0 }
0x407c   :  { %8256 = vmatprep.subr.msk.bf16.mxu1 %vm9774_vm5, %v8254_v60 }
0x407e   :  { %7898 = vmatmul.mubr.msk.f32.gmra.mrb[56].mxu1 %vm10485_vm6, %v6112_v24  ;;  %vm10500_vm6 = vmmov %vm10425_vm0  ;;  %v5987_v24 = vadd.s32 64, %v8778_v20 }
0x407f   :  { %7900 = vmatprep.mubr.msk.f32.mxu1 %vm10486_vm7, %v6113_v5  ;;  %vm5998_vm7 = vcmp.eq.s32.totalorder %v5980_v54, %v10206_v59  ;;  %v5989_v5 = vadd.s32 80, %v8778_v20  ;;  %v5993_v54 = vadd.s32 112, %v8778_v20 }
0x4080   :  { %v10214_v34 = vsel %vm5998_vm7, 1.0, %v8597_v1  ;;  %vm10501_vm7 = vcmask 261120  }
0x4082   :  { %7901 = vmatmul.mubr.msk.f32.gmra.mrb[58].mxu1 %vm10487_vm15, %v6114_v8  ;;  %vm5997_vm15 = vcmp.eq.s32.totalorder %v8778_v20, %v10206_v59 }
0x4083   :  { %7903 = vmatprep.mubr.msk.f32.mxu1 %vm10488_vm1, %v6115_v23  ;;  %8259 = vmatpush3.bf16.xpose.msk.msra.mxu1 %vm9774_vm5, %v8254_v60  ;;  %vm10498_vm5 = vmmov %vm10425_vm0  ;;  %v10217_v6 = vsel %vm5997_vm15, 1.0, %v8597_v1  ;;  %vm6000_vm1 = vcmp.eq.s32.totalorder %v5982_v47, %v10206_v59  ;;  %v5994_v60 = vadd.s32 120, %v8778_v20 }
0x4084   :  { %v10226_v44 = vsel %vm6000_vm1, 1.0, %v8597_v1  ;;  %vm10502_vm15 = vmmov %vm10501_vm7 }
0x4085   :  { %vm10503_vm1 = vmmov %vm10501_vm7 }
0x4086   :  { %7904 = vmatmul.mubr.msk.f32.gmra.mrb[60].mxu1 %vm10489_vm4, %v6116_v51  ;;  %vm5999_vm4 = vcmp.eq.s32.totalorder %v5981_v36, %v10206_v59 }
0x4087   :  { %7906 = vmatprep.mubr.msk.f32.mxu1 %vm10490_vm8, %v6117_v52  ;;  %v10229_v12 = vsel %vm5999_vm4, 1.0, %v8597_v1  ;;  %vm6002_vm8 = vcmp.eq.s32.totalorder %v5984_v19, %v10206_v59  ;;  %vm10504_vm4 = vmmov %vm10503_vm1 }
0x4088   :  { %v10238_v2 = vsel %vm6002_vm8, 1.0, %v8597_v1  ;;  %vm10505_vm8 = vmmov %vm10503_vm1 }
0x408a   :  { %7907 = vmatmul.mubr.msk.f32.gmra.mrb[62].mxu1 %vm10491_vm9, %v6118_v3  ;;  %vm6001_vm9 = vcmp.eq.s32.totalorder %v5983_v49, %v10206_v59 }
0x408b   :  { %7909 = vmatprep.mubr.msk.f32.mxu1 %vm10492_vm10, %v6119_v25  ;;  %v10241_v63 = vsel %vm6001_vm9, 1.0, %v8597_v1  ;;  %vm6004_vm10 = vcmp.eq.s32.totalorder %v5986_v11, %v10206_v59  ;;  %vm10506_vm9 = vmmov %vm10503_vm1 }
0x408c   :  { %v10250_v31 = vsel %vm6004_vm10, 1.0, %v8597_v1  ;;  %vm10507_vm10 = vmmov %vm10503_vm1 }
0x408e   :  { %7910 = vmatmul.mubr.msk.f32.gmra.mrb[64].mxu1 %vm10493_vm12, %v6120_v26  ;;  %vm6003_vm12 = vcmp.eq.s32.totalorder %v5985_v9, %v10206_v59 }
0x408f   :  { %7912 = vmatprep.mubr.msk.f32.mxu1 %vm10494_vm13, %v6121_v46  ;;  %v10253_v37 = vsel %vm6003_vm12, 1.0, %v8597_v1  ;;  %vm6006_vm13 = vcmp.eq.s32.totalorder %v5988_v10, %v10206_v59  ;;  %v5991_v46 = vadd.s32 96, %v8778_v20  ;;  %vm10508_vm12 = vmmov %vm10503_vm1 }
0x4090   :  { %v10262_v25 = vsel %vm6006_vm13, 1.0, %v8597_v1  ;;  %vm6863_vm13 = vcmask 27648  }
0x4092   :  { %7913 = vmatmul.mubr.msk.f32.gmra.mrb[66].mxu1 %vm10425_vm0, %v6122_v32  ;;  %vm6005_vm0 = vcmp.eq.s32.totalorder %v5987_v24, %v10206_v59 }
0x4093   :  { %7915 = vmatprep.mubr.msk.f32.mxu1 %vm10495_vm2, %v6123_v38  ;;  %v10265_v26 = vsel %vm6005_vm0, 1.0, %v8597_v1  ;;  %vm6008_vm2 = vcmp.eq.s32.totalorder %v5990_v35, %v10206_v59  ;;  %vm5767_vm0 = vcmask 25600  }
0x4096   :  { %7916 = vmatmul.mubr.msk.f32.gmra.mrb[68].mxu1 %vm10496_vm3, %v6124_v27  ;;  %vm6007_vm3 = vcmp.eq.s32.totalorder %v5989_v5, %v10206_v59 }
0x4097   :  { %7954 = vmatprep.mubr.msk.f32.mxu1 %vm10497_vm11, %v7127_v30  ;;  %vm6010_vm11 = vcmp.eq.s32.totalorder %v5992_v45, %v10206_v59 }
0x409a   :  { %7955 = vmatmul.mubr.msk.f32.vlgmr.msra.gmra.mrb[70].mxu1 %vm10498_vm5, %v7128_v56  ;;  %vm6009_vm5 = vcmp.eq.s32.totalorder %v5991_v46, %v10206_v59 }
0x409b   :  { %7957 = vmatprep.mubr.msk.f32.mxu1 %vm10499_vm14, %v7129_v42  ;;  %v10274_v42 = vsel %vm6008_vm2, 1.0, %v8597_v1  ;;  %v10289_v11 = vsel %vm6009_vm5, 1.0, %v8597_v1  ;;  %vm6012_vm14 = vcmp.eq.s32.totalorder %v5994_v60, %v10206_v59  ;;  %vm10509_vm2 = vmmov %vm10503_vm1 }
0x409c   :  { %v10296_v10 = vsel %vm6012_vm14, 1.0, %v8597_v1  ;;  %vm10512_vm5 = vmmov %vm10503_vm1 }
0x409e   :  { %7958 = vmatmul.mubr.msk.f32.gmra.mrb[72].mxu1 %vm10500_vm6, %v7130_v17  ;;  %v10277_v17 = vsel %vm6007_vm3, 1.0, %v8597_v1  ;;  %vm6011_vm6 = vcmp.eq.s32.totalorder %v5993_v54, %v10206_v59  ;;  %vm10510_vm3 = vmmov %vm10503_vm1 }
0x40a9   :  { %v7840_v4 = vpop.f32.mrb[50].mxu0 }
0x40aa   :  { %v6046_v57 = vsub.f32 %v7840_v4, %v10214_v34  ;;  %v5899_v58 = vpop.f32.mrb[51].mxu0 }
0x40ab   :  { %v6045_v39 = vsub.f32 %v5899_v58, %v10217_v6 }
0x40ac   :  { %v6062_v7 = vmul.f32 %v6046_v57, %v6046_v57 }
0x40ad   :  { %v6061_v18 = vmul.f32 %v6045_v39, %v6045_v39  ;;  %v7843_v40 = vpop.f32.mrb[52].mxu0 }
0x40ae   :  { %v6048_v14 = vsub.f32 %v7843_v40, %v10226_v44  ;;  %v5909_v41 = vpop.f32.mrb[53].mxu0 }
0x40af   :  { %v6077_v43 = vadd.f32 %v6062_v7, %v6061_v18  ;;  %v6047_v21 = vsub.f32 %v5909_v41, %v10229_v12  ;;  %v10286_v7 = vsel %vm6010_vm11, 1.0, %v8597_v1  ;;  %vm10511_vm11 = vmmov %vm10503_vm1 }
0x40b0   :  { %v6064_v22 = vmul.f32 %v6048_v14, %v6048_v14 }
0x40b1   :  { %v6063_v48 = vmul.f32 %v6047_v21, %v6047_v21  ;;  %v7846_v13 = vpop.f32.mrb[54].mxu0 }
0x40b2   :  { %v6050_v15 = vsub.f32 %v7846_v13, %v10238_v2  ;;  %v5919_v61 = vpop.f32.mrb[55].mxu0 }
0x40b3   :  { %v6078_v62 = vadd.f32 %v6077_v43, %v6063_v48  ;;  %v6049_v55 = vsub.f32 %v5919_v61, %v10241_v63 }
0x40b4   :  { %v6066_v8 = vmul.f32 %v6050_v15, %v6050_v15 }
0x40b5   :  { %v6065_v16 = vmul.f32 %v6049_v55, %v6049_v55  ;;  %v6079_v23 = vadd.f32 %v6078_v62, %v6064_v22  ;;  %v7849_v51 = vpop.f32.mrb[56].mxu0  ;;  %v10299_v22 = vsel %vm6011_vm6, 1.0, %v8597_v1 }
0x40b6   :  { %v6052_v50 = vsub.f32 %v7849_v51, %v10250_v31  ;;  %v5929_v52 = vpop.f32.mrb[57].mxu0 }
0x40b7   :  { %v6080_v3 = vadd.f32 %v6079_v23, %v6065_v16  ;;  %v6051_v29 = vsub.f32 %v5929_v52, %v10253_v37 }
0x40b8   :  { %v6068_v32 = vmul.f32 %v6052_v50, %v6052_v50 }
0x40b9   :  { %v6067_v33 = vmul.f32 %v6051_v29, %v6051_v29  ;;  %v6081_v38 = vadd.f32 %v6080_v3, %v6066_v8  ;;  %v7852_v27 = vpop.f32.mrb[58].mxu0 }
0x40ba   :  { %v6054_v28 = vsub.f32 %v7852_v27, %v10262_v25  ;;  %v5939_v30 = vpop.f32.mrb[59].mxu0 }
0x40bb   :  { %v6082_v56 = vadd.f32 %v6081_v38, %v6067_v33  ;;  %v6053_v53 = vsub.f32 %v5939_v30, %v10265_v26 }
0x40bc   :  { %v6070_v47 = vmul.f32 %v6054_v28, %v6054_v28 }
0x40bd   :  { %v6069_v36 = vmul.f32 %v6053_v53, %v6053_v53  ;;  %v6083_v19 = vadd.f32 %v6082_v56, %v6068_v32  ;;  %v7855_v4 = vpop.f32.mrb[60].mxu0 }
0x40be   :  { %v6056_v49 = vsub.f32 %v7855_v4, %v10274_v42  ;;  %v5949_v57 = vpop.f32.mrb[61].mxu0 }
0x40bf   :  { %v6084_v58 = vadd.f32 %v6083_v19, %v6069_v36  ;;  %v6055_v39 = vsub.f32 %v5949_v57, %v10277_v17 }
0x40c0   :  { %v6072_v20 = vmul.f32 %v6056_v49, %v6056_v49 }
0x40c1   :  { %v6071_v18 = vmul.f32 %v6055_v39, %v6055_v39  ;;  %v6085_v40 = vadd.f32 %v6084_v58, %v6070_v47  ;;  %v7858_v9 = vpop.f32.mrb[62].mxu0 }
0x40c2   :  { %v6058_v14 = vsub.f32 %v7858_v9, %v10286_v7  ;;  %v5959_v41 = vpop.f32.mrb[63].mxu0 }
0x40c3   :  { %v6086_v43 = vadd.f32 %v6085_v40, %v6071_v18  ;;  %v6057_v21 = vsub.f32 %v5959_v41, %v10289_v11 }
0x40c4   :  { %v6074_v48 = vmul.f32 %v6058_v14, %v6058_v14 }
0x40c5   :  { %v6073_v13 = vmul.f32 %v6057_v21, %v6057_v21  ;;  %v6087_v24 = vadd.f32 %v6086_v43, %v6072_v20  ;;  %v7861_v15 = vpop.f32.mrb[64].mxu0 }
0x40c6   :  { %v6060_v61 = vsub.f32 %v7861_v15, %v10296_v10  ;;  %v5969_v62 = vpop.f32.mrb[65].mxu0 }
0x40c7   :  { %v6088_v59 = vadd.f32 %v6087_v24, %v6073_v13  ;;  %v6059_v55 = vsub.f32 %v5969_v62, %v10299_v22 }
0x40c8   :  { %v6076_v35 = vmul.f32 %v6060_v61, %v6060_v61 }
0x40c9   :  { %v6075_v5 = vmul.f32 %v6059_v55, %v6059_v55  ;;  %v6089_v8 = vadd.f32 %v6088_v59, %v6074_v48  ;;  %v7928_v51 = vpop.f32.mrb[66].mxu0 }
0x40ca   :  { %v6485_v1 = vsub.f32 %v7928_v51, %v10214_v34  ;;  %v6465_v50 = vpop.f32.mrb[67].mxu0 }
0x40cb   :  { %v6090_v16 = vadd.f32 %v6089_v8, %v6075_v5  ;;  %v6484_v52 = vsub.f32 %v6465_v50, %v10217_v6  ;;  %v8548_v8 = vld [vmem:[%s10387_s12 + $0x10] sm:$0x3f]  ;;  %s8616_s12 = smov [#allocation2]  }
0x40cc   :  { %v6489_v3 = vmul.f32 %v6485_v1, %v6485_v1  ;;  %s6891_s7 = sshll.u32 %s8616_s12, 4  ;;  %s6892_s7 = int_to_ptr.vmem [resolvable:$true] %s6891_s7 }
0x40cd   :  { %v6091_v23 = vadd.f32 %v6090_v16, %v6076_v35  ;;  %v6488_v29 = vmul.f32 %v6484_v52, %v6484_v52  ;;  %v7931_v45 = vpop.f32.mrb[68].mxu0  ;;  %v5696_v16 = vrot.slane %v8548_v8, %v9202_v0  ;;  %s8549_s2 = scalar_lea.vmem %s6892_s7, 32  ;;  %p8554_p1 = scmp.lt.s32.totalorder %s6892_s7, %s6892_s7 }
0x40ce   :  { %v6493_v46 = vsel %vm10501_vm7, %v6489_v3, 0.0  ;;  %v6487_v32 = vsub.f32 %v7931_v45, %v10226_v44  ;;  %v6475_v33 = vpop.f32.mrb[69].mxu0  ;;  %p8550_p0 = scmp.ne.s32.totalorder %s6892_s7, %s8549_s2  ;;  %p8555_p2 = scmp.lt.s32.totalorder %s8549_s2, %s8549_s2 }
0x40cf   :  { %6092 = vadd.xlane.f32.xlu1 %v6091_v23  ;;  %v6492_v38 = vsel %vm10502_vm15, %v6488_v29, 0.0  ;;  %v6486_v27 = vsub.f32 %v6475_v33, %v10229_v12 }
0x40d0   :  { %v6494_v28 = vadd.f32 %v6493_v46, %v6492_v38  ;;  %v6491_v30 = vmul.f32 %v6487_v32, %v6487_v32  ;;  %p8556_p3 = por %p8555_p2, %p8554_p1 }
0x40d1   :  { %v6490_v56 = vmul.f32 %v6486_v27, %v6486_v27 }
0x40d2   :  { %v6497_v47 = vsel %vm10504_vm4, %v6491_v30, 0.0  ;;  %p8557_p4 = pnand %p8556_p3, %p8550_p0 }
0x40d3   :  { %v6495_v60 = vsel %vm10503_vm1, %v6490_v56, 0.0 }
0x40d4   :  { %v6496_v36 = vadd.f32 %v6495_v60, %v6494_v28 }
0x40d6   :  { %v10314_v20 = vadd.f32 %v6497_v47, %v6496_v36 }
0x40d9   :  { %v7942_v53 = vpop.f32.mrb[70].mxu0 }
0x40da   :  { %v6620_v54 = vsub.f32 %v7942_v53, %v10214_v34  ;;  %v6600_v4 = vpop.f32.mrb[71].mxu0 }
0x40db   :  { %v6619_v49 = vsub.f32 %v6600_v4, %v10217_v6 }
0x40dc   :  { %v6624_v19 = vmul.f32 %v6620_v54, %v6620_v54 }
0x40dd   :  { %v7945_v57 = vpop.f32.mrb[72].mxu0  ;;  %v6623_v40 = vmul.f32 %v6619_v49, %v6619_v49 }
0x40de   :  { %v6622_v58 = vsub.f32 %v7945_v57, %v10226_v44  ;;  %v6610_v39 = vpop.f32.mrb[73].mxu0  ;;  %v6628_v18 = vsel %vm10505_vm8, %v6624_v19, 0.0 }
0x40df   :  { %v6621_v9 = vsub.f32 %v6610_v39, %v10229_v12  ;;  %v6627_v41 = vsel %vm10506_vm9, %v6623_v40, 0.0 }
0x40e0   :  { %v6626_v14 = vmul.f32 %v6622_v58, %v6622_v58  ;;  %v6629_v21 = vadd.f32 %v6628_v18, %v6627_v41 }
0x40e1   :  { %v6625_v43 = vmul.f32 %v6621_v9, %v6621_v9  ;;  %v6857_v61 = vpop.f32.mrb[74].mxu0 }
0x40e2   :  { %v6632_v13 = vsel %vm10508_vm12, %v6626_v14, 0.0  ;;  %v6861_v62 = vsub.f32 %v6857_v61, %v10217_v6  ;;  %v6859_v59 = vpop.f32.mrb[75].mxu0 }
0x40e3   :  { %v6630_v48 = vsel %vm10507_vm10, %v6625_v43, 0.0 }
0x40e4   :  { %v6631_v24 = vadd.f32 %v6630_v48, %v6629_v21  ;;  %v6862_v55 = vmul.f32 %v6861_v62, %v6861_v62 }
0x40e6   :  { %v6633_v15 = vadd.f32 %v6632_v13, %v6631_v24  ;;  %v6864_v35 = vsel %vm6863_vm13, %v6862_v55, 0.0 }
0x40e8   :  { %6634 = vadd.xlane.f32.xlu1 %v6633_v15 }
0x40ec   :  { %6865 = vadd.xlane.f32.xlu1 %v6864_v35 }
0x410d   :  { %v7342_v5 = vpop.f32.mrb[52].mxu1 }
0x410e   :  { %v7343_v23 = vpop.f32.mrb[53].mxu1 }
0x410f   :  { %v7344_v51 = vadd.f32 %v7343_v23, %v7342_v5 }
0x4111   :  { %v5764_v1 = vadd.f32 %v7344_v51, %v5696_v16 }
0x4113   :  { %5768 = vst.msk [vmem:[#allocation2] sm:$0x3] %vm5767_vm0, %v5764_v1 }
0x414d   :  { %v7896_v50 = vpop.f32.mrb[54].mxu1 }
0x414e   :  { %v6319_v52 = vsub.f32 %v7896_v50, %v10214_v34  ;;  %v6239_v3 = vpop.f32.mrb[55].mxu1 }
0x414f   :  { %v6318_v29 = vsub.f32 %v6239_v3, %v10217_v6 }
0x4150   :  { %v6335_v45 = vmul.f32 %v6319_v52, %v6319_v52 }
0x4151   :  { %v6334_v46 = vmul.f32 %v6318_v29, %v6318_v29  ;;  %v7899_v32 = vpop.f32.mrb[56].mxu1 }
0x4152   :  { %v6249_v33 = vpop.f32.mrb[57].mxu1  ;;  %v6321_v27 = vsub.f32 %v7899_v32, %v10226_v44 }
0x4153   :  { %v6350_v38 = vadd.f32 %v6335_v45, %v6334_v46  ;;  %v6320_v0 = vsub.f32 %v6249_v33, %v10229_v12 }
0x4154   :  { %v6337_v53 = vmul.f32 %v6321_v27, %v6321_v27 }
0x4155   :  { %v6336_v28 = vmul.f32 %v6320_v0, %v6320_v0  ;;  %v7902_v30 = vpop.f32.mrb[58].mxu1 }
0x4156   :  { %v6259_v56 = vpop.f32.mrb[59].mxu1  ;;  %v6323_v54 = vsub.f32 %v7902_v30, %v10238_v2 }
0x4157   :  { %v6351_v60 = vadd.f32 %v6350_v38, %v6336_v28  ;;  %v6322_v47 = vsub.f32 %v6259_v56, %v10241_v63 }
0x4158   :  { %v6339_v58 = vmul.f32 %v6323_v54, %v6323_v54 }
0x4159   :  { %v6338_v36 = vmul.f32 %v6322_v47, %v6322_v47  ;;  %v6352_v19 = vadd.f32 %v6351_v60, %v6337_v53  ;;  %v7905_v4 = vpop.f32.mrb[60].mxu1 }
0x415a   :  { %v6325_v49 = vsub.f32 %v7905_v4, %v10250_v31  ;;  %v6269_v57 = vpop.f32.mrb[61].mxu1 }
0x415b   :  { %v6353_v39 = vadd.f32 %v6352_v19, %v6338_v36  ;;  %v6324_v18 = vsub.f32 %v6269_v57, %v10253_v37 }
0x415c   :  { %v6341_v41 = vmul.f32 %v6325_v49, %v6325_v49  ;;  %v6093_v21 = vpop.xlane.xlu1 %6092 }
0x415d   :  { %v6340_v40 = vmul.f32 %v6324_v18, %v6324_v18  ;;  %v6354_v9 = vadd.f32 %v6353_v39, %v6339_v58  ;;  %v7908_v14 = vpop.f32.mrb[62].mxu1  ;;  %v6094_v13 = vrot.slane %v6093_v21, 4 }
0x415e   :  { %v6279_v43 = vpop.f32.mrb[63].mxu1  ;;  %v6327_v2 = vsub.f32 %v7908_v14, %v10262_v25 }
0x415f   :  { %v6355_v48 = vadd.f32 %v6354_v9, %v6340_v40  ;;  %v6326_v63 = vsub.f32 %v6279_v43, %v10265_v26  ;;  %v6095_v61 = vadd.f32 %v6094_v13, %v6093_v21 }
0x4160   :  { %v6343_v37 = vmul.f32 %v6327_v2, %v6327_v2 }
0x4161   :  { %v6342_v24 = vmul.f32 %v6326_v63, %v6326_v63  ;;  %v6356_v15 = vadd.f32 %v6355_v48, %v6341_v41  ;;  %v7911_v31 = vpop.f32.mrb[64].mxu1  ;;  %v6096_v5 = vrot.slane %v6095_v61, 2 }
0x4162   :  { %v6329_v62 = vsub.f32 %v7911_v31, %v10274_v42  ;;  %v6289_v59 = vpop.f32.mrb[65].mxu1 }
0x4163   :  { %v6357_v55 = vadd.f32 %v6356_v15, %v6342_v24  ;;  %v6328_v35 = vsub.f32 %v6289_v59, %v10277_v17  ;;  %v6097_v51 = vadd.f32 %v6096_v5, %v6095_v61 }
0x4164   :  { %v6345_v25 = vmul.f32 %v6329_v62, %v6329_v62 }
0x4165   :  { %v6344_v8 = vmul.f32 %v6328_v35, %v6328_v35  ;;  %v6358_v16 = vadd.f32 %v6357_v55, %v6343_v37  ;;  %v7914_v23 = vpop.f32.mrb[66].mxu1  ;;  %v6098_v3 = vrot.slane %v6097_v51, 1 }
0x4166   :  { %v6299_v1 = vpop.f32.mrb[67].mxu1  ;;  %v6331_v50 = vsub.f32 %v7914_v23, %v10286_v7 }
0x4167   :  { %v6359_v26 = vadd.f32 %v6358_v16, %v6344_v8  ;;  %v6330_v52 = vsub.f32 %v6299_v1, %v10289_v11  ;;  %v6099_v46 = vadd.f32 %v6098_v3, %v6097_v51 }
0x4168   :  { %v6347_v33 = vmul.f32 %v6331_v50, %v6331_v50 }
0x4169   :  { %v6346_v29 = vmul.f32 %v6330_v52, %v6330_v52  ;;  %v6360_v42 = vadd.f32 %v6359_v26, %v6345_v25  ;;  %v7917_v45 = vpop.f32.mrb[68].mxu1  ;;  %8260 = vpush %v6099_v46 }
0x416a   :  { %v6309_v32 = vpop.f32.mrb[69].mxu1  ;;  %v6333_v38 = vsub.f32 %v7917_v45, %v10296_v10 }
0x416b   :  { %v6361_v17 = vadd.f32 %v6360_v42, %v6346_v29  ;;  %v6332_v27 = vsub.f32 %v6309_v32, %v10299_v22 }
0x416c   :  { %v6349_v11 = vmul.f32 %v6333_v38, %v6333_v38 }
0x416d   :  { %v6348_v0 = vmul.f32 %v6332_v27, %v6332_v27  ;;  %v6362_v28 = vadd.f32 %v6361_v17, %v6347_v33  ;;  %v7956_v30 = vpop.f32.mrb[70].mxu1 }
0x416e   :  { %v6755_v7 = vsub.f32 %v7956_v30, %v10214_v34  ;;  %v6735_v56 = vpop.f32.mrb[71].mxu1 }
0x416f   :  { %v6363_v53 = vadd.f32 %v6362_v28, %v6348_v0  ;;  %v6754_v60 = vsub.f32 %v6735_v56, %v10217_v6 }
0x4170   :  { %v6759_v54 = vmul.f32 %v6755_v7, %v6755_v7 }
0x4171   :  { %v6758_v47 = vmul.f32 %v6754_v60, %v6754_v60  ;;  %v7959_v36 = vpop.f32.mrb[72].mxu1  ;;  %v6364_v19 = vadd.f32 %v6363_v53, %v6349_v11 }
0x4172   :  { %v6763_v4 = vsel %vm10509_vm2, %v6759_v54, 0.0  ;;  %v6757_v10 = vsub.f32 %v7959_v36, %v10226_v44  ;;  %v6745_v22 = vpop.f32.mrb[73].mxu1 }
0x4173   :  { %v6762_v49 = vsel %vm10510_vm3, %v6758_v47, 0.0  ;;  %v6756_v57 = vsub.f32 %v6745_v22, %v10229_v12  ;;  %6365 = vadd.xlane.f32.xlu0 %v6364_v19 }
0x4174   :  { %v6764_v34 = vadd.f32 %v6763_v4, %v6762_v49  ;;  %v6761_v58 = vmul.f32 %v6757_v10, %v6757_v10 }
0x4175   :  { %v6760_v39 = vmul.f32 %v6756_v57, %v6756_v57 }
0x4176   :  { %v6767_v40 = vsel %vm10512_vm5, %v6761_v58, 0.0 }
0x4177   :  { %v6765_v18 = vsel %vm10511_vm11, %v6760_v39, 0.0  ;;  %6499 = vadd.xlane.f32.xlu0 %v10314_v20 }
0x4178   :  { %v6766_v6 = vadd.f32 %v6765_v18, %v6764_v34 }
0x417a   :  { %v6768_v9 = vadd.f32 %v6767_v40, %v6766_v6 }
0x417c   :  { %6769 = vadd.xlane.f32.xlu0 %v6768_v9 }
0x417d   :  { %8560 = shalt.err (!%p8557_p4)
}
0x417e   :  { %s8561_s5 = scalar_lea.hbm %s10392_s17, 32 }
0x417f   :  { %p8562_p5 = scmp.ne.s32.totalorder %s10392_s17, %s8561_s5  ;;  %p8565_p6 = scmp.lt.u32.totalorder %s8561_s5, %s10392_s17 }
0x4181   :  { %p8567_p7 = pnand %p8565_p6, %p8562_p5 }
0x4183   :  { %8570 = shalt.err (!%p8567_p7)
}
0x4184   :  { %6894 = dma.vmem_to_hbm [thread:$0]  %s6892_s7, 32, %s10392_s17, [#allocation3]   ;;  %v6635_v44 = vpop.xlane.xlu1 %6634  ;;  %vm6883_vm2 = vcmask 0  }
0x4185   :  { %v6636_v12 = vrot.slane %v6635_v44, 4  ;;  %s8617_s26 = smov [#allocation4]  }
0x4186   :  { %s6901_s0 = sshll.u32 %s8617_s26, 4  ;;  %s6902_s0 = int_to_ptr.vmem [resolvable:$true] %s6901_s0 }
0x4187   :  { %v6637_v14 = vadd.f32 %v6636_v12, %v6635_v44  ;;  %s8571_s16 = scalar_lea.vmem %s6902_s0, 16  ;;  %s8575_s19 = scalar_lea.vmem %s6902_s0, 32 }
0x4188   :  { %v6866_v20 = vpop.xlane.xlu1 %6865  ;;  %p8572_p8 = scmp.ne.s32.totalorder %s6902_s0, %s8571_s16  ;;  %p8576_p9 = scmp.lt.s32.totalorder %s6902_s0, %s6902_s0 }
0x4189   :  { %v6867_v21 = vrot.slane %v6866_v20, 4  ;;  %v6638_v2 = vrot.slane %v6637_v14, 2  ;;  %p8577_p10 = scmp.lt.s32.totalorder %s8575_s19, %s8571_s16 }
0x418b   :  { %v6868_v15 = vadd.f32 %v6867_v21, %v6866_v20  ;;  %v6639_v62 = vadd.f32 %v6638_v2, %v6637_v14  ;;  %p8578_p11 = por %p8577_p10, %p8576_p9 }
0x418d   :  { %v6869_v37 = vrot.slane %v6868_v15, 2  ;;  %v6640_v51 = vrot.slane %v6639_v62, 1  ;;  %p8579_p12 = pnand %p8578_p11, %p8572_p8 }
0x418f   :  { %v6870_v25 = vadd.f32 %v6869_v37, %v6868_v15  ;;  %v6641_v3 = vadd.f32 %v6640_v51, %v6639_v62 }
0x4191   :  { %v6871_v29 = vrot.slane %v6870_v25, 1 }
0x4193   :  { %v6872_v46 = vadd.f32 %v6871_v29, %v6870_v25 }
0x419a   :  { %s8261_s17 = spop %8260 }
0x419b   :  { %v6101_v32 = vstv %s8261_s17 }
0x419c   :  { %8535 = vrsqrt.f32 %v6101_v32  ;;  %vm6104_vm14 = vcmp.eq.f32.partialorder %v6101_v32, inf  ;;  %v6107_v11 = vand.u32 2147483648, %v6101_v32  ;;  %vm6106_vm7 = vcmp.eq.f32.partialorder %v6101_v32, 0.0 }
0x41a6   :  { %v8536_v27 = vpop.eup %8535 }
0x41a7   :  { %v6103_v28 = vmul.f32 %v8536_v27, %v6101_v32 }
0x41a9   :  { %v6105_v60 = vsel %vm6104_vm14, %v6101_v32, %v6103_v28 }
0x41aa   :  { %v6108_v10 = vsel %vm6106_vm7, %v6107_v11, %v6105_v60 }
0x4200   :  { %v6366_v41 = vpop.xlane.xlu0 %6365 }
0x4201   :  { %v6367_v43 = vrot.slane %v6366_v41, 4 }
0x4203   :  { %v6368_v48 = vadd.f32 %v6367_v43, %v6366_v41 }
0x4204   :  { %v6500_v63 = vpop.xlane.xlu0 %6499 }
0x4205   :  { %v6369_v13 = vrot.slane %v6368_v48, 2  ;;  %v6501_v24 = vrot.slane %v6500_v63, 4 }
0x4207   :  { %v6502_v31 = vadd.f32 %v6501_v24, %v6500_v63  ;;  %v6370_v61 = vadd.f32 %v6369_v13, %v6368_v48 }
0x4209   :  { %v6503_v59 = vrot.slane %v6502_v31, 2  ;;  %v6770_v55 = vpop.xlane.xlu0 %6769  ;;  %v6371_v35 = vrot.slane %v6370_v61, 1 }
0x420a   :  { %v6771_v5 = vrot.slane %v6770_v55, 4 }
0x420b   :  { %v6372_v8 = vadd.f32 %v6371_v35, %v6370_v61  ;;  %v6504_v16 = vadd.f32 %v6503_v59, %v6502_v31 }
0x420c   :  { %v6772_v23 = vadd.f32 %v6771_v5, %v6770_v55 }
0x420d   :  { %8262 = vpush %v6372_v8  ;;  %v6505_v1 = vrot.slane %v6504_v16, 1 }
0x420e   :  { %v6773_v26 = vrot.slane %v6772_v23, 2 }
0x420f   :  { %v6506_v50 = vadd.f32 %v6505_v1, %v6504_v16 }
0x4210   :  { %v6774_v52 = vadd.f32 %v6773_v26, %v6772_v23 }
0x4211   :  { %8264 = vpush %v6506_v50 }
0x4212   :  { %8266 = vpush %v6641_v3  ;;  %v6775_v42 = vrot.slane %v6774_v52, 1 }
0x4214   :  { %v6776_v45 = vadd.f32 %v6775_v42, %v6774_v52 }
0x4216   :  { %8268 = vpush %v6776_v45 }
0x4217   :  { %8270 = vpush %v6872_v46 }
0x423e   :  { %s8263_s4 = spop %8262 }
0x423f   :  { %v6374_v33 = vstv %s8263_s4 }
0x4240   :  { %8537 = vrsqrt.f32 %v6374_v33  ;;  %vm6377_vm6 = vcmp.eq.f32.partialorder %v6374_v33, inf  ;;  %v6380_v53 = vand.u32 2147483648, %v6374_v33  ;;  %vm6379_vm15 = vcmp.eq.f32.partialorder %v6374_v33, 0.0 }
0x4242   :  { %s8265_s9 = spop %8264 }
0x4243   :  { %v6508_v17 = vstv %s8265_s9  ;;  %s8267_s22 = spop %8266 }
0x4244   :  { %8539 = vrsqrt.f32 %v6508_v17  ;;  %v6643_v38 = vstv %s8267_s22  ;;  %vm6511_vm1 = vcmp.eq.f32.partialorder %v6508_v17, inf  ;;  %v6514_v22 = vand.u32 2147483648, %v6508_v17 }
0x4245   :  { %8541 = vrsqrt.f32 %v6643_v38  ;;  %vm6513_vm4 = vcmp.eq.f32.partialorder %v6508_v17, 0.0  ;;  %vm6646_vm8 = vcmp.eq.f32.partialorder %v6643_v38, inf  ;;  %v6649_v58 = vand.u32 2147483648, %v6643_v38 }
0x4246   :  { %vm6648_vm9 = vcmp.eq.f32.partialorder %v6643_v38, 0.0 }
0x4247   :  { %s8269_s30 = spop %8268 }
0x4248   :  { %v6778_v0 = vstv %s8269_s30  ;;  %s8271_s3 = spop %8270 }
0x4249   :  { %8543 = vrsqrt.f32 %v6778_v0  ;;  %v6874_v30 = vstv %s8271_s3  ;;  %vm6781_vm10 = vcmp.eq.f32.partialorder %v6778_v0, inf  ;;  %v6784_v20 = vand.u32 2147483648, %v6778_v0 }
0x424a   :  { %v8538_v7 = vpop.eup %8537  ;;  %8545 = vrsqrt.f32 %v6874_v30  ;;  %vm6877_vm12 = vcmp.eq.f32.partialorder %v6874_v30, inf  ;;  %vm6783_vm13 = vcmp.eq.f32.partialorder %v6778_v0, 0.0  ;;  %v6880_v21 = vand.u32 2147483648, %v6874_v30 }
0x424b   :  { %v6376_v56 = vmul.f32 %v8538_v7, %v6374_v33  ;;  %vm6879_vm0 = vcmp.eq.f32.partialorder %v6874_v30, 0.0 }
0x424d   :  { %v6378_v54 = vsel %vm6377_vm6, %v6374_v33, %v6376_v56 }
0x424e   :  { %v8540_v47 = vpop.eup %8539  ;;  %v6381_v36 = vsel %vm6379_vm15, %v6380_v53, %v6378_v54 }
0x424f   :  { %v6510_v19 = vmul.f32 %v8540_v47, %v6508_v17  ;;  %v8542_v4 = vpop.eup %8541  ;;  %v6382_v34 = vadd.f32 %v6381_v36, %v6108_v10 }
0x4250   :  { %v6645_v57 = vmul.f32 %v8542_v4, %v6643_v38 }
0x4251   :  { %v6512_v49 = vsel %vm6511_vm1, %v6508_v17, %v6510_v19 }
0x4252   :  { %v6515_v39 = vsel %vm6513_vm4, %v6514_v22, %v6512_v49  ;;  %v6647_v6 = vsel %vm6646_vm8, %v6643_v38, %v6645_v57 }
0x4253   :  { %v8544_v18 = vpop.eup %8543  ;;  %v6516_v40 = vadd.f32 %v6515_v39, %v6382_v34  ;;  %v6650_v12 = vsel %vm6648_vm9, %v6649_v58, %v6647_v6 }
0x4254   :  { %v8546_v9 = vpop.eup %8545  ;;  %v6780_v44 = vmul.f32 %v8544_v18, %v6778_v0 }
0x4255   :  { %v6876_v14 = vmul.f32 %v8546_v9, %v6874_v30  ;;  %v6651_v41 = vadd.f32 %v6650_v12, %v6516_v40 }
0x4256   :  { %v6782_v43 = vsel %vm6781_vm10, %v6778_v0, %v6780_v44 }
0x4257   :  { %v6785_v48 = vsel %vm6783_vm13, %v6784_v20, %v6782_v43  ;;  %v6878_v2 = vsel %vm6877_vm12, %v6874_v30, %v6876_v14 }
0x4258   :  { %v6786_v63 = vadd.f32 %v6785_v48, %v6651_v41  ;;  %v6881_v13 = vsel %vm6879_vm0, %v6880_v21, %v6878_v2 }
0x425a   :  { %v6882_v24 = vadd.f32 %v6881_v13, %v6786_v63 }
0x425c   :  { %6884 = vst.msk [vmem:[#allocation4] sm:$0x1] %vm6883_vm2, %v6882_v24 }
0x425d   :  { %8582 = shalt.err (!%p8579_p12)
}
0x425e   :  { %s8583_s14 = scalar_lea.hbm %s10393_s18, 16 }
0x425f   :  { %p8584_p13 = scmp.ne.s32.totalorder %s10393_s18, %s8583_s14  ;;  %p8587_p0 = scmp.lt.u32.totalorder %s8583_s14, %s10393_s18 }
0x4261   :  { %p8589_p1 = pnand %p8587_p0, %p8584_p13 }
0x4263   :  { %8592 = shalt.err (!%p8589_p1)
}
0x4264   :  { %6904 = dma.vmem_to_hbm [thread:$0]  %s6902_s0, 16, %s10393_s18, [#allocation5]  }
0x4265   :  { %8593 = dma.done.wait [#allocation3], 32  }
0x4266   :  { %8594 = vsyncadd [#allocation3], 4294967264 }
0x4267   :  { %8595 = dma.done.wait [#allocation5], 16  }
0x4268   :  { %8596 = vsyncadd [#allocation5], 4294967280 }
0x4269   :  { %6911 = vsyncpa [#allocation3], 1 }
0x426a   :  { %6912 = vsyncpa [#allocation5], 1 }

</bundles_post_ra>
